<compile_context>
chip_gen: v7x
topology: tpu7x:2x2x1
jax: 0.10.0
libtpu: 0.0.40
codegen_flags: <defaults>
</compile_context>

<pallas_src>
import jax
import jax.numpy as jnp
from jax import lax
from jax.experimental import pallas as pl
from jax.experimental.pallas import tpu as pltpu


# ------------------------------ Pallas kernel -------------------------------

def _lstm2_kernel(x_ref, wih0_ref, whh0_ref, b0_ref,
                  w1top_ref, w1bot_ref, whh1_ref, b1_ref,
                  wout_ref, bout_ref,
                  logits_ref,
                  g_scr, q_scr, a_scr, brev_scr):
    """Fused 2-layer bidirectional LSTM + classifier head.

    x_ref:      (T, B, E)     bf16 time-major embedded input
    wih0_ref:   (E, 8H)       bf16 [W_ih_fwd | W_ih_bwd], gate order [i,f,o,g]
    whh0_ref:   (2, H, 4H)    bf16 per-direction recurrent weights
    b0_ref:     (1, 8H)       f32  [b_fwd | b_bwd] (b_ih + b_hh)
    w1top_ref:  (H, 8H)       bf16 layer-1 W_ih rows that multiply h_fwd(l0)
    w1bot_ref:  (H, 8H)       bf16 layer-1 W_ih rows that multiply h_bwd(l0)
    whh1_ref:   (2, H, 4H)    bf16
    b1_ref:     (1, 8H)       f32
    wout_ref:   (H, C)        bf16 classifier weight
    bout_ref:   (1, C)        f32  classifier bias
    logits_ref: (4B, C)       f32  tag_space, PyTorch h_n row order
    scratch:    g_scr/q_scr (T,B,8H) f32 hoisted gate inputs,
                a_scr/brev_scr (T,B,H) bf16 layer-0 fwd/bwd hidden sequences
                (a_scr time-ordered, brev_scr reverse-time-ordered).
    """
    T, B, E = x_ref.shape
    H = whh0_ref.shape[1]
    H4 = 4 * H

    def bidir_pass(whh_ref, load_g, store_out):
        whh_f = whh_ref[0]                      # (H, 4H) bf16
        whh_b = whh_ref[1]

        def step(s, carry):
            hf, hb, cf, cb = carry              # (B, H) f32 each
            # Two independent direction chains interleaved per iteration.
            rec_f = jnp.dot(hf.astype(jnp.bfloat16), whh_f,
                            preferred_element_type=jnp.float32)   # (B, 4H)
            rec_b = jnp.dot(hb.astype(jnp.bfloat16), whh_b,
                            preferred_element_type=jnp.float32)
            r = T - 1 - s
            gf_in, gb_in = load_g(s, r)         # fwd gates @ time s, bwd @ T-1-s
            gf = gf_in + rec_f
            gb = gb_in + rec_b
            # gate columns reordered at init: [i | f | o | g]
            sf = jax.nn.sigmoid(gf[:, 0:3 * H])
            tgf = jnp.tanh(gf[:, 3 * H:])
            sb = jax.nn.sigmoid(gb[:, 0:3 * H])
            tgb = jnp.tanh(gb[:, 3 * H:])
            cf_n = sf[:, H:2 * H] * cf + sf[:, 0:H] * tgf
            cb_n = sb[:, H:2 * H] * cb + sb[:, 0:H] * tgb
            hf_n = sf[:, 2 * H:3 * H] * jnp.tanh(cf_n)
            hb_n = sb[:, 2 * H:3 * H] * jnp.tanh(cb_n)
            if store_out is not None:
                store_out(s, hf_n, hb_n)
            return hf_n, hb_n, cf_n, cb_n

        z = jnp.zeros((B, H), jnp.float32)
        # NOTE: unroll does not break the per-direction serial dependence; it
        # only removes loop overhead and exposes the two independent chains.
        hf_fin, hb_fin, _, _ = lax.fori_loop(
            0, T, step, (z, z, z, z), unroll=True if T <= 16 else 4)
        return hf_fin, hb_fin

    # ------------------------------- layer 0 --------------------------------
    # Hoisted fused input projection: both directions in one MXU matmul.
    x_flat = x_ref[...].reshape(T * B, E)                         # bf16
    g_scr[...] = (jnp.dot(x_flat, wih0_ref[...],
                          preferred_element_type=jnp.float32)
                  + b0_ref[...]).reshape(T, B, 2 * H4)

    def load_g0(s, r):
        return g_scr[s][:, 0:H4], g_scr[r][:, H4:2 * H4]

    def store_out0(s, hf_n, hb_n):
        a_scr[s] = hf_n.astype(jnp.bfloat16)        # fwd hidden at time s
        brev_scr[s] = hb_n.astype(jnp.bfloat16)     # bwd hidden at time T-1-s

    hf0, hb0 = bidir_pass(whh0_ref, load_g0, store_out0)

    # ------------------------------- layer 1 --------------------------------
    # Hoisted input projection from the in-VMEM layer-0 hidden sequence.
    a_flat = a_scr[...].reshape(T * B, H)           # time-ordered fwd hiddens
    b_flat = brev_scr[...].reshape(T * B, H)        # reverse-ordered bwd hiddens
    g_scr[...] = (jnp.dot(a_flat, w1top_ref[...],
                          preferred_element_type=jnp.float32)
                  + b1_ref[...]).reshape(T, B, 2 * H4)
    q_scr[...] = jnp.dot(b_flat, w1bot_ref[...],
                         preferred_element_type=jnp.float32).reshape(T, B, 2 * H4)

    def load_g1(s, r):
        # g_scr[t]  : contribution of h_fwd_l0(t)      (+ bias), time order
        # q_scr[u]  : contribution of h_bwd_l0(T-1-u),           reverse order
        ps = g_scr[s]
        pr = g_scr[r]
        qs = q_scr[s]
        qr = q_scr[r]
        return (ps[:, 0:H4] + qr[:, 0:H4],
                pr[:, H4:2 * H4] + qs[:, H4:2 * H4])

    hf1, hb1 = bidir_pass(whh1_ref, load_g1, None)

    # --------------------------- fused classifier head ----------------------
    # PyTorch h_n order: [l0_fwd, l0_bwd, l1_fwd, l1_bwd] -> view(-1, H) -> Linear
    h_n = jnp.concatenate([hf0, hb0, hf1, hb1], axis=0)           # (4B, H) f32
    logits_ref[...] = (jnp.dot(h_n.astype(jnp.bfloat16), wout_ref[...],
                               preferred_element_type=jnp.float32)
                       + bout_ref[...])


# --------------------------------- wrapper ----------------------------------

def lstm_classifier_forward(token_ids, kp):
    """token_ids: (B, T) int32, kp: packed kernel params.  Returns (4*B, C)."""
    # Embedding lookup (gather), time-major directly.
    x = jnp.take(kp["emb"], token_ids.T, axis=0)                  # (T, B, E) bf16
    T, B, E = x.shape
    H = kp["whh0"].shape[1]
    H4 = 4 * H
    H8 = 8 * H
    C = kp["wout"].shape[1]

    return pl.pallas_call(
        _lstm2_kernel,
        out_shape=jax.ShapeDtypeStruct((4 * B, C), jnp.float32),
        grid_spec=pltpu.PrefetchScalarGridSpec(
            num_scalar_prefetch=0,
            grid=(1,),
            in_specs=[
                pl.BlockSpec((T, B, E), lambda i: (0, 0, 0)),     # x
                pl.BlockSpec((E, H8), lambda i: (0, 0)),          # W_ih l0 cat
                pl.BlockSpec((2, H, H4), lambda i: (0, 0, 0)),    # W_hh l0
                pl.BlockSpec((1, H8), lambda i: (0, 0)),          # b l0
                pl.BlockSpec((H, H8), lambda i: (0, 0)),          # W_ih l1 top
                pl.BlockSpec((H, H8), lambda i: (0, 0)),          # W_ih l1 bot
                pl.BlockSpec((2, H, H4), lambda i: (0, 0, 0)),    # W_hh l1
                pl.BlockSpec((1, H8), lambda i: (0, 0)),          # b l1
                pl.BlockSpec((H, C), lambda i: (0, 0)),           # W_out
                pl.BlockSpec((1, C), lambda i: (0, 0)),           # b_out
            ],
            out_specs=pl.BlockSpec((4 * B, C), lambda i: (0, 0)),
            scratch_shapes=[
                pltpu.VMEM((T, B, H8), jnp.float32),   # gate inputs / layer-1 P
                pltpu.VMEM((T, B, H8), jnp.float32),   # layer-1 Q (bwd contrib)
                pltpu.VMEM((T, B, H), jnp.bfloat16),   # l0 fwd hidden sequence
                pltpu.VMEM((T, B, H), jnp.bfloat16),   # l0 bwd hidden sequence
            ]),
        compiler_params=pltpu.CompilerParams(
            dimension_semantics=("arbitrary",)),
    )(x, kp["wih0"], kp["whh0"], kp["b0"],
      kp["w1top"], kp["w1bot"], kp["whh1"], kp["b1"],
      kp["wout"], kp["bout"])


# ----------------------- canonical params + packing -------------------------

def init_params(key, v_size, e_size, h_size, c_size):
    """Canonical f32 params: transposed weights (in,4H)/(H,4H), gate order i,f,g,o."""
    ks = iter(jax.random.split(key, 40))
    k = 1.0 / (h_size ** 0.5)

    def u(shape):
        return jax.random.uniform(next(ks), shape, jnp.float32, -k, k)

    emb = jax.random.normal(next(ks), (v_size, e_size), jnp.float32)
    emb = emb.at[0].set(0.0)                       # padding_idx=0

    def layer(in_size):
        return {
            "w_ih": jnp.stack([u((in_size, 4 * h_size)) for _ in range(2)]),
            "w_hh": jnp.stack([u((h_size, 4 * h_size)) for _ in range(2)]),
            "b": jnp.stack([u((1, 4 * h_size)) + u((1, 4 * h_size))
                            for _ in range(2)]),
        }

    return {"embedding": emb,
            "l0": layer(e_size),
            "l1": layer(2 * h_size),
            "w_out": u((h_size, c_size)),
            "b_out": u((1, c_size))}


def pack_params(p):
    """Kernel layout: gate reorder [i,f,o,g], direction-concat W_ih, bf16 weights."""
    H = p["l0"]["w_hh"].shape[1]

    def reord(w):   # columns [i,f,g,o] -> [i,f,o,g]
        return jnp.concatenate(
            [w[..., 0:2 * H], w[..., 3 * H:4 * H], w[..., 2 * H:3 * H]], axis=-1)

    def pack_layer(lp):
        w_ih = reord(lp["w_ih"])                                  # (2, in, 4H)
        w_hh = reord(lp["w_hh"])                                  # (2, H, 4H)
        b = reord(lp["b"])                                        # (2, 1, 4H)
        wih_cat = jnp.concatenate([w_ih[0], w_ih[1]], axis=-1)    # (in, 8H)
        b_cat = jnp.concatenate([b[0], b[1]], axis=-1)            # (1, 8H)
        return wih_cat, w_hh, b_cat

    wih0, whh0, b0 = pack_layer(p["l0"])
    wih1, whh1, b1 = pack_layer(p["l1"])          # wih1: (2H, 8H)
    return {
        "emb": p["embedding"].astype(jnp.bfloat16),
        "wih0": wih0.astype(jnp.bfloat16),
        "whh0": whh0.astype(jnp.bfloat16),
        "b0": b0,
        "w1top": wih1[0:H].astype(jnp.bfloat16),      # multiplies h_fwd(l0)
        "w1bot": wih1[H:2 * H].astype(jnp.bfloat16),  # multiplies h_bwd(l0)
        "whh1": whh1.astype(jnp.bfloat16),
        "b1": b1,
        "wout": p["w_out"].astype(jnp.bfloat16),
        "bout": p["b_out"],
    }


# --------------------------- pure-JAX reference ------------------------------
# Mirrors the kernel's precision choices (bf16 matmul inputs, f32 accumulation,
# f32 gate/state math, bf16 layer-0 outputs) so the comparison is tight.

def _ref_lstm_direction(x_tbe, w_ih, w_hh, b):
    Bc = x_tbe.shape[1]
    H = w_hh.shape[0]
    w_ih_b = w_ih.astype(jnp.bfloat16)
    w_hh_b = w_hh.astype(jnp.bfloat16)

    def step(carry, x_t):
        h, c = carry
        gates = (jnp.dot(x_t, w_ih_b, preferred_element_type=jnp.float32)
                 + jnp.dot(h.astype(jnp.bfloat16), w_hh_b,
                           preferred_element_type=jnp.float32)
                 + b)
        i = jax.nn.sigmoid(gates[:, 0:H])
        f = jax.nn.sigmoid(gates[:, H:2 * H])
        g = jnp.tanh(gates[:, 2 * H:3 * H])
        o = jax.nn.sigmoid(gates[:, 3 * H:4 * H])
        c = f * c + i * g
        h = o * jnp.tanh(c)
        return (h, c), h

    init = (jnp.zeros((Bc, H), jnp.float32), jnp.zeros((Bc, H), jnp.float32))
    (h_fin, _), outs = lax.scan(step, init, x_tbe)
    return outs, h_fin


def ref_forward(token_ids, params):
    emb = params["embedding"].astype(jnp.bfloat16)
    x = jnp.take(emb, token_ids.T, axis=0)                        # (T, B, E)
    l0, l1 = params["l0"], params["l1"]
    out_f0, h_f0 = _ref_lstm_direction(x, l0["w_ih"][0], l0["w_hh"][0], l0["b"][0])
    out_b0, h_b0 = _ref_lstm_direction(jnp.flip(x, 0), l0["w_ih"][1],
                                       l0["w_hh"][1], l0["b"][1])
    x1 = jnp.concatenate([out_f0, jnp.flip(out_b0, 0)],
                         axis=-1).astype(jnp.bfloat16)
    _, h_f1 = _ref_lstm_direction(x1, l1["w_ih"][0], l1["w_hh"][0], l1["b"][0])
    _, h_b1 = _ref_lstm_direction(jnp.flip(x1, 0), l1["w_ih"][1],
                                  l1["w_hh"][1], l1["b"][1])
    h_n = jnp.concatenate([h_f0, h_b0, h_f1, h_b1], axis=0)       # (4B, H)
    return (jnp.dot(h_n.astype(jnp.bfloat16),
                    params["w_out"].astype(jnp.bfloat16),
                    preferred_element_type=jnp.float32) + params["b_out"])


# ----------------------------------- main ------------------------------------

if __name__ == "__main__":
    # SMALL shapes consistent with the module (v_size, e_size, h_size, c_size,
    # b_size), chosen TPU-friendly: B a multiple of 8 sublanes, 4*H = 128 lanes.
    B, T = 8, 8           # batch, max_len
    V, E, H, C = 64, 64, 32, 4

    key = jax.random.PRNGKey(0)
    params = init_params(key, V, E, H, C)
    kparams = pack_params(params)

    # TODO(synk): sent_to_ids (NLTK tokenize/stem/stopword filtering) has no
    # Pallas equivalent; the kernel consumes integer token ids directly.
    ids = jax.random.randint(jax.random.fold_in(key, 7), (B, T), 0, V,
                             dtype=jnp.int32)

    tag_space = jax.jit(lstm_classifier_forward)(ids, kparams)
    tag_space = jax.block_until_ready(tag_space)

    ref = ref_forward(ids, params)
    assert tag_space.shape == (4 * B, C), tag_space.shape
    err = float(jnp.max(jnp.abs(tag_space - ref)))
    assert jnp.allclose(tag_space, ref, atol=2e-3, rtol=2e-3), err

    print("KERNEL_OK")
</pallas_src>

<mosaic_0001>
module attributes {stable_mosaic.version = 11 : i64} {
  func.func @_lstm2_kernel(%arg0: i32, %arg1: memref<8x8x64xbf16, #tpu.memory_space<vmem>>, %arg2: memref<64x256xbf16, #tpu.memory_space<vmem>>, %arg3: memref<2x32x128xbf16, #tpu.memory_space<vmem>>, %arg4: memref<1x256xf32, #tpu.memory_space<vmem>>, %arg5: memref<32x256xbf16, #tpu.memory_space<vmem>>, %arg6: memref<32x256xbf16, #tpu.memory_space<vmem>>, %arg7: memref<2x32x128xbf16, #tpu.memory_space<vmem>>, %arg8: memref<1x256xf32, #tpu.memory_space<vmem>>, %arg9: memref<32x4xbf16, #tpu.memory_space<vmem>>, %arg10: memref<1x4xf32, #tpu.memory_space<vmem>>, %arg11: memref<32x4xf32, #tpu.memory_space<vmem>>, %arg12: memref<8x8x256xf32, #tpu.memory_space<vmem>>, %arg13: memref<8x8x256xf32, #tpu.memory_space<vmem>>, %arg14: memref<8x8x32xbf16, #tpu.memory_space<vmem>>, %arg15: memref<8x8x32xbf16, #tpu.memory_space<vmem>>) attributes {dimension_semantics = [#tpu.dimension_semantics<arbitrary>], iteration_bounds = array<i64: 1>, scalar_prefetch = 0 : i64, scratch_operands = 4 : i64, tpu.core_type = #tpu.core_type<tc>, window_params = [{pipeline_mode = #tpu.pipeline_mode<synchronous>, transform_indices = @transform_0, window_bounds = array<i64: 8, 8, 64>}, {pipeline_mode = #tpu.pipeline_mode<synchronous>, transform_indices = @transform_1, window_bounds = array<i64: 64, 256>}, {pipeline_mode = #tpu.pipeline_mode<synchronous>, transform_indices = @transform_2, window_bounds = array<i64: 2, 32, 128>}, {pipeline_mode = #tpu.pipeline_mode<synchronous>, transform_indices = @transform_3, window_bounds = array<i64: 1, 256>}, {pipeline_mode = #tpu.pipeline_mode<synchronous>, transform_indices = @transform_4, window_bounds = array<i64: 32, 256>}, {pipeline_mode = #tpu.pipeline_mode<synchronous>, transform_indices = @transform_5, window_bounds = array<i64: 32, 256>}, {pipeline_mode = #tpu.pipeline_mode<synchronous>, transform_indices = @transform_6, window_bounds = array<i64: 2, 32, 128>}, {pipeline_mode = #tpu.pipeline_mode<synchronous>, transform_indices = @transform_7, window_bounds = array<i64: 1, 256>}, {pipeline_mode = #tpu.pipeline_mode<synchronous>, transform_indices = @transform_8, window_bounds = array<i64: 32, 4>}, {pipeline_mode = #tpu.pipeline_mode<synchronous>, transform_indices = @transform_9, window_bounds = array<i64: 1, 4>}, {pipeline_mode = #tpu.pipeline_mode<synchronous>, transform_indices = @transform_10, window_bounds = array<i64: 32, 4>}]} {
    %c0 = arith.constant 0 : index
    %c0_0 = arith.constant 0 : index
    %c0_1 = arith.constant 0 : index
    %0 = vector.load %arg1[%c0, %c0_0, %c0_1] : memref<8x8x64xbf16, #tpu.memory_space<vmem>>, vector<8x8x64xbf16>
    %1 = vector.shape_cast %0 : vector<8x8x64xbf16> to vector<64x64xbf16>
    %c0_2 = arith.constant 0 : index
    %c0_3 = arith.constant 0 : index
    %2 = vector.load %arg2[%c0_2, %c0_3] : memref<64x256xbf16, #tpu.memory_space<vmem>>, vector<64x256xbf16>
    %cst = arith.constant dense<0.000000e+00> : vector<64x256xf32>
    %3 = tpu.matmul %1, %2, %cst {dimension_numbers = #tpu.dot_dimension_numbers<[1], [0], [0], [1], [0, 0, 1, 1], [], []>} : vector<64x64xbf16>, vector<64x256xbf16>, vector<64x256xf32> -> vector<64x256xf32>
    %c0_4 = arith.constant 0 : index
    %c0_5 = arith.constant 0 : index
    %4 = vector.load %arg4[%c0_4, %c0_5] : memref<1x256xf32, #tpu.memory_space<vmem>>, vector<1x256xf32>
    %5 = vector.broadcast %4 : vector<1x256xf32> to vector<64x256xf32>
    %6 = arith.addf %3, %5 : vector<64x256xf32>
    %7 = vector.shape_cast %6 : vector<64x256xf32> to vector<8x8x256xf32>
    %c0_6 = arith.constant 0 : index
    %c0_7 = arith.constant 0 : index
    %c0_8 = arith.constant 0 : index
    %8 = vector.load %arg12[%c0_6, %c0_7, %c0_8] : memref<8x8x256xf32, #tpu.memory_space<vmem>>, vector<8x8x256xf32>
    tpu.vector_store %arg12[%c0_6, %c0_7, %c0_8], %7 {strides = array<i32>} : memref<8x8x256xf32, #tpu.memory_space<vmem>>, vector<8x8x256xf32>,
    %c0_9 = arith.constant 0 : index
    %c0_10 = arith.constant 0 : index
    %c0_11 = arith.constant 0 : index
    %9 = vector.load %arg3[%c0_9, %c0_10, %c0_11] : memref<2x32x128xbf16, #tpu.memory_space<vmem>>, vector<1x32x128xbf16>
    %10 = vector.shape_cast %9 : vector<1x32x128xbf16> to vector<32x128xbf16>
    %c1 = arith.constant 1 : index
    %c0_12 = arith.constant 0 : index
    %c0_13 = arith.constant 0 : index
    %11 = vector.load %arg3[%c1, %c0_12, %c0_13] : memref<2x32x128xbf16, #tpu.memory_space<vmem>>, vector<1x32x128xbf16>
    %12 = vector.shape_cast %11 : vector<1x32x128xbf16> to vector<32x128xbf16>
    %cst_14 = arith.constant 0.000000e+00 : f32
    %13 = vector.broadcast %cst_14 : f32 to vector<8x32xf32>
    %c0_i32 = arith.constant 0 : i32
    %14 = arith.truncf %13 : vector<8x32xf32> to vector<8x32xbf16>
    %cst_15 = arith.constant dense<0.000000e+00> : vector<8x128xf32>
    %15 = tpu.matmul %14, %10, %cst_15 {dimension_numbers = #tpu.dot_dimension_numbers<[1], [0], [0], [1], [0, 0, 1, 1], [], []>} : vector<8x32xbf16>, vector<32x128xbf16>, vector<8x128xf32> -> vector<8x128xf32>
    %16 = arith.truncf %13 : vector<8x32xf32> to vector<8x32xbf16>
    %cst_16 = arith.constant dense<0.000000e+00> : vector<8x128xf32>
    %17 = tpu.matmul %16, %12, %cst_16 {dimension_numbers = #tpu.dot_dimension_numbers<[1], [0], [0], [1], [0, 0, 1, 1], [], []>} : vector<8x32xbf16>, vector<32x128xbf16>, vector<8x128xf32> -> vector<8x128xf32>
    %c7_i32 = arith.constant 7 : i32
    %18 = arith.subi %c7_i32, %c0_i32 : i32
    %19 = arith.index_cast %c0_i32 : i32 to index
    %c0_17 = arith.constant 0 : index
    %c0_18 = arith.constant 0 : index
    %20 = vector.load %arg12[%19, %c0_17, %c0_18] : memref<8x8x256xf32, #tpu.memory_space<vmem>>, vector<1x8x256xf32>
    %21 = vector.shape_cast %20 : vector<1x8x256xf32> to vector<8x256xf32>
    %22 = vector.extract_strided_slice %21 {offsets = [0, 0], sizes = [8, 128], strides = [1, 1]} : vector<8x256xf32> to vector<8x128xf32>
    %23 = arith.index_cast %18 : i32 to index
    %c0_19 = arith.constant 0 : index
    %c0_20 = arith.constant 0 : index
    %24 = vector.load %arg12[%23, %c0_19, %c0_20] : memref<8x8x256xf32, #tpu.memory_space<vmem>>, vector<1x8x256xf32>
    %25 = vector.shape_cast %24 : vector<1x8x256xf32> to vector<8x256xf32>
    %26 = vector.extract_strided_slice %25 {offsets = [0, 128], sizes = [8, 128], strides = [1, 1]} : vector<8x256xf32> to vector<8x128xf32>
    %27 = arith.addf %22, %15 : vector<8x128xf32>
    %28 = arith.addf %26, %17 : vector<8x128xf32>
    %29 = vector.extract_strided_slice %27 {offsets = [0, 0], sizes = [8, 96], strides = [1, 1]} : vector<8x128xf32> to vector<8x96xf32>
    %30 = arith.negf %29 : vector<8x96xf32>
    %31 = math.exp %30 : vector<8x96xf32>
    %cst_21 = arith.constant 1.000000e+00 : f32
    %32 = vector.broadcast %cst_21 : f32 to vector<8x96xf32>
    %33 = arith.addf %32, %31 : vector<8x96xf32>
    %34 = arith.divf %32, %33 : vector<8x96xf32>
    %35 = vector.extract_strided_slice %27 {offsets = [0, 96], sizes = [8, 32], strides = [1, 1]} : vector<8x128xf32> to vector<8x32xf32>
    %36 = math.tanh %35 : vector<8x32xf32>
    %37 = vector.extract_strided_slice %28 {offsets = [0, 0], sizes = [8, 96], strides = [1, 1]} : vector<8x128xf32> to vector<8x96xf32>
    %38 = arith.negf %37 : vector<8x96xf32>
    %39 = math.exp %38 : vector<8x96xf32>
    %cst_22 = arith.constant 1.000000e+00 : f32
    %40 = vector.broadcast %cst_22 : f32 to vector<8x96xf32>
    %41 = arith.addf %40, %39 : vector<8x96xf32>
    %42 = arith.divf %40, %41 : vector<8x96xf32>
    %43 = vector.extract_strided_slice %28 {offsets = [0, 96], sizes = [8, 32], strides = [1, 1]} : vector<8x128xf32> to vector<8x32xf32>
    %44 = math.tanh %43 : vector<8x32xf32>
    %45 = vector.extract_strided_slice %34 {offsets = [0, 32], sizes = [8, 32], strides = [1, 1]} : vector<8x96xf32> to vector<8x32xf32>
    %46 = arith.mulf %45, %13 : vector<8x32xf32>
    %47 = vector.extract_strided_slice %34 {offsets = [0, 0], sizes = [8, 32], strides = [1, 1]} : vector<8x96xf32> to vector<8x32xf32>
    %48 = arith.mulf %47, %36 : vector<8x32xf32>
    %49 = arith.addf %46, %48 : vector<8x32xf32>
    %50 = vector.extract_strided_slice %42 {offsets = [0, 32], sizes = [8, 32], strides = [1, 1]} : vector<8x96xf32> to vector<8x32xf32>
    %51 = arith.mulf %50, %13 : vector<8x32xf32>
    %52 = vector.extract_strided_slice %42 {offsets = [0, 0], sizes = [8, 32], strides = [1, 1]} : vector<8x96xf32> to vector<8x32xf32>
    %53 = arith.mulf %52, %44 : vector<8x32xf32>
    %54 = arith.addf %51, %53 : vector<8x32xf32>
    %55 = vector.extract_strided_slice %34 {offsets = [0, 64], sizes = [8, 32], strides = [1, 1]} : vector<8x96xf32> to vector<8x32xf32>
    %56 = math.tanh %49 : vector<8x32xf32>
    %57 = arith.mulf %55, %56 : vector<8x32xf32>
    %58 = vector.extract_strided_slice %42 {offsets = [0, 64], sizes = [8, 32], strides = [1, 1]} : vector<8x96xf32> to vector<8x32xf32>
    %59 = math.tanh %54 : vector<8x32xf32>
    %60 = arith.mulf %58, %59 : vector<8x32xf32>
    %61 = arith.truncf %57 : vector<8x32xf32> to vector<8x32xbf16>
    %62 = arith.index_cast %c0_i32 : i32 to index
    %c0_23 = arith.constant 0 : index
    %c0_24 = arith.constant 0 : index
    %63 = vector.load %arg14[%62, %c0_23, %c0_24] : memref<8x8x32xbf16, #tpu.memory_space<vmem>>, vector<1x8x32xbf16>
    %64 = vector.shape_cast %63 : vector<1x8x32xbf16> to vector<8x32xbf16>
    %65 = vector.shape_cast %61 : vector<8x32xbf16> to vector<1x8x32xbf16>
    tpu.vector_store %arg14[%62, %c0_23, %c0_24], %65 {strides = array<i32>} : memref<8x8x32xbf16, #tpu.memory_space<vmem>>, vector<1x8x32xbf16>,
    %66 = arith.truncf %60 : vector<8x32xf32> to vector<8x32xbf16>
    %67 = arith.index_cast %c0_i32 : i32 to index
    %c0_25 = arith.constant 0 : index
    %c0_26 = arith.constant 0 : index
    %68 = vector.load %arg15[%67, %c0_25, %c0_26] : memref<8x8x32xbf16, #tpu.memory_space<vmem>>, vector<1x8x32xbf16>
    %69 = vector.shape_cast %68 : vector<1x8x32xbf16> to vector<8x32xbf16>
    %70 = vector.shape_cast %66 : vector<8x32xbf16> to vector<1x8x32xbf16>
    tpu.vector_store %arg15[%67, %c0_25, %c0_26], %70 {strides = array<i32>} : memref<8x8x32xbf16, #tpu.memory_space<vmem>>, vector<1x8x32xbf16>,
    %c1_i32 = arith.constant 1 : i32
    %71 = arith.truncf %57 : vector<8x32xf32> to vector<8x32xbf16>
    %cst_27 = arith.constant dense<0.000000e+00> : vector<8x128xf32>
    %72 = tpu.matmul %71, %10, %cst_27 {dimension_numbers = #tpu.dot_dimension_numbers<[1], [0], [0], [1], [0, 0, 1, 1], [], []>} : vector<8x32xbf16>, vector<32x128xbf16>, vector<8x128xf32> -> vector<8x128xf32>
    %73 = arith.truncf %60 : vector<8x32xf32> to vector<8x32xbf16>
    %cst_28 = arith.constant dense<0.000000e+00> : vector<8x128xf32>
    %74 = tpu.matmul %73, %12, %cst_28 {dimension_numbers = #tpu.dot_dimension_numbers<[1], [0], [0], [1], [0, 0, 1, 1], [], []>} : vector<8x32xbf16>, vector<32x128xbf16>, vector<8x128xf32> -> vector<8x128xf32>
    %c7_i32_29 = arith.constant 7 : i32
    %75 = arith.subi %c7_i32_29, %c1_i32 : i32
    %76 = arith.index_cast %c1_i32 : i32 to index
    %c0_30 = arith.constant 0 : index
    %c0_31 = arith.constant 0 : index
    %77 = vector.load %arg12[%76, %c0_30, %c0_31] : memref<8x8x256xf32, #tpu.memory_space<vmem>>, vector<1x8x256xf32>
    %78 = vector.shape_cast %77 : vector<1x8x256xf32> to vector<8x256xf32>
    %79 = vector.extract_strided_slice %78 {offsets = [0, 0], sizes = [8, 128], strides = [1, 1]} : vector<8x256xf32> to vector<8x128xf32>
    %80 = arith.index_cast %75 : i32 to index
    %c0_32 = arith.constant 0 : index
    %c0_33 = arith.constant 0 : index
    %81 = vector.load %arg12[%80, %c0_32, %c0_33] : memref<8x8x256xf32, #tpu.memory_space<vmem>>, vector<1x8x256xf32>
    %82 = vector.shape_cast %81 : vector<1x8x256xf32> to vector<8x256xf32>
    %83 = vector.extract_strided_slice %82 {offsets = [0, 128], sizes = [8, 128], strides = [1, 1]} : vector<8x256xf32> to vector<8x128xf32>
    %84 = arith.addf %79, %72 : vector<8x128xf32>
    %85 = arith.addf %83, %74 : vector<8x128xf32>
    %86 = vector.extract_strided_slice %84 {offsets = [0, 0], sizes = [8, 96], strides = [1, 1]} : vector<8x128xf32> to vector<8x96xf32>
    %87 = arith.negf %86 : vector<8x96xf32>
    %88 = math.exp %87 : vector<8x96xf32>
    %cst_34 = arith.constant 1.000000e+00 : f32
    %89 = vector.broadcast %cst_34 : f32 to vector<8x96xf32>
    %90 = arith.addf %89, %88 : vector<8x96xf32>
    %91 = arith.divf %89, %90 : vector<8x96xf32>
    %92 = vector.extract_strided_slice %84 {offsets = [0, 96], sizes = [8, 32], strides = [1, 1]} : vector<8x128xf32> to vector<8x32xf32>
    %93 = math.tanh %92 : vector<8x32xf32>
    %94 = vector.extract_strided_slice %85 {offsets = [0, 0], sizes = [8, 96], strides = [1, 1]} : vector<8x128xf32> to vector<8x96xf32>
    %95 = arith.negf %94 : vector<8x96xf32>
    %96 = math.exp %95 : vector<8x96xf32>
    %cst_35 = arith.constant 1.000000e+00 : f32
    %97 = vector.broadcast %cst_35 : f32 to vector<8x96xf32>
    %98 = arith.addf %97, %96 : vector<8x96xf32>
    %99 = arith.divf %97, %98 : vector<8x96xf32>
    %100 = vector.extract_strided_slice %85 {offsets = [0, 96], sizes = [8, 32], strides = [1, 1]} : vector<8x128xf32> to vector<8x32xf32>
    %101 = math.tanh %100 : vector<8x32xf32>
    %102 = vector.extract_strided_slice %91 {offsets = [0, 32], sizes = [8, 32], strides = [1, 1]} : vector<8x96xf32> to vector<8x32xf32>
    %103 = arith.mulf %102, %49 : vector<8x32xf32>
    %104 = vector.extract_strided_slice %91 {offsets = [0, 0], sizes = [8, 32], strides = [1, 1]} : vector<8x96xf32> to vector<8x32xf32>
    %105 = arith.mulf %104, %93 : vector<8x32xf32>
    %106 = arith.addf %103, %105 : vector<8x32xf32>
    %107 = vector.extract_strided_slice %99 {offsets = [0, 32], sizes = [8, 32], strides = [1, 1]} : vector<8x96xf32> to vector<8x32xf32>
    %108 = arith.mulf %107, %54 : vector<8x32xf32>
    %109 = vector.extract_strided_slice %99 {offsets = [0, 0], sizes = [8, 32], strides = [1, 1]} : vector<8x96xf32> to vector<8x32xf32>
    %110 = arith.mulf %109, %101 : vector<8x32xf32>
    %111 = arith.addf %108, %110 : vector<8x32xf32>
    %112 = vector.extract_strided_slice %91 {offsets = [0, 64], sizes = [8, 32], strides = [1, 1]} : vector<8x96xf32> to vector<8x32xf32>
    %113 = math.tanh %106 : vector<8x32xf32>
    %114 = arith.mulf %112, %113 : vector<8x32xf32>
    %115 = vector.extract_strided_slice %99 {offsets = [0, 64], sizes = [8, 32], strides = [1, 1]} : vector<8x96xf32> to vector<8x32xf32>
    %116 = math.tanh %111 : vector<8x32xf32>
    %117 = arith.mulf %115, %116 : vector<8x32xf32>
    %118 = arith.truncf %114 : vector<8x32xf32> to vector<8x32xbf16>
    %119 = arith.index_cast %c1_i32 : i32 to index
    %c0_36 = arith.constant 0 : index
    %c0_37 = arith.constant 0 : index
    %120 = vector.load %arg14[%119, %c0_36, %c0_37] : memref<8x8x32xbf16, #tpu.memory_space<vmem>>, vector<1x8x32xbf16>
    %121 = vector.shape_cast %120 : vector<1x8x32xbf16> to vector<8x32xbf16>
    %122 = vector.shape_cast %118 : vector<8x32xbf16> to vector<1x8x32xbf16>
    tpu.vector_store %arg14[%119, %c0_36, %c0_37], %122 {strides = array<i32>} : memref<8x8x32xbf16, #tpu.memory_space<vmem>>, vector<1x8x32xbf16>,
    %123 = arith.truncf %117 : vector<8x32xf32> to vector<8x32xbf16>
    %124 = arith.index_cast %c1_i32 : i32 to index
    %c0_38 = arith.constant 0 : index
    %c0_39 = arith.constant 0 : index
    %125 = vector.load %arg15[%124, %c0_38, %c0_39] : memref<8x8x32xbf16, #tpu.memory_space<vmem>>, vector<1x8x32xbf16>
    %126 = vector.shape_cast %125 : vector<1x8x32xbf16> to vector<8x32xbf16>
    %127 = vector.shape_cast %123 : vector<8x32xbf16> to vector<1x8x32xbf16>
    tpu.vector_store %arg15[%124, %c0_38, %c0_39], %127 {strides = array<i32>} : memref<8x8x32xbf16, #tpu.memory_space<vmem>>, vector<1x8x32xbf16>,
    %c2_i32 = arith.constant 2 : i32
    %128 = arith.truncf %114 : vector<8x32xf32> to vector<8x32xbf16>
    %cst_40 = arith.constant dense<0.000000e+00> : vector<8x128xf32>
    %129 = tpu.matmul %128, %10, %cst_40 {dimension_numbers = #tpu.dot_dimension_numbers<[1], [0], [0], [1], [0, 0, 1, 1], [], []>} : vector<8x32xbf16>, vector<32x128xbf16>, vector<8x128xf32> -> vector<8x128xf32>
    %130 = arith.truncf %117 : vector<8x32xf32> to vector<8x32xbf16>
    %cst_41 = arith.constant dense<0.000000e+00> : vector<8x128xf32>
    %131 = tpu.matmul %130, %12, %cst_41 {dimension_numbers = #tpu.dot_dimension_numbers<[1], [0], [0], [1], [0, 0, 1, 1], [], []>} : vector<8x32xbf16>, vector<32x128xbf16>, vector<8x128xf32> -> vector<8x128xf32>
    %c7_i32_42 = arith.constant 7 : i32
    %132 = arith.subi %c7_i32_42, %c2_i32 : i32
    %133 = arith.index_cast %c2_i32 : i32 to index
    %c0_43 = arith.constant 0 : index
    %c0_44 = arith.constant 0 : index
    %134 = vector.load %arg12[%133, %c0_43, %c0_44] : memref<8x8x256xf32, #tpu.memory_space<vmem>>, vector<1x8x256xf32>
    %135 = vector.shape_cast %134 : vector<1x8x256xf32> to vector<8x256xf32>
    %136 = vector.extract_strided_slice %135 {offsets = [0, 0], sizes = [8, 128], strides = [1, 1]} : vector<8x256xf32> to vector<8x128xf32>
    %137 = arith.index_cast %132 : i32 to index
    %c0_45 = arith.constant 0 : index
    %c0_46 = arith.constant 0 : index
    %138 = vector.load %arg12[%137, %c0_45, %c0_46] : memref<8x8x256xf32, #tpu.memory_space<vmem>>, vector<1x8x256xf32>
    %139 = vector.shape_cast %138 : vector<1x8x256xf32> to vector<8x256xf32>
    %140 = vector.extract_strided_slice %139 {offsets = [0, 128], sizes = [8, 128], strides = [1, 1]} : vector<8x256xf32> to vector<8x128xf32>
    %141 = arith.addf %136, %129 : vector<8x128xf32>
    %142 = arith.addf %140, %131 : vector<8x128xf32>
    %143 = vector.extract_strided_slice %141 {offsets = [0, 0], sizes = [8, 96], strides = [1, 1]} : vector<8x128xf32> to vector<8x96xf32>
    %144 = arith.negf %143 : vector<8x96xf32>
    %145 = math.exp %144 : vector<8x96xf32>
    %cst_47 = arith.constant 1.000000e+00 : f32
    %146 = vector.broadcast %cst_47 : f32 to vector<8x96xf32>
    %147 = arith.addf %146, %145 : vector<8x96xf32>
    %148 = arith.divf %146, %147 : vector<8x96xf32>
    %149 = vector.extract_strided_slice %141 {offsets = [0, 96], sizes = [8, 32], strides = [1, 1]} : vector<8x128xf32> to vector<8x32xf32>
    %150 = math.tanh %149 : vector<8x32xf32>
    %151 = vector.extract_strided_slice %142 {offsets = [0, 0], sizes = [8, 96], strides = [1, 1]} : vector<8x128xf32> to vector<8x96xf32>
    %152 = arith.negf %151 : vector<8x96xf32>
    %153 = math.exp %152 : vector<8x96xf32>
    %cst_48 = arith.constant 1.000000e+00 : f32
    %154 = vector.broadcast %cst_48 : f32 to vector<8x96xf32>
    %155 = arith.addf %154, %153 : vector<8x96xf32>
    %156 = arith.divf %154, %155 : vector<8x96xf32>
    %157 = vector.extract_strided_slice %142 {offsets = [0, 96], sizes = [8, 32], strides = [1, 1]} : vector<8x128xf32> to vector<8x32xf32>
    %158 = math.tanh %157 : vector<8x32xf32>
    %159 = vector.extract_strided_slice %148 {offsets = [0, 32], sizes = [8, 32], strides = [1, 1]} : vector<8x96xf32> to vector<8x32xf32>
    %160 = arith.mulf %159, %106 : vector<8x32xf32>
    %161 = vector.extract_strided_slice %148 {offsets = [0, 0], sizes = [8, 32], strides = [1, 1]} : vector<8x96xf32> to vector<8x32xf32>
    %162 = arith.mulf %161, %150 : vector<8x32xf32>
    %163 = arith.addf %160, %162 : vector<8x32xf32>
    %164 = vector.extract_strided_slice %156 {offsets = [0, 32], sizes = [8, 32], strides = [1, 1]} : vector<8x96xf32> to vector<8x32xf32>
    %165 = arith.mulf %164, %111 : vector<8x32xf32>
    %166 = vector.extract_strided_slice %156 {offsets = [0, 0], sizes = [8, 32], strides = [1, 1]} : vector<8x96xf32> to vector<8x32xf32>
    %167 = arith.mulf %166, %158 : vector<8x32xf32>
    %168 = arith.addf %165, %167 : vector<8x32xf32>
    %169 = vector.extract_strided_slice %148 {offsets = [0, 64], sizes = [8, 32], strides = [1, 1]} : vector<8x96xf32> to vector<8x32xf32>
    %170 = math.tanh %163 : vector<8x32xf32>
    %171 = arith.mulf %169, %170 : vector<8x32xf32>
    %172 = vector.extract_strided_slice %156 {offsets = [0, 64], sizes = [8, 32], strides = [1, 1]} : vector<8x96xf32> to vector<8x32xf32>
    %173 = math.tanh %168 : vector<8x32xf32>
    %174 = arith.mulf %172, %173 : vector<8x32xf32>
    %175 = arith.truncf %171 : vector<8x32xf32> to vector<8x32xbf16>
    %176 = arith.index_cast %c2_i32 : i32 to index
    %c0_49 = arith.constant 0 : index
    %c0_50 = arith.constant 0 : index
    %177 = vector.load %arg14[%176, %c0_49, %c0_50] : memref<8x8x32xbf16, #tpu.memory_space<vmem>>, vector<1x8x32xbf16>
    %178 = vector.shape_cast %177 : vector<1x8x32xbf16> to vector<8x32xbf16>
    %179 = vector.shape_cast %175 : vector<8x32xbf16> to vector<1x8x32xbf16>
    tpu.vector_store %arg14[%176, %c0_49, %c0_50], %179 {strides = array<i32>} : memref<8x8x32xbf16, #tpu.memory_space<vmem>>, vector<1x8x32xbf16>,
    %180 = arith.truncf %174 : vector<8x32xf32> to vector<8x32xbf16>
    %181 = arith.index_cast %c2_i32 : i32 to index
    %c0_51 = arith.constant 0 : index
    %c0_52 = arith.constant 0 : index
    %182 = vector.load %arg15[%181, %c0_51, %c0_52] : memref<8x8x32xbf16, #tpu.memory_space<vmem>>, vector<1x8x32xbf16>
    %183 = vector.shape_cast %182 : vector<1x8x32xbf16> to vector<8x32xbf16>
    %184 = vector.shape_cast %180 : vector<8x32xbf16> to vector<1x8x32xbf16>
    tpu.vector_store %arg15[%181, %c0_51, %c0_52], %184 {strides = array<i32>} : memref<8x8x32xbf16, #tpu.memory_space<vmem>>, vector<1x8x32xbf16>,
    %c3_i32 = arith.constant 3 : i32
    %185 = arith.truncf %171 : vector<8x32xf32> to vector<8x32xbf16>
    %cst_53 = arith.constant dense<0.000000e+00> : vector<8x128xf32>
    %186 = tpu.matmul %185, %10, %cst_53 {dimension_numbers = #tpu.dot_dimension_numbers<[1], [0], [0], [1], [0, 0, 1, 1], [], []>} : vector<8x32xbf16>, vector<32x128xbf16>, vector<8x128xf32> -> vector<8x128xf32>
    %187 = arith.truncf %174 : vector<8x32xf32> to vector<8x32xbf16>
    %cst_54 = arith.constant dense<0.000000e+00> : vector<8x128xf32>
    %188 = tpu.matmul %187, %12, %cst_54 {dimension_numbers = #tpu.dot_dimension_numbers<[1], [0], [0], [1], [0, 0, 1, 1], [], []>} : vector<8x32xbf16>, vector<32x128xbf16>, vector<8x128xf32> -> vector<8x128xf32>
    %c7_i32_55 = arith.constant 7 : i32
    %189 = arith.subi %c7_i32_55, %c3_i32 : i32
    %190 = arith.index_cast %c3_i32 : i32 to index
    %c0_56 = arith.constant 0 : index
    %c0_57 = arith.constant 0 : index
    %191 = vector.load %arg12[%190, %c0_56, %c0_57] : memref<8x8x256xf32, #tpu.memory_space<vmem>>, vector<1x8x256xf32>
    %192 = vector.shape_cast %191 : vector<1x8x256xf32> to vector<8x256xf32>
    %193 = vector.extract_strided_slice %192 {offsets = [0, 0], sizes = [8, 128], strides = [1, 1]} : vector<8x256xf32> to vector<8x128xf32>
    %194 = arith.index_cast %189 : i32 to index
    %c0_58 = arith.constant 0 : index
    %c0_59 = arith.constant 0 : index
    %195 = vector.load %arg12[%194, %c0_58, %c0_59] : memref<8x8x256xf32, #tpu.memory_space<vmem>>, vector<1x8x256xf32>
    %196 = vector.shape_cast %195 : vector<1x8x256xf32> to vector<8x256xf32>
    %197 = vector.extract_strided_slice %196 {offsets = [0, 128], sizes = [8, 128], strides = [1, 1]} : vector<8x256xf32> to vector<8x128xf32>
    %198 = arith.addf %193, %186 : vector<8x128xf32>
    %199 = arith.addf %197, %188 : vector<8x128xf32>
    %200 = vector.extract_strided_slice %198 {offsets = [0, 0], sizes = [8, 96], strides = [1, 1]} : vector<8x128xf32> to vector<8x96xf32>
    %201 = arith.negf %200 : vector<8x96xf32>
    %202 = math.exp %201 : vector<8x96xf32>
    %cst_60 = arith.constant 1.000000e+00 : f32
    %203 = vector.broadcast %cst_60 : f32 to vector<8x96xf32>
    %204 = arith.addf %203, %202 : vector<8x96xf32>
    %205 = arith.divf %203, %204 : vector<8x96xf32>
    %206 = vector.extract_strided_slice %198 {offsets = [0, 96], sizes = [8, 32], strides = [1, 1]} : vector<8x128xf32> to vector<8x32xf32>
    %207 = math.tanh %206 : vector<8x32xf32>
    %208 = vector.extract_strided_slice %199 {offsets = [0, 0], sizes = [8, 96], strides = [1, 1]} : vector<8x128xf32> to vector<8x96xf32>
    %209 = arith.negf %208 : vector<8x96xf32>
    %210 = math.exp %209 : vector<8x96xf32>
    %cst_61 = arith.constant 1.000000e+00 : f32
    %211 = vector.broadcast %cst_61 : f32 to vector<8x96xf32>
    %212 = arith.addf %211, %210 : vector<8x96xf32>
    %213 = arith.divf %211, %212 : vector<8x96xf32>
    %214 = vector.extract_strided_slice %199 {offsets = [0, 96], sizes = [8, 32], strides = [1, 1]} : vector<8x128xf32> to vector<8x32xf32>
    %215 = math.tanh %214 : vector<8x32xf32>
    %216 = vector.extract_strided_slice %205 {offsets = [0, 32], sizes = [8, 32], strides = [1, 1]} : vector<8x96xf32> to vector<8x32xf32>
    %217 = arith.mulf %216, %163 : vector<8x32xf32>
    %218 = vector.extract_strided_slice %205 {offsets = [0, 0], sizes = [8, 32], strides = [1, 1]} : vector<8x96xf32> to vector<8x32xf32>
    %219 = arith.mulf %218, %207 : vector<8x32xf32>
    %220 = arith.addf %217, %219 : vector<8x32xf32>
    %221 = vector.extract_strided_slice %213 {offsets = [0, 32], sizes = [8, 32], strides = [1, 1]} : vector<8x96xf32> to vector<8x32xf32>
    %222 = arith.mulf %221, %168 : vector<8x32xf32>
    %223 = vector.extract_strided_slice %213 {offsets = [0, 0], sizes = [8, 32], strides = [1, 1]} : vector<8x96xf32> to vector<8x32xf32>
    %224 = arith.mulf %223, %215 : vector<8x32xf32>
    %225 = arith.addf %222, %224 : vector<8x32xf32>
    %226 = vector.extract_strided_slice %205 {offsets = [0, 64], sizes = [8, 32], strides = [1, 1]} : vector<8x96xf32> to vector<8x32xf32>
    %227 = math.tanh %220 : vector<8x32xf32>
    %228 = arith.mulf %226, %227 : vector<8x32xf32>
    %229 = vector.extract_strided_slice %213 {offsets = [0, 64], sizes = [8, 32], strides = [1, 1]} : vector<8x96xf32> to vector<8x32xf32>
    %230 = math.tanh %225 : vector<8x32xf32>
    %231 = arith.mulf %229, %230 : vector<8x32xf32>
    %232 = arith.truncf %228 : vector<8x32xf32> to vector<8x32xbf16>
    %233 = arith.index_cast %c3_i32 : i32 to index
    %c0_62 = arith.constant 0 : index
    %c0_63 = arith.constant 0 : index
    %234 = vector.load %arg14[%233, %c0_62, %c0_63] : memref<8x8x32xbf16, #tpu.memory_space<vmem>>, vector<1x8x32xbf16>
    %235 = vector.shape_cast %234 : vector<1x8x32xbf16> to vector<8x32xbf16>
    %236 = vector.shape_cast %232 : vector<8x32xbf16> to vector<1x8x32xbf16>
    tpu.vector_store %arg14[%233, %c0_62, %c0_63], %236 {strides = array<i32>} : memref<8x8x32xbf16, #tpu.memory_space<vmem>>, vector<1x8x32xbf16>,
    %237 = arith.truncf %231 : vector<8x32xf32> to vector<8x32xbf16>
    %238 = arith.index_cast %c3_i32 : i32 to index
    %c0_64 = arith.constant 0 : index
    %c0_65 = arith.constant 0 : index
    %239 = vector.load %arg15[%238, %c0_64, %c0_65] : memref<8x8x32xbf16, #tpu.memory_space<vmem>>, vector<1x8x32xbf16>
    %240 = vector.shape_cast %239 : vector<1x8x32xbf16> to vector<8x32xbf16>
    %241 = vector.shape_cast %237 : vector<8x32xbf16> to vector<1x8x32xbf16>
    tpu.vector_store %arg15[%238, %c0_64, %c0_65], %241 {strides = array<i32>} : memref<8x8x32xbf16, #tpu.memory_space<vmem>>, vector<1x8x32xbf16>,
    %c4_i32 = arith.constant 4 : i32
    %242 = arith.truncf %228 : vector<8x32xf32> to vector<8x32xbf16>
    %cst_66 = arith.constant dense<0.000000e+00> : vector<8x128xf32>
    %243 = tpu.matmul %242, %10, %cst_66 {dimension_numbers = #tpu.dot_dimension_numbers<[1], [0], [0], [1], [0, 0, 1, 1], [], []>} : vector<8x32xbf16>, vector<32x128xbf16>, vector<8x128xf32> -> vector<8x128xf32>
    %244 = arith.truncf %231 : vector<8x32xf32> to vector<8x32xbf16>
    %cst_67 = arith.constant dense<0.000000e+00> : vector<8x128xf32>
    %245 = tpu.matmul %244, %12, %cst_67 {dimension_numbers = #tpu.dot_dimension_numbers<[1], [0], [0], [1], [0, 0, 1, 1], [], []>} : vector<8x32xbf16>, vector<32x128xbf16>, vector<8x128xf32> -> vector<8x128xf32>
    %c7_i32_68 = arith.constant 7 : i32
    %246 = arith.subi %c7_i32_68, %c4_i32 : i32
    %247 = arith.index_cast %c4_i32 : i32 to index
    %c0_69 = arith.constant 0 : index
    %c0_70 = arith.constant 0 : index
    %248 = vector.load %arg12[%247, %c0_69, %c0_70] : memref<8x8x256xf32, #tpu.memory_space<vmem>>, vector<1x8x256xf32>
    %249 = vector.shape_cast %248 : vector<1x8x256xf32> to vector<8x256xf32>
    %250 = vector.extract_strided_slice %249 {offsets = [0, 0], sizes = [8, 128], strides = [1, 1]} : vector<8x256xf32> to vector<8x128xf32>
    %251 = arith.index_cast %246 : i32 to index
    %c0_71 = arith.constant 0 : index
    %c0_72 = arith.constant 0 : index
    %252 = vector.load %arg12[%251, %c0_71, %c0_72] : memref<8x8x256xf32, #tpu.memory_space<vmem>>, vector<1x8x256xf32>
    %253 = vector.shape_cast %252 : vector<1x8x256xf32> to vector<8x256xf32>
    %254 = vector.extract_strided_slice %253 {offsets = [0, 128], sizes = [8, 128], strides = [1, 1]} : vector<8x256xf32> to vector<8x128xf32>
    %255 = arith.addf %250, %243 : vector<8x128xf32>
    %256 = arith.addf %254, %245 : vector<8x128xf32>
    %257 = vector.extract_strided_slice %255 {offsets = [0, 0], sizes = [8, 96], strides = [1, 1]} : vector<8x128xf32> to vector<8x96xf32>
    %258 = arith.negf %257 : vector<8x96xf32>
    %259 = math.exp %258 : vector<8x96xf32>
    %cst_73 = arith.constant 1.000000e+00 : f32
    %260 = vector.broadcast %cst_73 : f32 to vector<8x96xf32>
    %261 = arith.addf %260, %259 : vector<8x96xf32>
    %262 = arith.divf %260, %261 : vector<8x96xf32>
    %263 = vector.extract_strided_slice %255 {offsets = [0, 96], sizes = [8, 32], strides = [1, 1]} : vector<8x128xf32> to vector<8x32xf32>
    %264 = math.tanh %263 : vector<8x32xf32>
    %265 = vector.extract_strided_slice %256 {offsets = [0, 0], sizes = [8, 96], strides = [1, 1]} : vector<8x128xf32> to vector<8x96xf32>
    %266 = arith.negf %265 : vector<8x96xf32>
    %267 = math.exp %266 : vector<8x96xf32>
    %cst_74 = arith.constant 1.000000e+00 : f32
    %268 = vector.broadcast %cst_74 : f32 to vector<8x96xf32>
    %269 = arith.addf %268, %267 : vector<8x96xf32>
    %270 = arith.divf %268, %269 : vector<8x96xf32>
    %271 = vector.extract_strided_slice %256 {offsets = [0, 96], sizes = [8, 32], strides = [1, 1]} : vector<8x128xf32> to vector<8x32xf32>
    %272 = math.tanh %271 : vector<8x32xf32>
    %273 = vector.extract_strided_slice %262 {offsets = [0, 32], sizes = [8, 32], strides = [1, 1]} : vector<8x96xf32> to vector<8x32xf32>
    %274 = arith.mulf %273, %220 : vector<8x32xf32>
    %275 = vector.extract_strided_slice %262 {offsets = [0, 0], sizes = [8, 32], strides = [1, 1]} : vector<8x96xf32> to vector<8x32xf32>
    %276 = arith.mulf %275, %264 : vector<8x32xf32>
    %277 = arith.addf %274, %276 : vector<8x32xf32>
    %278 = vector.extract_strided_slice %270 {offsets = [0, 32], sizes = [8, 32], strides = [1, 1]} : vector<8x96xf32> to vector<8x32xf32>
    %279 = arith.mulf %278, %225 : vector<8x32xf32>
    %280 = vector.extract_strided_slice %270 {offsets = [0, 0], sizes = [8, 32], strides = [1, 1]} : vector<8x96xf32> to vector<8x32xf32>
    %281 = arith.mulf %280, %272 : vector<8x32xf32>
    %282 = arith.addf %279, %281 : vector<8x32xf32>
    %283 = vector.extract_strided_slice %262 {offsets = [0, 64], sizes = [8, 32], strides = [1, 1]} : vector<8x96xf32> to vector<8x32xf32>
    %284 = math.tanh %277 : vector<8x32xf32>
    %285 = arith.mulf %283, %284 : vector<8x32xf32>
    %286 = vector.extract_strided_slice %270 {offsets = [0, 64], sizes = [8, 32], strides = [1, 1]} : vector<8x96xf32> to vector<8x32xf32>
    %287 = math.tanh %282 : vector<8x32xf32>
    %288 = arith.mulf %286, %287 : vector<8x32xf32>
    %289 = arith.truncf %285 : vector<8x32xf32> to vector<8x32xbf16>
    %290 = arith.index_cast %c4_i32 : i32 to index
    %c0_75 = arith.constant 0 : index
    %c0_76 = arith.constant 0 : index
    %291 = vector.load %arg14[%290, %c0_75, %c0_76] : memref<8x8x32xbf16, #tpu.memory_space<vmem>>, vector<1x8x32xbf16>
    %292 = vector.shape_cast %291 : vector<1x8x32xbf16> to vector<8x32xbf16>
    %293 = vector.shape_cast %289 : vector<8x32xbf16> to vector<1x8x32xbf16>
    tpu.vector_store %arg14[%290, %c0_75, %c0_76], %293 {strides = array<i32>} : memref<8x8x32xbf16, #tpu.memory_space<vmem>>, vector<1x8x32xbf16>,
    %294 = arith.truncf %288 : vector<8x32xf32> to vector<8x32xbf16>
    %295 = arith.index_cast %c4_i32 : i32 to index
    %c0_77 = arith.constant 0 : index
    %c0_78 = arith.constant 0 : index
    %296 = vector.load %arg15[%295, %c0_77, %c0_78] : memref<8x8x32xbf16, #tpu.memory_space<vmem>>, vector<1x8x32xbf16>
    %297 = vector.shape_cast %296 : vector<1x8x32xbf16> to vector<8x32xbf16>
    %298 = vector.shape_cast %294 : vector<8x32xbf16> to vector<1x8x32xbf16>
    tpu.vector_store %arg15[%295, %c0_77, %c0_78], %298 {strides = array<i32>} : memref<8x8x32xbf16, #tpu.memory_space<vmem>>, vector<1x8x32xbf16>,
    %c5_i32 = arith.constant 5 : i32
    %299 = arith.truncf %285 : vector<8x32xf32> to vector<8x32xbf16>
    %cst_79 = arith.constant dense<0.000000e+00> : vector<8x128xf32>
    %300 = tpu.matmul %299, %10, %cst_79 {dimension_numbers = #tpu.dot_dimension_numbers<[1], [0], [0], [1], [0, 0, 1, 1], [], []>} : vector<8x32xbf16>, vector<32x128xbf16>, vector<8x128xf32> -> vector<8x128xf32>
    %301 = arith.truncf %288 : vector<8x32xf32> to vector<8x32xbf16>
    %cst_80 = arith.constant dense<0.000000e+00> : vector<8x128xf32>
    %302 = tpu.matmul %301, %12, %cst_80 {dimension_numbers = #tpu.dot_dimension_numbers<[1], [0], [0], [1], [0, 0, 1, 1], [], []>} : vector<8x32xbf16>, vector<32x128xbf16>, vector<8x128xf32> -> vector<8x128xf32>
    %c7_i32_81 = arith.constant 7 : i32
    %303 = arith.subi %c7_i32_81, %c5_i32 : i32
    %304 = arith.index_cast %c5_i32 : i32 to index
    %c0_82 = arith.constant 0 : index
    %c0_83 = arith.constant 0 : index
    %305 = vector.load %arg12[%304, %c0_82, %c0_83] : memref<8x8x256xf32, #tpu.memory_space<vmem>>, vector<1x8x256xf32>
    %306 = vector.shape_cast %305 : vector<1x8x256xf32> to vector<8x256xf32>
    %307 = vector.extract_strided_slice %306 {offsets = [0, 0], sizes = [8, 128], strides = [1, 1]} : vector<8x256xf32> to vector<8x128xf32>
    %308 = arith.index_cast %303 : i32 to index
    %c0_84 = arith.constant 0 : index
    %c0_85 = arith.constant 0 : index
    %309 = vector.load %arg12[%308, %c0_84, %c0_85] : memref<8x8x256xf32, #tpu.memory_space<vmem>>, vector<1x8x256xf32>
    %310 = vector.shape_cast %309 : vector<1x8x256xf32> to vector<8x256xf32>
    %311 = vector.extract_strided_slice %310 {offsets = [0, 128], sizes = [8, 128], strides = [1, 1]} : vector<8x256xf32> to vector<8x128xf32>
    %312 = arith.addf %307, %300 : vector<8x128xf32>
    %313 = arith.addf %311, %302 : vector<8x128xf32>
    %314 = vector.extract_strided_slice %312 {offsets = [0, 0], sizes = [8, 96], strides = [1, 1]} : vector<8x128xf32> to vector<8x96xf32>
    %315 = arith.negf %314 : vector<8x96xf32>
    %316 = math.exp %315 : vector<8x96xf32>
    %cst_86 = arith.constant 1.000000e+00 : f32
    %317 = vector.broadcast %cst_86 : f32 to vector<8x96xf32>
    %318 = arith.addf %317, %316 : vector<8x96xf32>
    %319 = arith.divf %317, %318 : vector<8x96xf32>
    %320 = vector.extract_strided_slice %312 {offsets = [0, 96], sizes = [8, 32], strides = [1, 1]} : vector<8x128xf32> to vector<8x32xf32>
    %321 = math.tanh %320 : vector<8x32xf32>
    %322 = vector.extract_strided_slice %313 {offsets = [0, 0], sizes = [8, 96], strides = [1, 1]} : vector<8x128xf32> to vector<8x96xf32>
    %323 = arith.negf %322 : vector<8x96xf32>
    %324 = math.exp %323 : vector<8x96xf32>
    %cst_87 = arith.constant 1.000000e+00 : f32
    %325 = vector.broadcast %cst_87 : f32 to vector<8x96xf32>
    %326 = arith.addf %325, %324 : vector<8x96xf32>
    %327 = arith.divf %325, %326 : vector<8x96xf32>
    %328 = vector.extract_strided_slice %313 {offsets = [0, 96], sizes = [8, 32], strides = [1, 1]} : vector<8x128xf32> to vector<8x32xf32>
    %329 = math.tanh %328 : vector<8x32xf32>
    %330 = vector.extract_strided_slice %319 {offsets = [0, 32], sizes = [8, 32], strides = [1, 1]} : vector<8x96xf32> to vector<8x32xf32>
    %331 = arith.mulf %330, %277 : vector<8x32xf32>
    %332 = vector.extract_strided_slice %319 {offsets = [0, 0], sizes = [8, 32], strides = [1, 1]} : vector<8x96xf32> to vector<8x32xf32>
    %333 = arith.mulf %332, %321 : vector<8x32xf32>
    %334 = arith.addf %331, %333 : vector<8x32xf32>
    %335 = vector.extract_strided_slice %327 {offsets = [0, 32], sizes = [8, 32], strides = [1, 1]} : vector<8x96xf32> to vector<8x32xf32>
    %336 = arith.mulf %335, %282 : vector<8x32xf32>
    %337 = vector.extract_strided_slice %327 {offsets = [0, 0], sizes = [8, 32], strides = [1, 1]} : vector<8x96xf32> to vector<8x32xf32>
    %338 = arith.mulf %337, %329 : vector<8x32xf32>
    %339 = arith.addf %336, %338 : vector<8x32xf32>
    %340 = vector.extract_strided_slice %319 {offsets = [0, 64], sizes = [8, 32], strides = [1, 1]} : vector<8x96xf32> to vector<8x32xf32>
    %341 = math.tanh %334 : vector<8x32xf32>
    %342 = arith.mulf %340, %341 : vector<8x32xf32>
    %343 = vector.extract_strided_slice %327 {offsets = [0, 64], sizes = [8, 32], strides = [1, 1]} : vector<8x96xf32> to vector<8x32xf32>
    %344 = math.tanh %339 : vector<8x32xf32>
    %345 = arith.mulf %343, %344 : vector<8x32xf32>
    %346 = arith.truncf %342 : vector<8x32xf32> to vector<8x32xbf16>
    %347 = arith.index_cast %c5_i32 : i32 to index
    %c0_88 = arith.constant 0 : index
    %c0_89 = arith.constant 0 : index
    %348 = vector.load %arg14[%347, %c0_88, %c0_89] : memref<8x8x32xbf16, #tpu.memory_space<vmem>>, vector<1x8x32xbf16>
    %349 = vector.shape_cast %348 : vector<1x8x32xbf16> to vector<8x32xbf16>
    %350 = vector.shape_cast %346 : vector<8x32xbf16> to vector<1x8x32xbf16>
    tpu.vector_store %arg14[%347, %c0_88, %c0_89], %350 {strides = array<i32>} : memref<8x8x32xbf16, #tpu.memory_space<vmem>>, vector<1x8x32xbf16>,
    %351 = arith.truncf %345 : vector<8x32xf32> to vector<8x32xbf16>
    %352 = arith.index_cast %c5_i32 : i32 to index
    %c0_90 = arith.constant 0 : index
    %c0_91 = arith.constant 0 : index
    %353 = vector.load %arg15[%352, %c0_90, %c0_91] : memref<8x8x32xbf16, #tpu.memory_space<vmem>>, vector<1x8x32xbf16>
    %354 = vector.shape_cast %353 : vector<1x8x32xbf16> to vector<8x32xbf16>
    %355 = vector.shape_cast %351 : vector<8x32xbf16> to vector<1x8x32xbf16>
    tpu.vector_store %arg15[%352, %c0_90, %c0_91], %355 {strides = array<i32>} : memref<8x8x32xbf16, #tpu.memory_space<vmem>>, vector<1x8x32xbf16>,
    %c6_i32 = arith.constant 6 : i32
    %356 = arith.truncf %342 : vector<8x32xf32> to vector<8x32xbf16>
    %cst_92 = arith.constant dense<0.000000e+00> : vector<8x128xf32>
    %357 = tpu.matmul %356, %10, %cst_92 {dimension_numbers = #tpu.dot_dimension_numbers<[1], [0], [0], [1], [0, 0, 1, 1], [], []>} : vector<8x32xbf16>, vector<32x128xbf16>, vector<8x128xf32> -> vector<8x128xf32>
    %358 = arith.truncf %345 : vector<8x32xf32> to vector<8x32xbf16>
    %cst_93 = arith.constant dense<0.000000e+00> : vector<8x128xf32>
    %359 = tpu.matmul %358, %12, %cst_93 {dimension_numbers = #tpu.dot_dimension_numbers<[1], [0], [0], [1], [0, 0, 1, 1], [], []>} : vector<8x32xbf16>, vector<32x128xbf16>, vector<8x128xf32> -> vector<8x128xf32>
    %c7_i32_94 = arith.constant 7 : i32
    %360 = arith.subi %c7_i32_94, %c6_i32 : i32
    %361 = arith.index_cast %c6_i32 : i32 to index
    %c0_95 = arith.constant 0 : index
    %c0_96 = arith.constant 0 : index
    %362 = vector.load %arg12[%361, %c0_95, %c0_96] : memref<8x8x256xf32, #tpu.memory_space<vmem>>, vector<1x8x256xf32>
    %363 = vector.shape_cast %362 : vector<1x8x256xf32> to vector<8x256xf32>
    %364 = vector.extract_strided_slice %363 {offsets = [0, 0], sizes = [8, 128], strides = [1, 1]} : vector<8x256xf32> to vector<8x128xf32>
    %365 = arith.index_cast %360 : i32 to index
    %c0_97 = arith.constant 0 : index
    %c0_98 = arith.constant 0 : index
    %366 = vector.load %arg12[%365, %c0_97, %c0_98] : memref<8x8x256xf32, #tpu.memory_space<vmem>>, vector<1x8x256xf32>
    %367 = vector.shape_cast %366 : vector<1x8x256xf32> to vector<8x256xf32>
    %368 = vector.extract_strided_slice %367 {offsets = [0, 128], sizes = [8, 128], strides = [1, 1]} : vector<8x256xf32> to vector<8x128xf32>
    %369 = arith.addf %364, %357 : vector<8x128xf32>
    %370 = arith.addf %368, %359 : vector<8x128xf32>
    %371 = vector.extract_strided_slice %369 {offsets = [0, 0], sizes = [8, 96], strides = [1, 1]} : vector<8x128xf32> to vector<8x96xf32>
    %372 = arith.negf %371 : vector<8x96xf32>
    %373 = math.exp %372 : vector<8x96xf32>
    %cst_99 = arith.constant 1.000000e+00 : f32
    %374 = vector.broadcast %cst_99 : f32 to vector<8x96xf32>
    %375 = arith.addf %374, %373 : vector<8x96xf32>
    %376 = arith.divf %374, %375 : vector<8x96xf32>
    %377 = vector.extract_strided_slice %369 {offsets = [0, 96], sizes = [8, 32], strides = [1, 1]} : vector<8x128xf32> to vector<8x32xf32>
    %378 = math.tanh %377 : vector<8x32xf32>
    %379 = vector.extract_strided_slice %370 {offsets = [0, 0], sizes = [8, 96], strides = [1, 1]} : vector<8x128xf32> to vector<8x96xf32>
    %380 = arith.negf %379 : vector<8x96xf32>
    %381 = math.exp %380 : vector<8x96xf32>
    %cst_100 = arith.constant 1.000000e+00 : f32
    %382 = vector.broadcast %cst_100 : f32 to vector<8x96xf32>
    %383 = arith.addf %382, %381 : vector<8x96xf32>
    %384 = arith.divf %382, %383 : vector<8x96xf32>
    %385 = vector.extract_strided_slice %370 {offsets = [0, 96], sizes = [8, 32], strides = [1, 1]} : vector<8x128xf32> to vector<8x32xf32>
    %386 = math.tanh %385 : vector<8x32xf32>
    %387 = vector.extract_strided_slice %376 {offsets = [0, 32], sizes = [8, 32], strides = [1, 1]} : vector<8x96xf32> to vector<8x32xf32>
    %388 = arith.mulf %387, %334 : vector<8x32xf32>
    %389 = vector.extract_strided_slice %376 {offsets = [0, 0], sizes = [8, 32], strides = [1, 1]} : vector<8x96xf32> to vector<8x32xf32>
    %390 = arith.mulf %389, %378 : vector<8x32xf32>
    %391 = arith.addf %388, %390 : vector<8x32xf32>
    %392 = vector.extract_strided_slice %384 {offsets = [0, 32], sizes = [8, 32], strides = [1, 1]} : vector<8x96xf32> to vector<8x32xf32>
    %393 = arith.mulf %392, %339 : vector<8x32xf32>
    %394 = vector.extract_strided_slice %384 {offsets = [0, 0], sizes = [8, 32], strides = [1, 1]} : vector<8x96xf32> to vector<8x32xf32>
    %395 = arith.mulf %394, %386 : vector<8x32xf32>
    %396 = arith.addf %393, %395 : vector<8x32xf32>
    %397 = vector.extract_strided_slice %376 {offsets = [0, 64], sizes = [8, 32], strides = [1, 1]} : vector<8x96xf32> to vector<8x32xf32>
    %398 = math.tanh %391 : vector<8x32xf32>
    %399 = arith.mulf %397, %398 : vector<8x32xf32>
    %400 = vector.extract_strided_slice %384 {offsets = [0, 64], sizes = [8, 32], strides = [1, 1]} : vector<8x96xf32> to vector<8x32xf32>
    %401 = math.tanh %396 : vector<8x32xf32>
    %402 = arith.mulf %400, %401 : vector<8x32xf32>
    %403 = arith.truncf %399 : vector<8x32xf32> to vector<8x32xbf16>
    %404 = arith.index_cast %c6_i32 : i32 to index
    %c0_101 = arith.constant 0 : index
    %c0_102 = arith.constant 0 : index
    %405 = vector.load %arg14[%404, %c0_101, %c0_102] : memref<8x8x32xbf16, #tpu.memory_space<vmem>>, vector<1x8x32xbf16>
    %406 = vector.shape_cast %405 : vector<1x8x32xbf16> to vector<8x32xbf16>
    %407 = vector.shape_cast %403 : vector<8x32xbf16> to vector<1x8x32xbf16>
    tpu.vector_store %arg14[%404, %c0_101, %c0_102], %407 {strides = array<i32>} : memref<8x8x32xbf16, #tpu.memory_space<vmem>>, vector<1x8x32xbf16>,
    %408 = arith.truncf %402 : vector<8x32xf32> to vector<8x32xbf16>
    %409 = arith.index_cast %c6_i32 : i32 to index
    %c0_103 = arith.constant 0 : index
    %c0_104 = arith.constant 0 : index
    %410 = vector.load %arg15[%409, %c0_103, %c0_104] : memref<8x8x32xbf16, #tpu.memory_space<vmem>>, vector<1x8x32xbf16>
    %411 = vector.shape_cast %410 : vector<1x8x32xbf16> to vector<8x32xbf16>
    %412 = vector.shape_cast %408 : vector<8x32xbf16> to vector<1x8x32xbf16>
    tpu.vector_store %arg15[%409, %c0_103, %c0_104], %412 {strides = array<i32>} : memref<8x8x32xbf16, #tpu.memory_space<vmem>>, vector<1x8x32xbf16>,
    %c7_i32_105 = arith.constant 7 : i32
    %413 = arith.truncf %399 : vector<8x32xf32> to vector<8x32xbf16>
    %cst_106 = arith.constant dense<0.000000e+00> : vector<8x128xf32>
    %414 = tpu.matmul %413, %10, %cst_106 {dimension_numbers = #tpu.dot_dimension_numbers<[1], [0], [0], [1], [0, 0, 1, 1], [], []>} : vector<8x32xbf16>, vector<32x128xbf16>, vector<8x128xf32> -> vector<8x128xf32>
    %415 = arith.truncf %402 : vector<8x32xf32> to vector<8x32xbf16>
    %cst_107 = arith.constant dense<0.000000e+00> : vector<8x128xf32>
    %416 = tpu.matmul %415, %12, %cst_107 {dimension_numbers = #tpu.dot_dimension_numbers<[1], [0], [0], [1], [0, 0, 1, 1], [], []>} : vector<8x32xbf16>, vector<32x128xbf16>, vector<8x128xf32> -> vector<8x128xf32>
    %c7_i32_108 = arith.constant 7 : i32
    %417 = arith.subi %c7_i32_108, %c7_i32_105 : i32
    %418 = arith.index_cast %c7_i32_105 : i32 to index
    %c0_109 = arith.constant 0 : index
    %c0_110 = arith.constant 0 : index
    %419 = vector.load %arg12[%418, %c0_109, %c0_110] : memref<8x8x256xf32, #tpu.memory_space<vmem>>, vector<1x8x256xf32>
    %420 = vector.shape_cast %419 : vector<1x8x256xf32> to vector<8x256xf32>
    %421 = vector.extract_strided_slice %420 {offsets = [0, 0], sizes = [8, 128], strides = [1, 1]} : vector<8x256xf32> to vector<8x128xf32>
    %422 = arith.index_cast %417 : i32 to index
    %c0_111 = arith.constant 0 : index
    %c0_112 = arith.constant 0 : index
    %423 = vector.load %arg12[%422, %c0_111, %c0_112] : memref<8x8x256xf32, #tpu.memory_space<vmem>>, vector<1x8x256xf32>
    %424 = vector.shape_cast %423 : vector<1x8x256xf32> to vector<8x256xf32>
    %425 = vector.extract_strided_slice %424 {offsets = [0, 128], sizes = [8, 128], strides = [1, 1]} : vector<8x256xf32> to vector<8x128xf32>
    %426 = arith.addf %421, %414 : vector<8x128xf32>
    %427 = arith.addf %425, %416 : vector<8x128xf32>
    %428 = vector.extract_strided_slice %426 {offsets = [0, 0], sizes = [8, 96], strides = [1, 1]} : vector<8x128xf32> to vector<8x96xf32>
    %429 = arith.negf %428 : vector<8x96xf32>
    %430 = math.exp %429 : vector<8x96xf32>
    %cst_113 = arith.constant 1.000000e+00 : f32
    %431 = vector.broadcast %cst_113 : f32 to vector<8x96xf32>
    %432 = arith.addf %431, %430 : vector<8x96xf32>
    %433 = arith.divf %431, %432 : vector<8x96xf32>
    %434 = vector.extract_strided_slice %426 {offsets = [0, 96], sizes = [8, 32], strides = [1, 1]} : vector<8x128xf32> to vector<8x32xf32>
    %435 = math.tanh %434 : vector<8x32xf32>
    %436 = vector.extract_strided_slice %427 {offsets = [0, 0], sizes = [8, 96], strides = [1, 1]} : vector<8x128xf32> to vector<8x96xf32>
    %437 = arith.negf %436 : vector<8x96xf32>
    %438 = math.exp %437 : vector<8x96xf32>
    %cst_114 = arith.constant 1.000000e+00 : f32
    %439 = vector.broadcast %cst_114 : f32 to vector<8x96xf32>
    %440 = arith.addf %439, %438 : vector<8x96xf32>
    %441 = arith.divf %439, %440 : vector<8x96xf32>
    %442 = vector.extract_strided_slice %427 {offsets = [0, 96], sizes = [8, 32], strides = [1, 1]} : vector<8x128xf32> to vector<8x32xf32>
    %443 = math.tanh %442 : vector<8x32xf32>
    %444 = vector.extract_strided_slice %433 {offsets = [0, 32], sizes = [8, 32], strides = [1, 1]} : vector<8x96xf32> to vector<8x32xf32>
    %445 = arith.mulf %444, %391 : vector<8x32xf32>
    %446 = vector.extract_strided_slice %433 {offsets = [0, 0], sizes = [8, 32], strides = [1, 1]} : vector<8x96xf32> to vector<8x32xf32>
    %447 = arith.mulf %446, %435 : vector<8x32xf32>
    %448 = arith.addf %445, %447 : vector<8x32xf32>
    %449 = vector.extract_strided_slice %441 {offsets = [0, 32], sizes = [8, 32], strides = [1, 1]} : vector<8x96xf32> to vector<8x32xf32>
    %450 = arith.mulf %449, %396 : vector<8x32xf32>
    %451 = vector.extract_strided_slice %441 {offsets = [0, 0], sizes = [8, 32], strides = [1, 1]} : vector<8x96xf32> to vector<8x32xf32>
    %452 = arith.mulf %451, %443 : vector<8x32xf32>
    %453 = arith.addf %450, %452 : vector<8x32xf32>
    %454 = vector.extract_strided_slice %433 {offsets = [0, 64], sizes = [8, 32], strides = [1, 1]} : vector<8x96xf32> to vector<8x32xf32>
    %455 = math.tanh %448 : vector<8x32xf32>
    %456 = arith.mulf %454, %455 : vector<8x32xf32>
    %457 = vector.extract_strided_slice %441 {offsets = [0, 64], sizes = [8, 32], strides = [1, 1]} : vector<8x96xf32> to vector<8x32xf32>
    %458 = math.tanh %453 : vector<8x32xf32>
    %459 = arith.mulf %457, %458 : vector<8x32xf32>
    %460 = arith.truncf %456 : vector<8x32xf32> to vector<8x32xbf16>
    %461 = arith.index_cast %c7_i32_105 : i32 to index
    %c0_115 = arith.constant 0 : index
    %c0_116 = arith.constant 0 : index
    %462 = vector.load %arg14[%461, %c0_115, %c0_116] : memref<8x8x32xbf16, #tpu.memory_space<vmem>>, vector<1x8x32xbf16>
    %463 = vector.shape_cast %462 : vector<1x8x32xbf16> to vector<8x32xbf16>
    %464 = vector.shape_cast %460 : vector<8x32xbf16> to vector<1x8x32xbf16>
    tpu.vector_store %arg14[%461, %c0_115, %c0_116], %464 {strides = array<i32>} : memref<8x8x32xbf16, #tpu.memory_space<vmem>>, vector<1x8x32xbf16>,
    %465 = arith.truncf %459 : vector<8x32xf32> to vector<8x32xbf16>
    %466 = arith.index_cast %c7_i32_105 : i32 to index
    %c0_117 = arith.constant 0 : index
    %c0_118 = arith.constant 0 : index
    %467 = vector.load %arg15[%466, %c0_117, %c0_118] : memref<8x8x32xbf16, #tpu.memory_space<vmem>>, vector<1x8x32xbf16>
    %468 = vector.shape_cast %467 : vector<1x8x32xbf16> to vector<8x32xbf16>
    %469 = vector.shape_cast %465 : vector<8x32xbf16> to vector<1x8x32xbf16>
    tpu.vector_store %arg15[%466, %c0_117, %c0_118], %469 {strides = array<i32>} : memref<8x8x32xbf16, #tpu.memory_space<vmem>>, vector<1x8x32xbf16>,
    %c8_i32 = arith.constant 8 : i32
    %c0_119 = arith.constant 0 : index
    %c0_120 = arith.constant 0 : index
    %c0_121 = arith.constant 0 : index
    %470 = vector.load %arg14[%c0_119, %c0_120, %c0_121] : memref<8x8x32xbf16, #tpu.memory_space<vmem>>, vector<8x8x32xbf16>
    %471 = vector.shape_cast %470 : vector<8x8x32xbf16> to vector<64x32xbf16>
    %c0_122 = arith.constant 0 : index
    %c0_123 = arith.constant 0 : index
    %c0_124 = arith.constant 0 : index
    %472 = vector.load %arg15[%c0_122, %c0_123, %c0_124] : memref<8x8x32xbf16, #tpu.memory_space<vmem>>, vector<8x8x32xbf16>
    %473 = vector.shape_cast %472 : vector<8x8x32xbf16> to vector<64x32xbf16>
    %c0_125 = arith.constant 0 : index
    %c0_126 = arith.constant 0 : index
    %474 = vector.load %arg5[%c0_125, %c0_126] : memref<32x256xbf16, #tpu.memory_space<vmem>>, vector<32x256xbf16>
    %cst_127 = arith.constant dense<0.000000e+00> : vector<64x256xf32>
    %475 = tpu.matmul %471, %474, %cst_127 {dimension_numbers = #tpu.dot_dimension_numbers<[1], [0], [0], [1], [0, 0, 1, 1], [], []>} : vector<64x32xbf16>, vector<32x256xbf16>, vector<64x256xf32> -> vector<64x256xf32>
    %c0_128 = arith.constant 0 : index
    %c0_129 = arith.constant 0 : index
    %476 = vector.load %arg8[%c0_128, %c0_129] : memref<1x256xf32, #tpu.memory_space<vmem>>, vector<1x256xf32>
    %477 = vector.broadcast %476 : vector<1x256xf32> to vector<64x256xf32>
    %478 = arith.addf %475, %477 : vector<64x256xf32>
    %479 = vector.shape_cast %478 : vector<64x256xf32> to vector<8x8x256xf32>
    %c0_130 = arith.constant 0 : index
    %c0_131 = arith.constant 0 : index
    %c0_132 = arith.constant 0 : index
    %480 = vector.load %arg12[%c0_130, %c0_131, %c0_132] : memref<8x8x256xf32, #tpu.memory_space<vmem>>, vector<8x8x256xf32>
    tpu.vector_store %arg12[%c0_130, %c0_131, %c0_132], %479 {strides = array<i32>} : memref<8x8x256xf32, #tpu.memory_space<vmem>>, vector<8x8x256xf32>,
    %c0_133 = arith.constant 0 : index
    %c0_134 = arith.constant 0 : index
    %481 = vector.load %arg6[%c0_133, %c0_134] : memref<32x256xbf16, #tpu.memory_space<vmem>>, vector<32x256xbf16>
    %cst_135 = arith.constant dense<0.000000e+00> : vector<64x256xf32>
    %482 = tpu.matmul %473, %481, %cst_135 {dimension_numbers = #tpu.dot_dimension_numbers<[1], [0], [0], [1], [0, 0, 1, 1], [], []>} : vector<64x32xbf16>, vector<32x256xbf16>, vector<64x256xf32> -> vector<64x256xf32>
    %483 = vector.shape_cast %482 : vector<64x256xf32> to vector<8x8x256xf32>
    %c0_136 = arith.constant 0 : index
    %c0_137 = arith.constant 0 : index
    %c0_138 = arith.constant 0 : index
    %484 = vector.load %arg13[%c0_136, %c0_137, %c0_138] : memref<8x8x256xf32, #tpu.memory_space<vmem>>, vector<8x8x256xf32>
    tpu.vector_store %arg13[%c0_136, %c0_137, %c0_138], %483 {strides = array<i32>} : memref<8x8x256xf32, #tpu.memory_space<vmem>>, vector<8x8x256xf32>,
    %c0_139 = arith.constant 0 : index
    %c0_140 = arith.constant 0 : index
    %c0_141 = arith.constant 0 : index
    %485 = vector.load %arg7[%c0_139, %c0_140, %c0_141] : memref<2x32x128xbf16, #tpu.memory_space<vmem>>, vector<1x32x128xbf16>
    %486 = vector.shape_cast %485 : vector<1x32x128xbf16> to vector<32x128xbf16>
    %c1_142 = arith.constant 1 : index
    %c0_143 = arith.constant 0 : index
    %c0_144 = arith.constant 0 : index
    %487 = vector.load %arg7[%c1_142, %c0_143, %c0_144] : memref<2x32x128xbf16, #tpu.memory_space<vmem>>, vector<1x32x128xbf16>
    %488 = vector.shape_cast %487 : vector<1x32x128xbf16> to vector<32x128xbf16>
    %cst_145 = arith.constant 0.000000e+00 : f32
    %489 = vector.broadcast %cst_145 : f32 to vector<8x32xf32>
    %c0_i32_146 = arith.constant 0 : i32
    %490 = arith.truncf %489 : vector<8x32xf32> to vector<8x32xbf16>
    %cst_147 = arith.constant dense<0.000000e+00> : vector<8x128xf32>
    %491 = tpu.matmul %490, %486, %cst_147 {dimension_numbers = #tpu.dot_dimension_numbers<[1], [0], [0], [1], [0, 0, 1, 1], [], []>} : vector<8x32xbf16>, vector<32x128xbf16>, vector<8x128xf32> -> vector<8x128xf32>
    %492 = arith.truncf %489 : vector<8x32xf32> to vector<8x32xbf16>
    %cst_148 = arith.constant dense<0.000000e+00> : vector<8x128xf32>
    %493 = tpu.matmul %492, %488, %cst_148 {dimension_numbers = #tpu.dot_dimension_numbers<[1], [0], [0], [1], [0, 0, 1, 1], [], []>} : vector<8x32xbf16>, vector<32x128xbf16>, vector<8x128xf32> -> vector<8x128xf32>
    %c7_i32_149 = arith.constant 7 : i32
    %494 = arith.subi %c7_i32_149, %c0_i32_146 : i32
    %495 = arith.index_cast %c0_i32_146 : i32 to index
    %c0_150 = arith.constant 0 : index
    %c0_151 = arith.constant 0 : index
    %496 = vector.load %arg12[%495, %c0_150, %c0_151] : memref<8x8x256xf32, #tpu.memory_space<vmem>>, vector<1x8x256xf32>
    %497 = vector.shape_cast %496 : vector<1x8x256xf32> to vector<8x256xf32>
    %498 = arith.index_cast %494 : i32 to index
    %c0_152 = arith.constant 0 : index
    %c0_153 = arith.constant 0 : index
    %499 = vector.load %arg12[%498, %c0_152, %c0_153] : memref<8x8x256xf32, #tpu.memory_space<vmem>>, vector<1x8x256xf32>
    %500 = vector.shape_cast %499 : vector<1x8x256xf32> to vector<8x256xf32>
    %501 = arith.index_cast %c0_i32_146 : i32 to index
    %c0_154 = arith.constant 0 : index
    %c0_155 = arith.constant 0 : index
    %502 = vector.load %arg13[%501, %c0_154, %c0_155] : memref<8x8x256xf32, #tpu.memory_space<vmem>>, vector<1x8x256xf32>
    %503 = vector.shape_cast %502 : vector<1x8x256xf32> to vector<8x256xf32>
    %504 = arith.index_cast %494 : i32 to index
    %c0_156 = arith.constant 0 : index
    %c0_157 = arith.constant 0 : index
    %505 = vector.load %arg13[%504, %c0_156, %c0_157] : memref<8x8x256xf32, #tpu.memory_space<vmem>>, vector<1x8x256xf32>
    %506 = vector.shape_cast %505 : vector<1x8x256xf32> to vector<8x256xf32>
    %507 = vector.extract_strided_slice %497 {offsets = [0, 0], sizes = [8, 128], strides = [1, 1]} : vector<8x256xf32> to vector<8x128xf32>
    %508 = vector.extract_strided_slice %506 {offsets = [0, 0], sizes = [8, 128], strides = [1, 1]} : vector<8x256xf32> to vector<8x128xf32>
    %509 = arith.addf %507, %508 : vector<8x128xf32>
    %510 = vector.extract_strided_slice %500 {offsets = [0, 128], sizes = [8, 128], strides = [1, 1]} : vector<8x256xf32> to vector<8x128xf32>
    %511 = vector.extract_strided_slice %503 {offsets = [0, 128], sizes = [8, 128], strides = [1, 1]} : vector<8x256xf32> to vector<8x128xf32>
    %512 = arith.addf %510, %511 : vector<8x128xf32>
    %513 = arith.addf %509, %491 : vector<8x128xf32>
    %514 = arith.addf %512, %493 : vector<8x128xf32>
    %515 = vector.extract_strided_slice %513 {offsets = [0, 0], sizes = [8, 96], strides = [1, 1]} : vector<8x128xf32> to vector<8x96xf32>
    %516 = arith.negf %515 : vector<8x96xf32>
    %517 = math.exp %516 : vector<8x96xf32>
    %cst_158 = arith.constant 1.000000e+00 : f32
    %518 = vector.broadcast %cst_158 : f32 to vector<8x96xf32>
    %519 = arith.addf %518, %517 : vector<8x96xf32>
    %520 = arith.divf %518, %519 : vector<8x96xf32>
    %521 = vector.extract_strided_slice %513 {offsets = [0, 96], sizes = [8, 32], strides = [1, 1]} : vector<8x128xf32> to vector<8x32xf32>
    %522 = math.tanh %521 : vector<8x32xf32>
    %523 = vector.extract_strided_slice %514 {offsets = [0, 0], sizes = [8, 96], strides = [1, 1]} : vector<8x128xf32> to vector<8x96xf32>
    %524 = arith.negf %523 : vector<8x96xf32>
    %525 = math.exp %524 : vector<8x96xf32>
    %cst_159 = arith.constant 1.000000e+00 : f32
    %526 = vector.broadcast %cst_159 : f32 to vector<8x96xf32>
    %527 = arith.addf %526, %525 : vector<8x96xf32>
    %528 = arith.divf %526, %527 : vector<8x96xf32>
    %529 = vector.extract_strided_slice %514 {offsets = [0, 96], sizes = [8, 32], strides = [1, 1]} : vector<8x128xf32> to vector<8x32xf32>
    %530 = math.tanh %529 : vector<8x32xf32>
    %531 = vector.extract_strided_slice %520 {offsets = [0, 32], sizes = [8, 32], strides = [1, 1]} : vector<8x96xf32> to vector<8x32xf32>
    %532 = arith.mulf %531, %489 : vector<8x32xf32>
    %533 = vector.extract_strided_slice %520 {offsets = [0, 0], sizes = [8, 32], strides = [1, 1]} : vector<8x96xf32> to vector<8x32xf32>
    %534 = arith.mulf %533, %522 : vector<8x32xf32>
    %535 = arith.addf %532, %534 : vector<8x32xf32>
    %536 = vector.extract_strided_slice %528 {offsets = [0, 32], sizes = [8, 32], strides = [1, 1]} : vector<8x96xf32> to vector<8x32xf32>
    %537 = arith.mulf %536, %489 : vector<8x32xf32>
    %538 = vector.extract_strided_slice %528 {offsets = [0, 0], sizes = [8, 32], strides = [1, 1]} : vector<8x96xf32> to vector<8x32xf32>
    %539 = arith.mulf %538, %530 : vector<8x32xf32>
    %540 = arith.addf %537, %539 : vector<8x32xf32>
    %541 = vector.extract_strided_slice %520 {offsets = [0, 64], sizes = [8, 32], strides = [1, 1]} : vector<8x96xf32> to vector<8x32xf32>
    %542 = math.tanh %535 : vector<8x32xf32>
    %543 = arith.mulf %541, %542 : vector<8x32xf32>
    %544 = vector.extract_strided_slice %528 {offsets = [0, 64], sizes = [8, 32], strides = [1, 1]} : vector<8x96xf32> to vector<8x32xf32>
    %545 = math.tanh %540 : vector<8x32xf32>
    %546 = arith.mulf %544, %545 : vector<8x32xf32>
    %c1_i32_160 = arith.constant 1 : i32
    %547 = arith.truncf %543 : vector<8x32xf32> to vector<8x32xbf16>
    %cst_161 = arith.constant dense<0.000000e+00> : vector<8x128xf32>
    %548 = tpu.matmul %547, %486, %cst_161 {dimension_numbers = #tpu.dot_dimension_numbers<[1], [0], [0], [1], [0, 0, 1, 1], [], []>} : vector<8x32xbf16>, vector<32x128xbf16>, vector<8x128xf32> -> vector<8x128xf32>
    %549 = arith.truncf %546 : vector<8x32xf32> to vector<8x32xbf16>
    %cst_162 = arith.constant dense<0.000000e+00> : vector<8x128xf32>
    %550 = tpu.matmul %549, %488, %cst_162 {dimension_numbers = #tpu.dot_dimension_numbers<[1], [0], [0], [1], [0, 0, 1, 1], [], []>} : vector<8x32xbf16>, vector<32x128xbf16>, vector<8x128xf32> -> vector<8x128xf32>
    %c7_i32_163 = arith.constant 7 : i32
    %551 = arith.subi %c7_i32_163, %c1_i32_160 : i32
    %552 = arith.index_cast %c1_i32_160 : i32 to index
    %c0_164 = arith.constant 0 : index
    %c0_165 = arith.constant 0 : index
    %553 = vector.load %arg12[%552, %c0_164, %c0_165] : memref<8x8x256xf32, #tpu.memory_space<vmem>>, vector<1x8x256xf32>
    %554 = vector.shape_cast %553 : vector<1x8x256xf32> to vector<8x256xf32>
    %555 = arith.index_cast %551 : i32 to index
    %c0_166 = arith.constant 0 : index
    %c0_167 = arith.constant 0 : index
    %556 = vector.load %arg12[%555, %c0_166, %c0_167] : memref<8x8x256xf32, #tpu.memory_space<vmem>>, vector<1x8x256xf32>
    %557 = vector.shape_cast %556 : vector<1x8x256xf32> to vector<8x256xf32>
    %558 = arith.index_cast %c1_i32_160 : i32 to index
    %c0_168 = arith.constant 0 : index
    %c0_169 = arith.constant 0 : index
    %559 = vector.load %arg13[%558, %c0_168, %c0_169] : memref<8x8x256xf32, #tpu.memory_space<vmem>>, vector<1x8x256xf32>
    %560 = vector.shape_cast %559 : vector<1x8x256xf32> to vector<8x256xf32>
    %561 = arith.index_cast %551 : i32 to index
    %c0_170 = arith.constant 0 : index
    %c0_171 = arith.constant 0 : index
    %562 = vector.load %arg13[%561, %c0_170, %c0_171] : memref<8x8x256xf32, #tpu.memory_space<vmem>>, vector<1x8x256xf32>
    %563 = vector.shape_cast %562 : vector<1x8x256xf32> to vector<8x256xf32>
    %564 = vector.extract_strided_slice %554 {offsets = [0, 0], sizes = [8, 128], strides = [1, 1]} : vector<8x256xf32> to vector<8x128xf32>
    %565 = vector.extract_strided_slice %563 {offsets = [0, 0], sizes = [8, 128], strides = [1, 1]} : vector<8x256xf32> to vector<8x128xf32>
    %566 = arith.addf %564, %565 : vector<8x128xf32>
    %567 = vector.extract_strided_slice %557 {offsets = [0, 128], sizes = [8, 128], strides = [1, 1]} : vector<8x256xf32> to vector<8x128xf32>
    %568 = vector.extract_strided_slice %560 {offsets = [0, 128], sizes = [8, 128], strides = [1, 1]} : vector<8x256xf32> to vector<8x128xf32>
    %569 = arith.addf %567, %568 : vector<8x128xf32>
    %570 = arith.addf %566, %548 : vector<8x128xf32>
    %571 = arith.addf %569, %550 : vector<8x128xf32>
    %572 = vector.extract_strided_slice %570 {offsets = [0, 0], sizes = [8, 96], strides = [1, 1]} : vector<8x128xf32> to vector<8x96xf32>
    %573 = arith.negf %572 : vector<8x96xf32>
    %574 = math.exp %573 : vector<8x96xf32>
    %cst_172 = arith.constant 1.000000e+00 : f32
    %575 = vector.broadcast %cst_172 : f32 to vector<8x96xf32>
    %576 = arith.addf %575, %574 : vector<8x96xf32>
    %577 = arith.divf %575, %576 : vector<8x96xf32>
    %578 = vector.extract_strided_slice %570 {offsets = [0, 96], sizes = [8, 32], strides = [1, 1]} : vector<8x128xf32> to vector<8x32xf32>
    %579 = math.tanh %578 : vector<8x32xf32>
    %580 = vector.extract_strided_slice %571 {offsets = [0, 0], sizes = [8, 96], strides = [1, 1]} : vector<8x128xf32> to vector<8x96xf32>
    %581 = arith.negf %580 : vector<8x96xf32>
    %582 = math.exp %581 : vector<8x96xf32>
    %cst_173 = arith.constant 1.000000e+00 : f32
    %583 = vector.broadcast %cst_173 : f32 to vector<8x96xf32>
    %584 = arith.addf %583, %582 : vector<8x96xf32>
    %585 = arith.divf %583, %584 : vector<8x96xf32>
    %586 = vector.extract_strided_slice %571 {offsets = [0, 96], sizes = [8, 32], strides = [1, 1]} : vector<8x128xf32> to vector<8x32xf32>
    %587 = math.tanh %586 : vector<8x32xf32>
    %588 = vector.extract_strided_slice %577 {offsets = [0, 32], sizes = [8, 32], strides = [1, 1]} : vector<8x96xf32> to vector<8x32xf32>
    %589 = arith.mulf %588, %535 : vector<8x32xf32>
    %590 = vector.extract_strided_slice %577 {offsets = [0, 0], sizes = [8, 32], strides = [1, 1]} : vector<8x96xf32> to vector<8x32xf32>
    %591 = arith.mulf %590, %579 : vector<8x32xf32>
    %592 = arith.addf %589, %591 : vector<8x32xf32>
    %593 = vector.extract_strided_slice %585 {offsets = [0, 32], sizes = [8, 32], strides = [1, 1]} : vector<8x96xf32> to vector<8x32xf32>
    %594 = arith.mulf %593, %540 : vector<8x32xf32>
    %595 = vector.extract_strided_slice %585 {offsets = [0, 0], sizes = [8, 32], strides = [1, 1]} : vector<8x96xf32> to vector<8x32xf32>
    %596 = arith.mulf %595, %587 : vector<8x32xf32>
    %597 = arith.addf %594, %596 : vector<8x32xf32>
    %598 = vector.extract_strided_slice %577 {offsets = [0, 64], sizes = [8, 32], strides = [1, 1]} : vector<8x96xf32> to vector<8x32xf32>
    %599 = math.tanh %592 : vector<8x32xf32>
    %600 = arith.mulf %598, %599 : vector<8x32xf32>
    %601 = vector.extract_strided_slice %585 {offsets = [0, 64], sizes = [8, 32], strides = [1, 1]} : vector<8x96xf32> to vector<8x32xf32>
    %602 = math.tanh %597 : vector<8x32xf32>
    %603 = arith.mulf %601, %602 : vector<8x32xf32>
    %c2_i32_174 = arith.constant 2 : i32
    %604 = arith.truncf %600 : vector<8x32xf32> to vector<8x32xbf16>
    %cst_175 = arith.constant dense<0.000000e+00> : vector<8x128xf32>
    %605 = tpu.matmul %604, %486, %cst_175 {dimension_numbers = #tpu.dot_dimension_numbers<[1], [0], [0], [1], [0, 0, 1, 1], [], []>} : vector<8x32xbf16>, vector<32x128xbf16>, vector<8x128xf32> -> vector<8x128xf32>
    %606 = arith.truncf %603 : vector<8x32xf32> to vector<8x32xbf16>
    %cst_176 = arith.constant dense<0.000000e+00> : vector<8x128xf32>
    %607 = tpu.matmul %606, %488, %cst_176 {dimension_numbers = #tpu.dot_dimension_numbers<[1], [0], [0], [1], [0, 0, 1, 1], [], []>} : vector<8x32xbf16>, vector<32x128xbf16>, vector<8x128xf32> -> vector<8x128xf32>
    %c7_i32_177 = arith.constant 7 : i32
    %608 = arith.subi %c7_i32_177, %c2_i32_174 : i32
    %609 = arith.index_cast %c2_i32_174 : i32 to index
    %c0_178 = arith.constant 0 : index
    %c0_179 = arith.constant 0 : index
    %610 = vector.load %arg12[%609, %c0_178, %c0_179] : memref<8x8x256xf32, #tpu.memory_space<vmem>>, vector<1x8x256xf32>
    %611 = vector.shape_cast %610 : vector<1x8x256xf32> to vector<8x256xf32>
    %612 = arith.index_cast %608 : i32 to index
    %c0_180 = arith.constant 0 : index
    %c0_181 = arith.constant 0 : index
    %613 = vector.load %arg12[%612, %c0_180, %c0_181] : memref<8x8x256xf32, #tpu.memory_space<vmem>>, vector<1x8x256xf32>
    %614 = vector.shape_cast %613 : vector<1x8x256xf32> to vector<8x256xf32>
    %615 = arith.index_cast %c2_i32_174 : i32 to index
    %c0_182 = arith.constant 0 : index
    %c0_183 = arith.constant 0 : index
    %616 = vector.load %arg13[%615, %c0_182, %c0_183] : memref<8x8x256xf32, #tpu.memory_space<vmem>>, vector<1x8x256xf32>
    %617 = vector.shape_cast %616 : vector<1x8x256xf32> to vector<8x256xf32>
    %618 = arith.index_cast %608 : i32 to index
    %c0_184 = arith.constant 0 : index
    %c0_185 = arith.constant 0 : index
    %619 = vector.load %arg13[%618, %c0_184, %c0_185] : memref<8x8x256xf32, #tpu.memory_space<vmem>>, vector<1x8x256xf32>
    %620 = vector.shape_cast %619 : vector<1x8x256xf32> to vector<8x256xf32>
    %621 = vector.extract_strided_slice %611 {offsets = [0, 0], sizes = [8, 128], strides = [1, 1]} : vector<8x256xf32> to vector<8x128xf32>
    %622 = vector.extract_strided_slice %620 {offsets = [0, 0], sizes = [8, 128], strides = [1, 1]} : vector<8x256xf32> to vector<8x128xf32>
    %623 = arith.addf %621, %622 : vector<8x128xf32>
    %624 = vector.extract_strided_slice %614 {offsets = [0, 128], sizes = [8, 128], strides = [1, 1]} : vector<8x256xf32> to vector<8x128xf32>
    %625 = vector.extract_strided_slice %617 {offsets = [0, 128], sizes = [8, 128], strides = [1, 1]} : vector<8x256xf32> to vector<8x128xf32>
    %626 = arith.addf %624, %625 : vector<8x128xf32>
    %627 = arith.addf %623, %605 : vector<8x128xf32>
    %628 = arith.addf %626, %607 : vector<8x128xf32>
    %629 = vector.extract_strided_slice %627 {offsets = [0, 0], sizes = [8, 96], strides = [1, 1]} : vector<8x128xf32> to vector<8x96xf32>
    %630 = arith.negf %629 : vector<8x96xf32>
    %631 = math.exp %630 : vector<8x96xf32>
    %cst_186 = arith.constant 1.000000e+00 : f32
    %632 = vector.broadcast %cst_186 : f32 to vector<8x96xf32>
    %633 = arith.addf %632, %631 : vector<8x96xf32>
    %634 = arith.divf %632, %633 : vector<8x96xf32>
    %635 = vector.extract_strided_slice %627 {offsets = [0, 96], sizes = [8, 32], strides = [1, 1]} : vector<8x128xf32> to vector<8x32xf32>
    %636 = math.tanh %635 : vector<8x32xf32>
    %637 = vector.extract_strided_slice %628 {offsets = [0, 0], sizes = [8, 96], strides = [1, 1]} : vector<8x128xf32> to vector<8x96xf32>
    %638 = arith.negf %637 : vector<8x96xf32>
    %639 = math.exp %638 : vector<8x96xf32>
    %cst_187 = arith.constant 1.000000e+00 : f32
    %640 = vector.broadcast %cst_187 : f32 to vector<8x96xf32>
    %641 = arith.addf %640, %639 : vector<8x96xf32>
    %642 = arith.divf %640, %641 : vector<8x96xf32>
    %643 = vector.extract_strided_slice %628 {offsets = [0, 96], sizes = [8, 32], strides = [1, 1]} : vector<8x128xf32> to vector<8x32xf32>
    %644 = math.tanh %643 : vector<8x32xf32>
    %645 = vector.extract_strided_slice %634 {offsets = [0, 32], sizes = [8, 32], strides = [1, 1]} : vector<8x96xf32> to vector<8x32xf32>
    %646 = arith.mulf %645, %592 : vector<8x32xf32>
    %647 = vector.extract_strided_slice %634 {offsets = [0, 0], sizes = [8, 32], strides = [1, 1]} : vector<8x96xf32> to vector<8x32xf32>
    %648 = arith.mulf %647, %636 : vector<8x32xf32>
    %649 = arith.addf %646, %648 : vector<8x32xf32>
    %650 = vector.extract_strided_slice %642 {offsets = [0, 32], sizes = [8, 32], strides = [1, 1]} : vector<8x96xf32> to vector<8x32xf32>
    %651 = arith.mulf %650, %597 : vector<8x32xf32>
    %652 = vector.extract_strided_slice %642 {offsets = [0, 0], sizes = [8, 32], strides = [1, 1]} : vector<8x96xf32> to vector<8x32xf32>
    %653 = arith.mulf %652, %644 : vector<8x32xf32>
    %654 = arith.addf %651, %653 : vector<8x32xf32>
    %655 = vector.extract_strided_slice %634 {offsets = [0, 64], sizes = [8, 32], strides = [1, 1]} : vector<8x96xf32> to vector<8x32xf32>
    %656 = math.tanh %649 : vector<8x32xf32>
    %657 = arith.mulf %655, %656 : vector<8x32xf32>
    %658 = vector.extract_strided_slice %642 {offsets = [0, 64], sizes = [8, 32], strides = [1, 1]} : vector<8x96xf32> to vector<8x32xf32>
    %659 = math.tanh %654 : vector<8x32xf32>
    %660 = arith.mulf %658, %659 : vector<8x32xf32>
    %c3_i32_188 = arith.constant 3 : i32
    %661 = arith.truncf %657 : vector<8x32xf32> to vector<8x32xbf16>
    %cst_189 = arith.constant dense<0.000000e+00> : vector<8x128xf32>
    %662 = tpu.matmul %661, %486, %cst_189 {dimension_numbers = #tpu.dot_dimension_numbers<[1], [0], [0], [1], [0, 0, 1, 1], [], []>} : vector<8x32xbf16>, vector<32x128xbf16>, vector<8x128xf32> -> vector<8x128xf32>
    %663 = arith.truncf %660 : vector<8x32xf32> to vector<8x32xbf16>
    %cst_190 = arith.constant dense<0.000000e+00> : vector<8x128xf32>
    %664 = tpu.matmul %663, %488, %cst_190 {dimension_numbers = #tpu.dot_dimension_numbers<[1], [0], [0], [1], [0, 0, 1, 1], [], []>} : vector<8x32xbf16>, vector<32x128xbf16>, vector<8x128xf32> -> vector<8x128xf32>
    %c7_i32_191 = arith.constant 7 : i32
    %665 = arith.subi %c7_i32_191, %c3_i32_188 : i32
    %666 = arith.index_cast %c3_i32_188 : i32 to index
    %c0_192 = arith.constant 0 : index
    %c0_193 = arith.constant 0 : index
    %667 = vector.load %arg12[%666, %c0_192, %c0_193] : memref<8x8x256xf32, #tpu.memory_space<vmem>>, vector<1x8x256xf32>
    %668 = vector.shape_cast %667 : vector<1x8x256xf32> to vector<8x256xf32>
    %669 = arith.index_cast %665 : i32 to index
    %c0_194 = arith.constant 0 : index
    %c0_195 = arith.constant 0 : index
    %670 = vector.load %arg12[%669, %c0_194, %c0_195] : memref<8x8x256xf32, #tpu.memory_space<vmem>>, vector<1x8x256xf32>
    %671 = vector.shape_cast %670 : vector<1x8x256xf32> to vector<8x256xf32>
    %672 = arith.index_cast %c3_i32_188 : i32 to index
    %c0_196 = arith.constant 0 : index
    %c0_197 = arith.constant 0 : index
    %673 = vector.load %arg13[%672, %c0_196, %c0_197] : memref<8x8x256xf32, #tpu.memory_space<vmem>>, vector<1x8x256xf32>
    %674 = vector.shape_cast %673 : vector<1x8x256xf32> to vector<8x256xf32>
    %675 = arith.index_cast %665 : i32 to index
    %c0_198 = arith.constant 0 : index
    %c0_199 = arith.constant 0 : index
    %676 = vector.load %arg13[%675, %c0_198, %c0_199] : memref<8x8x256xf32, #tpu.memory_space<vmem>>, vector<1x8x256xf32>
    %677 = vector.shape_cast %676 : vector<1x8x256xf32> to vector<8x256xf32>
    %678 = vector.extract_strided_slice %668 {offsets = [0, 0], sizes = [8, 128], strides = [1, 1]} : vector<8x256xf32> to vector<8x128xf32>
    %679 = vector.extract_strided_slice %677 {offsets = [0, 0], sizes = [8, 128], strides = [1, 1]} : vector<8x256xf32> to vector<8x128xf32>
    %680 = arith.addf %678, %679 : vector<8x128xf32>
    %681 = vector.extract_strided_slice %671 {offsets = [0, 128], sizes = [8, 128], strides = [1, 1]} : vector<8x256xf32> to vector<8x128xf32>
    %682 = vector.extract_strided_slice %674 {offsets = [0, 128], sizes = [8, 128], strides = [1, 1]} : vector<8x256xf32> to vector<8x128xf32>
    %683 = arith.addf %681, %682 : vector<8x128xf32>
    %684 = arith.addf %680, %662 : vector<8x128xf32>
    %685 = arith.addf %683, %664 : vector<8x128xf32>
    %686 = vector.extract_strided_slice %684 {offsets = [0, 0], sizes = [8, 96], strides = [1, 1]} : vector<8x128xf32> to vector<8x96xf32>
    %687 = arith.negf %686 : vector<8x96xf32>
    %688 = math.exp %687 : vector<8x96xf32>
    %cst_200 = arith.constant 1.000000e+00 : f32
    %689 = vector.broadcast %cst_200 : f32 to vector<8x96xf32>
    %690 = arith.addf %689, %688 : vector<8x96xf32>
    %691 = arith.divf %689, %690 : vector<8x96xf32>
    %692 = vector.extract_strided_slice %684 {offsets = [0, 96], sizes = [8, 32], strides = [1, 1]} : vector<8x128xf32> to vector<8x32xf32>
    %693 = math.tanh %692 : vector<8x32xf32>
    %694 = vector.extract_strided_slice %685 {offsets = [0, 0], sizes = [8, 96], strides = [1, 1]} : vector<8x128xf32> to vector<8x96xf32>
    %695 = arith.negf %694 : vector<8x96xf32>
    %696 = math.exp %695 : vector<8x96xf32>
    %cst_201 = arith.constant 1.000000e+00 : f32
    %697 = vector.broadcast %cst_201 : f32 to vector<8x96xf32>
    %698 = arith.addf %697, %696 : vector<8x96xf32>
    %699 = arith.divf %697, %698 : vector<8x96xf32>
    %700 = vector.extract_strided_slice %685 {offsets = [0, 96], sizes = [8, 32], strides = [1, 1]} : vector<8x128xf32> to vector<8x32xf32>
    %701 = math.tanh %700 : vector<8x32xf32>
    %702 = vector.extract_strided_slice %691 {offsets = [0, 32], sizes = [8, 32], strides = [1, 1]} : vector<8x96xf32> to vector<8x32xf32>
    %703 = arith.mulf %702, %649 : vector<8x32xf32>
    %704 = vector.extract_strided_slice %691 {offsets = [0, 0], sizes = [8, 32], strides = [1, 1]} : vector<8x96xf32> to vector<8x32xf32>
    %705 = arith.mulf %704, %693 : vector<8x32xf32>
    %706 = arith.addf %703, %705 : vector<8x32xf32>
    %707 = vector.extract_strided_slice %699 {offsets = [0, 32], sizes = [8, 32], strides = [1, 1]} : vector<8x96xf32> to vector<8x32xf32>
    %708 = arith.mulf %707, %654 : vector<8x32xf32>
    %709 = vector.extract_strided_slice %699 {offsets = [0, 0], sizes = [8, 32], strides = [1, 1]} : vector<8x96xf32> to vector<8x32xf32>
    %710 = arith.mulf %709, %701 : vector<8x32xf32>
    %711 = arith.addf %708, %710 : vector<8x32xf32>
    %712 = vector.extract_strided_slice %691 {offsets = [0, 64], sizes = [8, 32], strides = [1, 1]} : vector<8x96xf32> to vector<8x32xf32>
    %713 = math.tanh %706 : vector<8x32xf32>
    %714 = arith.mulf %712, %713 : vector<8x32xf32>
    %715 = vector.extract_strided_slice %699 {offsets = [0, 64], sizes = [8, 32], strides = [1, 1]} : vector<8x96xf32> to vector<8x32xf32>
    %716 = math.tanh %711 : vector<8x32xf32>
    %717 = arith.mulf %715, %716 : vector<8x32xf32>
    %c4_i32_202 = arith.constant 4 : i32
    %718 = arith.truncf %714 : vector<8x32xf32> to vector<8x32xbf16>
    %cst_203 = arith.constant dense<0.000000e+00> : vector<8x128xf32>
    %719 = tpu.matmul %718, %486, %cst_203 {dimension_numbers = #tpu.dot_dimension_numbers<[1], [0], [0], [1], [0, 0, 1, 1], [], []>} : vector<8x32xbf16>, vector<32x128xbf16>, vector<8x128xf32> -> vector<8x128xf32>
    %720 = arith.truncf %717 : vector<8x32xf32> to vector<8x32xbf16>
    %cst_204 = arith.constant dense<0.000000e+00> : vector<8x128xf32>
    %721 = tpu.matmul %720, %488, %cst_204 {dimension_numbers = #tpu.dot_dimension_numbers<[1], [0], [0], [1], [0, 0, 1, 1], [], []>} : vector<8x32xbf16>, vector<32x128xbf16>, vector<8x128xf32> -> vector<8x128xf32>
    %c7_i32_205 = arith.constant 7 : i32
    %722 = arith.subi %c7_i32_205, %c4_i32_202 : i32
    %723 = arith.index_cast %c4_i32_202 : i32 to index
    %c0_206 = arith.constant 0 : index
    %c0_207 = arith.constant 0 : index
    %724 = vector.load %arg12[%723, %c0_206, %c0_207] : memref<8x8x256xf32, #tpu.memory_space<vmem>>, vector<1x8x256xf32>
    %725 = vector.shape_cast %724 : vector<1x8x256xf32> to vector<8x256xf32>
    %726 = arith.index_cast %722 : i32 to index
    %c0_208 = arith.constant 0 : index
    %c0_209 = arith.constant 0 : index
    %727 = vector.load %arg12[%726, %c0_208, %c0_209] : memref<8x8x256xf32, #tpu.memory_space<vmem>>, vector<1x8x256xf32>
    %728 = vector.shape_cast %727 : vector<1x8x256xf32> to vector<8x256xf32>
    %729 = arith.index_cast %c4_i32_202 : i32 to index
    %c0_210 = arith.constant 0 : index
    %c0_211 = arith.constant 0 : index
    %730 = vector.load %arg13[%729, %c0_210, %c0_211] : memref<8x8x256xf32, #tpu.memory_space<vmem>>, vector<1x8x256xf32>
    %731 = vector.shape_cast %730 : vector<1x8x256xf32> to vector<8x256xf32>
    %732 = arith.index_cast %722 : i32 to index
    %c0_212 = arith.constant 0 : index
    %c0_213 = arith.constant 0 : index
    %733 = vector.load %arg13[%732, %c0_212, %c0_213] : memref<8x8x256xf32, #tpu.memory_space<vmem>>, vector<1x8x256xf32>
    %734 = vector.shape_cast %733 : vector<1x8x256xf32> to vector<8x256xf32>
    %735 = vector.extract_strided_slice %725 {offsets = [0, 0], sizes = [8, 128], strides = [1, 1]} : vector<8x256xf32> to vector<8x128xf32>
    %736 = vector.extract_strided_slice %734 {offsets = [0, 0], sizes = [8, 128], strides = [1, 1]} : vector<8x256xf32> to vector<8x128xf32>
    %737 = arith.addf %735, %736 : vector<8x128xf32>
    %738 = vector.extract_strided_slice %728 {offsets = [0, 128], sizes = [8, 128], strides = [1, 1]} : vector<8x256xf32> to vector<8x128xf32>
    %739 = vector.extract_strided_slice %731 {offsets = [0, 128], sizes = [8, 128], strides = [1, 1]} : vector<8x256xf32> to vector<8x128xf32>
    %740 = arith.addf %738, %739 : vector<8x128xf32>
    %741 = arith.addf %737, %719 : vector<8x128xf32>
    %742 = arith.addf %740, %721 : vector<8x128xf32>
    %743 = vector.extract_strided_slice %741 {offsets = [0, 0], sizes = [8, 96], strides = [1, 1]} : vector<8x128xf32> to vector<8x96xf32>
    %744 = arith.negf %743 : vector<8x96xf32>
    %745 = math.exp %744 : vector<8x96xf32>
    %cst_214 = arith.constant 1.000000e+00 : f32
    %746 = vector.broadcast %cst_214 : f32 to vector<8x96xf32>
    %747 = arith.addf %746, %745 : vector<8x96xf32>
    %748 = arith.divf %746, %747 : vector<8x96xf32>
    %749 = vector.extract_strided_slice %741 {offsets = [0, 96], sizes = [8, 32], strides = [1, 1]} : vector<8x128xf32> to vector<8x32xf32>
    %750 = math.tanh %749 : vector<8x32xf32>
    %751 = vector.extract_strided_slice %742 {offsets = [0, 0], sizes = [8, 96], strides = [1, 1]} : vector<8x128xf32> to vector<8x96xf32>
    %752 = arith.negf %751 : vector<8x96xf32>
    %753 = math.exp %752 : vector<8x96xf32>
    %cst_215 = arith.constant 1.000000e+00 : f32
    %754 = vector.broadcast %cst_215 : f32 to vector<8x96xf32>
    %755 = arith.addf %754, %753 : vector<8x96xf32>
    %756 = arith.divf %754, %755 : vector<8x96xf32>
    %757 = vector.extract_strided_slice %742 {offsets = [0, 96], sizes = [8, 32], strides = [1, 1]} : vector<8x128xf32> to vector<8x32xf32>
    %758 = math.tanh %757 : vector<8x32xf32>
    %759 = vector.extract_strided_slice %748 {offsets = [0, 32], sizes = [8, 32], strides = [1, 1]} : vector<8x96xf32> to vector<8x32xf32>
    %760 = arith.mulf %759, %706 : vector<8x32xf32>
    %761 = vector.extract_strided_slice %748 {offsets = [0, 0], sizes = [8, 32], strides = [1, 1]} : vector<8x96xf32> to vector<8x32xf32>
    %762 = arith.mulf %761, %750 : vector<8x32xf32>
    %763 = arith.addf %760, %762 : vector<8x32xf32>
    %764 = vector.extract_strided_slice %756 {offsets = [0, 32], sizes = [8, 32], strides = [1, 1]} : vector<8x96xf32> to vector<8x32xf32>
    %765 = arith.mulf %764, %711 : vector<8x32xf32>
    %766 = vector.extract_strided_slice %756 {offsets = [0, 0], sizes = [8, 32], strides = [1, 1]} : vector<8x96xf32> to vector<8x32xf32>
    %767 = arith.mulf %766, %758 : vector<8x32xf32>
    %768 = arith.addf %765, %767 : vector<8x32xf32>
    %769 = vector.extract_strided_slice %748 {offsets = [0, 64], sizes = [8, 32], strides = [1, 1]} : vector<8x96xf32> to vector<8x32xf32>
    %770 = math.tanh %763 : vector<8x32xf32>
    %771 = arith.mulf %769, %770 : vector<8x32xf32>
    %772 = vector.extract_strided_slice %756 {offsets = [0, 64], sizes = [8, 32], strides = [1, 1]} : vector<8x96xf32> to vector<8x32xf32>
    %773 = math.tanh %768 : vector<8x32xf32>
    %774 = arith.mulf %772, %773 : vector<8x32xf32>
    %c5_i32_216 = arith.constant 5 : i32
    %775 = arith.truncf %771 : vector<8x32xf32> to vector<8x32xbf16>
    %cst_217 = arith.constant dense<0.000000e+00> : vector<8x128xf32>
    %776 = tpu.matmul %775, %486, %cst_217 {dimension_numbers = #tpu.dot_dimension_numbers<[1], [0], [0], [1], [0, 0, 1, 1], [], []>} : vector<8x32xbf16>, vector<32x128xbf16>, vector<8x128xf32> -> vector<8x128xf32>
    %777 = arith.truncf %774 : vector<8x32xf32> to vector<8x32xbf16>
    %cst_218 = arith.constant dense<0.000000e+00> : vector<8x128xf32>
    %778 = tpu.matmul %777, %488, %cst_218 {dimension_numbers = #tpu.dot_dimension_numbers<[1], [0], [0], [1], [0, 0, 1, 1], [], []>} : vector<8x32xbf16>, vector<32x128xbf16>, vector<8x128xf32> -> vector<8x128xf32>
    %c7_i32_219 = arith.constant 7 : i32
    %779 = arith.subi %c7_i32_219, %c5_i32_216 : i32
    %780 = arith.index_cast %c5_i32_216 : i32 to index
    %c0_220 = arith.constant 0 : index
    %c0_221 = arith.constant 0 : index
    %781 = vector.load %arg12[%780, %c0_220, %c0_221] : memref<8x8x256xf32, #tpu.memory_space<vmem>>, vector<1x8x256xf32>
    %782 = vector.shape_cast %781 : vector<1x8x256xf32> to vector<8x256xf32>
    %783 = arith.index_cast %779 : i32 to index
    %c0_222 = arith.constant 0 : index
    %c0_223 = arith.constant 0 : index
    %784 = vector.load %arg12[%783, %c0_222, %c0_223] : memref<8x8x256xf32, #tpu.memory_space<vmem>>, vector<1x8x256xf32>
    %785 = vector.shape_cast %784 : vector<1x8x256xf32> to vector<8x256xf32>
    %786 = arith.index_cast %c5_i32_216 : i32 to index
    %c0_224 = arith.constant 0 : index
    %c0_225 = arith.constant 0 : index
    %787 = vector.load %arg13[%786, %c0_224, %c0_225] : memref<8x8x256xf32, #tpu.memory_space<vmem>>, vector<1x8x256xf32>
    %788 = vector.shape_cast %787 : vector<1x8x256xf32> to vector<8x256xf32>
    %789 = arith.index_cast %779 : i32 to index
    %c0_226 = arith.constant 0 : index
    %c0_227 = arith.constant 0 : index
    %790 = vector.load %arg13[%789, %c0_226, %c0_227] : memref<8x8x256xf32, #tpu.memory_space<vmem>>, vector<1x8x256xf32>
    %791 = vector.shape_cast %790 : vector<1x8x256xf32> to vector<8x256xf32>
    %792 = vector.extract_strided_slice %782 {offsets = [0, 0], sizes = [8, 128], strides = [1, 1]} : vector<8x256xf32> to vector<8x128xf32>
    %793 = vector.extract_strided_slice %791 {offsets = [0, 0], sizes = [8, 128], strides = [1, 1]} : vector<8x256xf32> to vector<8x128xf32>
    %794 = arith.addf %792, %793 : vector<8x128xf32>
    %795 = vector.extract_strided_slice %785 {offsets = [0, 128], sizes = [8, 128], strides = [1, 1]} : vector<8x256xf32> to vector<8x128xf32>
    %796 = vector.extract_strided_slice %788 {offsets = [0, 128], sizes = [8, 128], strides = [1, 1]} : vector<8x256xf32> to vector<8x128xf32>
    %797 = arith.addf %795, %796 : vector<8x128xf32>
    %798 = arith.addf %794, %776 : vector<8x128xf32>
    %799 = arith.addf %797, %778 : vector<8x128xf32>
    %800 = vector.extract_strided_slice %798 {offsets = [0, 0], sizes = [8, 96], strides = [1, 1]} : vector<8x128xf32> to vector<8x96xf32>
    %801 = arith.negf %800 : vector<8x96xf32>
    %802 = math.exp %801 : vector<8x96xf32>
    %cst_228 = arith.constant 1.000000e+00 : f32
    %803 = vector.broadcast %cst_228 : f32 to vector<8x96xf32>
    %804 = arith.addf %803, %802 : vector<8x96xf32>
    %805 = arith.divf %803, %804 : vector<8x96xf32>
    %806 = vector.extract_strided_slice %798 {offsets = [0, 96], sizes = [8, 32], strides = [1, 1]} : vector<8x128xf32> to vector<8x32xf32>
    %807 = math.tanh %806 : vector<8x32xf32>
    %808 = vector.extract_strided_slice %799 {offsets = [0, 0], sizes = [8, 96], strides = [1, 1]} : vector<8x128xf32> to vector<8x96xf32>
    %809 = arith.negf %808 : vector<8x96xf32>
    %810 = math.exp %809 : vector<8x96xf32>
    %cst_229 = arith.constant 1.000000e+00 : f32
    %811 = vector.broadcast %cst_229 : f32 to vector<8x96xf32>
    %812 = arith.addf %811, %810 : vector<8x96xf32>
    %813 = arith.divf %811, %812 : vector<8x96xf32>
    %814 = vector.extract_strided_slice %799 {offsets = [0, 96], sizes = [8, 32], strides = [1, 1]} : vector<8x128xf32> to vector<8x32xf32>
    %815 = math.tanh %814 : vector<8x32xf32>
    %816 = vector.extract_strided_slice %805 {offsets = [0, 32], sizes = [8, 32], strides = [1, 1]} : vector<8x96xf32> to vector<8x32xf32>
    %817 = arith.mulf %816, %763 : vector<8x32xf32>
    %818 = vector.extract_strided_slice %805 {offsets = [0, 0], sizes = [8, 32], strides = [1, 1]} : vector<8x96xf32> to vector<8x32xf32>
    %819 = arith.mulf %818, %807 : vector<8x32xf32>
    %820 = arith.addf %817, %819 : vector<8x32xf32>
    %821 = vector.extract_strided_slice %813 {offsets = [0, 32], sizes = [8, 32], strides = [1, 1]} : vector<8x96xf32> to vector<8x32xf32>
    %822 = arith.mulf %821, %768 : vector<8x32xf32>
    %823 = vector.extract_strided_slice %813 {offsets = [0, 0], sizes = [8, 32], strides = [1, 1]} : vector<8x96xf32> to vector<8x32xf32>
    %824 = arith.mulf %823, %815 : vector<8x32xf32>
    %825 = arith.addf %822, %824 : vector<8x32xf32>
    %826 = vector.extract_strided_slice %805 {offsets = [0, 64], sizes = [8, 32], strides = [1, 1]} : vector<8x96xf32> to vector<8x32xf32>
    %827 = math.tanh %820 : vector<8x32xf32>
    %828 = arith.mulf %826, %827 : vector<8x32xf32>
    %829 = vector.extract_strided_slice %813 {offsets = [0, 64], sizes = [8, 32], strides = [1, 1]} : vector<8x96xf32> to vector<8x32xf32>
    %830 = math.tanh %825 : vector<8x32xf32>
    %831 = arith.mulf %829, %830 : vector<8x32xf32>
    %c6_i32_230 = arith.constant 6 : i32
    %832 = arith.truncf %828 : vector<8x32xf32> to vector<8x32xbf16>
    %cst_231 = arith.constant dense<0.000000e+00> : vector<8x128xf32>
    %833 = tpu.matmul %832, %486, %cst_231 {dimension_numbers = #tpu.dot_dimension_numbers<[1], [0], [0], [1], [0, 0, 1, 1], [], []>} : vector<8x32xbf16>, vector<32x128xbf16>, vector<8x128xf32> -> vector<8x128xf32>
    %834 = arith.truncf %831 : vector<8x32xf32> to vector<8x32xbf16>
    %cst_232 = arith.constant dense<0.000000e+00> : vector<8x128xf32>
    %835 = tpu.matmul %834, %488, %cst_232 {dimension_numbers = #tpu.dot_dimension_numbers<[1], [0], [0], [1], [0, 0, 1, 1], [], []>} : vector<8x32xbf16>, vector<32x128xbf16>, vector<8x128xf32> -> vector<8x128xf32>
    %c7_i32_233 = arith.constant 7 : i32
    %836 = arith.subi %c7_i32_233, %c6_i32_230 : i32
    %837 = arith.index_cast %c6_i32_230 : i32 to index
    %c0_234 = arith.constant 0 : index
    %c0_235 = arith.constant 0 : index
    %838 = vector.load %arg12[%837, %c0_234, %c0_235] : memref<8x8x256xf32, #tpu.memory_space<vmem>>, vector<1x8x256xf32>
    %839 = vector.shape_cast %838 : vector<1x8x256xf32> to vector<8x256xf32>
    %840 = arith.index_cast %836 : i32 to index
    %c0_236 = arith.constant 0 : index
    %c0_237 = arith.constant 0 : index
    %841 = vector.load %arg12[%840, %c0_236, %c0_237] : memref<8x8x256xf32, #tpu.memory_space<vmem>>, vector<1x8x256xf32>
    %842 = vector.shape_cast %841 : vector<1x8x256xf32> to vector<8x256xf32>
    %843 = arith.index_cast %c6_i32_230 : i32 to index
    %c0_238 = arith.constant 0 : index
    %c0_239 = arith.constant 0 : index
    %844 = vector.load %arg13[%843, %c0_238, %c0_239] : memref<8x8x256xf32, #tpu.memory_space<vmem>>, vector<1x8x256xf32>
    %845 = vector.shape_cast %844 : vector<1x8x256xf32> to vector<8x256xf32>
    %846 = arith.index_cast %836 : i32 to index
    %c0_240 = arith.constant 0 : index
    %c0_241 = arith.constant 0 : index
    %847 = vector.load %arg13[%846, %c0_240, %c0_241] : memref<8x8x256xf32, #tpu.memory_space<vmem>>, vector<1x8x256xf32>
    %848 = vector.shape_cast %847 : vector<1x8x256xf32> to vector<8x256xf32>
    %849 = vector.extract_strided_slice %839 {offsets = [0, 0], sizes = [8, 128], strides = [1, 1]} : vector<8x256xf32> to vector<8x128xf32>
    %850 = vector.extract_strided_slice %848 {offsets = [0, 0], sizes = [8, 128], strides = [1, 1]} : vector<8x256xf32> to vector<8x128xf32>
    %851 = arith.addf %849, %850 : vector<8x128xf32>
    %852 = vector.extract_strided_slice %842 {offsets = [0, 128], sizes = [8, 128], strides = [1, 1]} : vector<8x256xf32> to vector<8x128xf32>
    %853 = vector.extract_strided_slice %845 {offsets = [0, 128], sizes = [8, 128], strides = [1, 1]} : vector<8x256xf32> to vector<8x128xf32>
    %854 = arith.addf %852, %853 : vector<8x128xf32>
    %855 = arith.addf %851, %833 : vector<8x128xf32>
    %856 = arith.addf %854, %835 : vector<8x128xf32>
    %857 = vector.extract_strided_slice %855 {offsets = [0, 0], sizes = [8, 96], strides = [1, 1]} : vector<8x128xf32> to vector<8x96xf32>
    %858 = arith.negf %857 : vector<8x96xf32>
    %859 = math.exp %858 : vector<8x96xf32>
    %cst_242 = arith.constant 1.000000e+00 : f32
    %860 = vector.broadcast %cst_242 : f32 to vector<8x96xf32>
    %861 = arith.addf %860, %859 : vector<8x96xf32>
    %862 = arith.divf %860, %861 : vector<8x96xf32>
    %863 = vector.extract_strided_slice %855 {offsets = [0, 96], sizes = [8, 32], strides = [1, 1]} : vector<8x128xf32> to vector<8x32xf32>
    %864 = math.tanh %863 : vector<8x32xf32>
    %865 = vector.extract_strided_slice %856 {offsets = [0, 0], sizes = [8, 96], strides = [1, 1]} : vector<8x128xf32> to vector<8x96xf32>
    %866 = arith.negf %865 : vector<8x96xf32>
    %867 = math.exp %866 : vector<8x96xf32>
    %cst_243 = arith.constant 1.000000e+00 : f32
    %868 = vector.broadcast %cst_243 : f32 to vector<8x96xf32>
    %869 = arith.addf %868, %867 : vector<8x96xf32>
    %870 = arith.divf %868, %869 : vector<8x96xf32>
    %871 = vector.extract_strided_slice %856 {offsets = [0, 96], sizes = [8, 32], strides = [1, 1]} : vector<8x128xf32> to vector<8x32xf32>
    %872 = math.tanh %871 : vector<8x32xf32>
    %873 = vector.extract_strided_slice %862 {offsets = [0, 32], sizes = [8, 32], strides = [1, 1]} : vector<8x96xf32> to vector<8x32xf32>
    %874 = arith.mulf %873, %820 : vector<8x32xf32>
    %875 = vector.extract_strided_slice %862 {offsets = [0, 0], sizes = [8, 32], strides = [1, 1]} : vector<8x96xf32> to vector<8x32xf32>
    %876 = arith.mulf %875, %864 : vector<8x32xf32>
    %877 = arith.addf %874, %876 : vector<8x32xf32>
    %878 = vector.extract_strided_slice %870 {offsets = [0, 32], sizes = [8, 32], strides = [1, 1]} : vector<8x96xf32> to vector<8x32xf32>
    %879 = arith.mulf %878, %825 : vector<8x32xf32>
    %880 = vector.extract_strided_slice %870 {offsets = [0, 0], sizes = [8, 32], strides = [1, 1]} : vector<8x96xf32> to vector<8x32xf32>
    %881 = arith.mulf %880, %872 : vector<8x32xf32>
    %882 = arith.addf %879, %881 : vector<8x32xf32>
    %883 = vector.extract_strided_slice %862 {offsets = [0, 64], sizes = [8, 32], strides = [1, 1]} : vector<8x96xf32> to vector<8x32xf32>
    %884 = math.tanh %877 : vector<8x32xf32>
    %885 = arith.mulf %883, %884 : vector<8x32xf32>
    %886 = vector.extract_strided_slice %870 {offsets = [0, 64], sizes = [8, 32], strides = [1, 1]} : vector<8x96xf32> to vector<8x32xf32>
    %887 = math.tanh %882 : vector<8x32xf32>
    %888 = arith.mulf %886, %887 : vector<8x32xf32>
    %c7_i32_244 = arith.constant 7 : i32
    %889 = arith.truncf %885 : vector<8x32xf32> to vector<8x32xbf16>
    %cst_245 = arith.constant dense<0.000000e+00> : vector<8x128xf32>
    %890 = tpu.matmul %889, %486, %cst_245 {dimension_numbers = #tpu.dot_dimension_numbers<[1], [0], [0], [1], [0, 0, 1, 1], [], []>} : vector<8x32xbf16>, vector<32x128xbf16>, vector<8x128xf32> -> vector<8x128xf32>
    %891 = arith.truncf %888 : vector<8x32xf32> to vector<8x32xbf16>
    %cst_246 = arith.constant dense<0.000000e+00> : vector<8x128xf32>
    %892 = tpu.matmul %891, %488, %cst_246 {dimension_numbers = #tpu.dot_dimension_numbers<[1], [0], [0], [1], [0, 0, 1, 1], [], []>} : vector<8x32xbf16>, vector<32x128xbf16>, vector<8x128xf32> -> vector<8x128xf32>
    %c7_i32_247 = arith.constant 7 : i32
    %893 = arith.subi %c7_i32_247, %c7_i32_244 : i32
    %894 = arith.index_cast %c7_i32_244 : i32 to index
    %c0_248 = arith.constant 0 : index
    %c0_249 = arith.constant 0 : index
    %895 = vector.load %arg12[%894, %c0_248, %c0_249] : memref<8x8x256xf32, #tpu.memory_space<vmem>>, vector<1x8x256xf32>
    %896 = vector.shape_cast %895 : vector<1x8x256xf32> to vector<8x256xf32>
    %897 = arith.index_cast %893 : i32 to index
    %c0_250 = arith.constant 0 : index
    %c0_251 = arith.constant 0 : index
    %898 = vector.load %arg12[%897, %c0_250, %c0_251] : memref<8x8x256xf32, #tpu.memory_space<vmem>>, vector<1x8x256xf32>
    %899 = vector.shape_cast %898 : vector<1x8x256xf32> to vector<8x256xf32>
    %900 = arith.index_cast %c7_i32_244 : i32 to index
    %c0_252 = arith.constant 0 : index
    %c0_253 = arith.constant 0 : index
    %901 = vector.load %arg13[%900, %c0_252, %c0_253] : memref<8x8x256xf32, #tpu.memory_space<vmem>>, vector<1x8x256xf32>
    %902 = vector.shape_cast %901 : vector<1x8x256xf32> to vector<8x256xf32>
    %903 = arith.index_cast %893 : i32 to index
    %c0_254 = arith.constant 0 : index
    %c0_255 = arith.constant 0 : index
    %904 = vector.load %arg13[%903, %c0_254, %c0_255] : memref<8x8x256xf32, #tpu.memory_space<vmem>>, vector<1x8x256xf32>
    %905 = vector.shape_cast %904 : vector<1x8x256xf32> to vector<8x256xf32>
    %906 = vector.extract_strided_slice %896 {offsets = [0, 0], sizes = [8, 128], strides = [1, 1]} : vector<8x256xf32> to vector<8x128xf32>
    %907 = vector.extract_strided_slice %905 {offsets = [0, 0], sizes = [8, 128], strides = [1, 1]} : vector<8x256xf32> to vector<8x128xf32>
    %908 = arith.addf %906, %907 : vector<8x128xf32>
    %909 = vector.extract_strided_slice %899 {offsets = [0, 128], sizes = [8, 128], strides = [1, 1]} : vector<8x256xf32> to vector<8x128xf32>
    %910 = vector.extract_strided_slice %902 {offsets = [0, 128], sizes = [8, 128], strides = [1, 1]} : vector<8x256xf32> to vector<8x128xf32>
    %911 = arith.addf %909, %910 : vector<8x128xf32>
    %912 = arith.addf %908, %890 : vector<8x128xf32>
    %913 = arith.addf %911, %892 : vector<8x128xf32>
    %914 = vector.extract_strided_slice %912 {offsets = [0, 0], sizes = [8, 96], strides = [1, 1]} : vector<8x128xf32> to vector<8x96xf32>
    %915 = arith.negf %914 : vector<8x96xf32>
    %916 = math.exp %915 : vector<8x96xf32>
    %cst_256 = arith.constant 1.000000e+00 : f32
    %917 = vector.broadcast %cst_256 : f32 to vector<8x96xf32>
    %918 = arith.addf %917, %916 : vector<8x96xf32>
    %919 = arith.divf %917, %918 : vector<8x96xf32>
    %920 = vector.extract_strided_slice %912 {offsets = [0, 96], sizes = [8, 32], strides = [1, 1]} : vector<8x128xf32> to vector<8x32xf32>
    %921 = math.tanh %920 : vector<8x32xf32>
    %922 = vector.extract_strided_slice %913 {offsets = [0, 0], sizes = [8, 96], strides = [1, 1]} : vector<8x128xf32> to vector<8x96xf32>
    %923 = arith.negf %922 : vector<8x96xf32>
    %924 = math.exp %923 : vector<8x96xf32>
    %cst_257 = arith.constant 1.000000e+00 : f32
    %925 = vector.broadcast %cst_257 : f32 to vector<8x96xf32>
    %926 = arith.addf %925, %924 : vector<8x96xf32>
    %927 = arith.divf %925, %926 : vector<8x96xf32>
    %928 = vector.extract_strided_slice %913 {offsets = [0, 96], sizes = [8, 32], strides = [1, 1]} : vector<8x128xf32> to vector<8x32xf32>
    %929 = math.tanh %928 : vector<8x32xf32>
    %930 = vector.extract_strided_slice %919 {offsets = [0, 32], sizes = [8, 32], strides = [1, 1]} : vector<8x96xf32> to vector<8x32xf32>
    %931 = arith.mulf %930, %877 : vector<8x32xf32>
    %932 = vector.extract_strided_slice %919 {offsets = [0, 0], sizes = [8, 32], strides = [1, 1]} : vector<8x96xf32> to vector<8x32xf32>
    %933 = arith.mulf %932, %921 : vector<8x32xf32>
    %934 = arith.addf %931, %933 : vector<8x32xf32>
    %935 = vector.extract_strided_slice %927 {offsets = [0, 32], sizes = [8, 32], strides = [1, 1]} : vector<8x96xf32> to vector<8x32xf32>
    %936 = arith.mulf %935, %882 : vector<8x32xf32>
    %937 = vector.extract_strided_slice %927 {offsets = [0, 0], sizes = [8, 32], strides = [1, 1]} : vector<8x96xf32> to vector<8x32xf32>
    %938 = arith.mulf %937, %929 : vector<8x32xf32>
    %939 = arith.addf %936, %938 : vector<8x32xf32>
    %940 = vector.extract_strided_slice %919 {offsets = [0, 64], sizes = [8, 32], strides = [1, 1]} : vector<8x96xf32> to vector<8x32xf32>
    %941 = math.tanh %934 : vector<8x32xf32>
    %942 = arith.mulf %940, %941 : vector<8x32xf32>
    %943 = vector.extract_strided_slice %927 {offsets = [0, 64], sizes = [8, 32], strides = [1, 1]} : vector<8x96xf32> to vector<8x32xf32>
    %944 = math.tanh %939 : vector<8x32xf32>
    %945 = arith.mulf %943, %944 : vector<8x32xf32>
    %c8_i32_258 = arith.constant 8 : i32
    %946 = tpu.concatenate %456, %459, %942, %945 in 0 : vector<8x32xf32>, vector<8x32xf32>, vector<8x32xf32>, vector<8x32xf32> -> vector<32x32xf32>
    %947 = arith.truncf %946 : vector<32x32xf32> to vector<32x32xbf16>
    %c0_259 = arith.constant 0 : index
    %c0_260 = arith.constant 0 : index
    %948 = vector.load %arg9[%c0_259, %c0_260] : memref<32x4xbf16, #tpu.memory_space<vmem>>, vector<32x4xbf16>
    %cst_261 = arith.constant dense<0.000000e+00> : vector<32x4xf32>
    %949 = tpu.matmul %947, %948, %cst_261 {dimension_numbers = #tpu.dot_dimension_numbers<[1], [0], [0], [1], [0, 0, 1, 1], [], []>} : vector<32x32xbf16>, vector<32x4xbf16>, vector<32x4xf32> -> vector<32x4xf32>
    %c0_262 = arith.constant 0 : index
    %c0_263 = arith.constant 0 : index
    %950 = vector.load %arg10[%c0_262, %c0_263] : memref<1x4xf32, #tpu.memory_space<vmem>>, vector<1x4xf32>
    %951 = vector.broadcast %950 : vector<1x4xf32> to vector<32x4xf32>
    %952 = arith.addf %949, %951 : vector<32x4xf32>
    %c0_264 = arith.constant 0 : index
    %c0_265 = arith.constant 0 : index
    %953 = vector.load %arg11[%c0_264, %c0_265] : memref<32x4xf32, #tpu.memory_space<vmem>>, vector<32x4xf32>
    tpu.vector_store %arg11[%c0_264, %c0_265], %952 {strides = array<i32>} : memref<32x4xf32, #tpu.memory_space<vmem>>, vector<32x4xf32>,
    return
  }
  func.func @transform_0(%arg0: i32) -> (i32, i32, i32) {
    %c0_i32 = arith.constant 0 : i32
    %c0_i32_0 = arith.constant 0 : i32
    %c0_i32_1 = arith.constant 0 : i32
    %c0_i32_2 = arith.constant 0 : i32
    return %c0_i32, %c0_i32_0, %c0_i32_1 : i32, i32, i32
  }
  func.func @transform_1(%arg0: i32) -> (i32, i32) {
    %c0_i32 = arith.constant 0 : i32
    %c0_i32_0 = arith.constant 0 : i32
    %c0_i32_1 = arith.constant 0 : i32
    return %c0_i32, %c0_i32_0 : i32, i32
  }
  func.func @transform_2(%arg0: i32) -> (i32, i32, i32) {
    %c0_i32 = arith.constant 0 : i32
    %c0_i32_0 = arith.constant 0 : i32
    %c0_i32_1 = arith.constant 0 : i32
    %c0_i32_2 = arith.constant 0 : i32
    return %c0_i32, %c0_i32_0, %c0_i32_1 : i32, i32, i32
  }
  func.func @transform_3(%arg0: i32) -> (i32, i32) {
    %c0_i32 = arith.constant 0 : i32
    %c0_i32_0 = arith.constant 0 : i32
    %c0_i32_1 = arith.constant 0 : i32
    return %c0_i32, %c0_i32_0 : i32, i32
  }
  func.func @transform_4(%arg0: i32) -> (i32, i32) {
    %c0_i32 = arith.constant 0 : i32
    %c0_i32_0 = arith.constant 0 : i32
    %c0_i32_1 = arith.constant 0 : i32
    return %c0_i32, %c0_i32_0 : i32, i32
  }
  func.func @transform_5(%arg0: i32) -> (i32, i32) {
    %c0_i32 = arith.constant 0 : i32
    %c0_i32_0 = arith.constant 0 : i32
    %c0_i32_1 = arith.constant 0 : i32
    return %c0_i32, %c0_i32_0 : i32, i32
  }
  func.func @transform_6(%arg0: i32) -> (i32, i32, i32) {
    %c0_i32 = arith.constant 0 : i32
    %c0_i32_0 = arith.constant 0 : i32
    %c0_i32_1 = arith.constant 0 : i32
    %c0_i32_2 = arith.constant 0 : i32
    return %c0_i32, %c0_i32_0, %c0_i32_1 : i32, i32, i32
  }
  func.func @transform_7(%arg0: i32) -> (i32, i32) {
    %c0_i32 = arith.constant 0 : i32
    %c0_i32_0 = arith.constant 0 : i32
    %c0_i32_1 = arith.constant 0 : i32
    return %c0_i32, %c0_i32_0 : i32, i32
  }
  func.func @transform_8(%arg0: i32) -> (i32, i32) {
    %c0_i32 = arith.constant 0 : i32
    %c0_i32_0 = arith.constant 0 : i32
    %c0_i32_1 = arith.constant 0 : i32
    return %c0_i32, %c0_i32_0 : i32, i32
  }
  func.func @transform_9(%arg0: i32) -> (i32, i32) {
    %c0_i32 = arith.constant 0 : i32
    %c0_i32_0 = arith.constant 0 : i32
    %c0_i32_1 = arith.constant 0 : i32
    return %c0_i32, %c0_i32_0 : i32, i32
  }
  func.func @transform_10(%arg0: i32) -> (i32, i32) {
    %c0_i32 = arith.constant 0 : i32
    %c0_i32_0 = arith.constant 0 : i32
    %c0_i32_1 = arith.constant 0 : i32
    return %c0_i32, %c0_i32_0 : i32, i32
  }
}

</mosaic_0001>

<bundles_post_ra>
// kernel: lstm_classifier_forward.1
= control target key start
LH: loop header
LB: loop body
LE: loop exit
PB: predicated region body
PF: predicated region fallthrough
CT: control target
= control target key end

     0   :  { %v4006_v1 = vmov 0.0   ;;  %v4007_v2 = vmov 0   ;;  %vm4008_vm0 = vmmov 0   ;;  %vm124_vm1 = vcmask 523264   ;;  %s4885_s1 = inlined_call_operand.vmem [shape: bf16[64,256], index: 1, kind: input, shape index: {}]   ;;  %s4886_s2 = inlined_call_operand.vmem [shape: bf16[2,32,128], index: 2, kind: input, shape index: {}]   ;;  %s4887_s0 = inlined_call_operand.vmem [shape: bf16[8,8,64], index: 0, kind: input, shape index: {}]   ;;  %s4888_s3 = inlined_call_operand.vmem [shape: f32[1,256], index: 3, kind: input, shape index: {}]   ;;  %s4889_s4 = inlined_call_operand.vmem [shape: bf16[32,256], index: 4, kind: input, shape index: {}]   ;;  %s4890_s5 = inlined_call_operand.vmem [shape: bf16[32,256], index: 5, kind: input, shape index: {}]   ;;  %s4891_s6 = inlined_call_operand.vmem [shape: bf16[2,32,128], index: 6, kind: input, shape index: {}]   ;;  %s4892_s7 = inlined_call_operand.vmem [shape: f32[1,256], index: 7, kind: input, shape index: {}]   ;;  %s4893_s8 = inlined_call_operand.vmem [shape: bf16[32,4], index: 8, kind: input, shape index: {}]   ;;  %s4894_s9 = inlined_call_operand.vmem [shape: f32[1,4], index: 9, kind: input, shape index: {}]   ;;  %s4895_s10 = inlined_call_operand.vmem [shape: f32[32,4], index: 10, kind: output, shape index: {}]  }
   0x1   :  { %v3700_v0 = vld [vmem:[%s4885_s1 + $0x4] ss:$8 sps:$4 sm:$0xff]   ;;  %3431 = vmatprep.subr.bf16.mxu1 %v4006_v1  ;;  %169 = vmatprep.mubr.bf16.mxu0 %v4007_v2  ;;  %v3702_v3 = vld [vmem:[%s4885_s1] ss:$8 sps:$4 sm:$0xff]   ;;  %v3703_v4 = vld [vmem:[%s4885_s1 + $0x14] ss:$8 sps:$4 sm:$0xff]   ;;  %v54_v18 = vlaneseq }
   0x2   :  { %3435 = vmatprep.mubr.msk.bf16.mxu1 %vm4008_vm0, %v4006_v1  ;;  %137 = vmatprep.subr.bf16.mxu0 %v3700_v0  ;;  %v3705_v5 = vld [vmem:[%s4885_s1 + $0x10] ss:$8 sps:$4 sm:$0xff]   ;;  %v3706_v6 = vld [vmem:[%s4885_s1 + $0x24] ss:$8 sps:$4 sm:$0xff]   ;;  %v3708_v8 = vld [vmem:[%s4885_s1 + $0x20] ss:$8 sps:$4 sm:$0xff]  }
   0x3   :  { %138 = vmatpush1.bf16.msra.mxu0 %v3702_v3  ;;  %v4088_v7 = vld [vmem:[%s4886_s2] sm:$0xff]   ;;  %v4098_v9 = vld [vmem:[%s4886_s2 + $0x8] sm:$0xff]   ;;  %v3710_v10 = vld [vmem:[%s4885_s1 + $0x34] ss:$8 sps:$4 sm:$0xff]   ;;  %v4158_v19 = vshrl.u32 %v54_v18, 7  ;;  %vm247_vm2 = vcmask 261120  }
   0x4   :  { %139 = vmatprep.subr.bf16.mxu0 %v3703_v4  ;;  %3432 = vmatpush3.bf16.msra.mxu1 %v4088_v7  ;;  %v3712_v11 = vld [vmem:[%s4885_s1 + $0x30] ss:$8 sps:$4 sm:$0xff]   ;;  %v3714_v13 = vld [vmem:[%s4887_s0] sm:$0xff]   ;;  %v3715_v15 = vld [vmem:[%s4887_s0 + $0x8] sm:$0xff]   ;;  %vm403_vm3 = vcmask 257024   ;;  %vm3169_vm4 = vcmask 31744  }
   0x5   :  { %3433 = vmatprep.subr.bf16.mxu1 %v4006_v1  ;;  %v4111_v12 = vld [vmem:[%s4886_s2 + $0x10] sm:$0xff]   ;;  %v4121_v14 = vld [vmem:[%s4886_s2 + $0x18] sm:$0xff]   ;;  %v56_v20 = vsub.s32 0, %v4158_v19  ;;  %v52_v21 = vld [vmem:[%s4888_s3] sm:$0x3]  ;;  %v60_v22 = vsub.s32 1, %v4158_v19 }
   0x6   :  { %v3716_v16 = vld [vmem:[%s4887_s0 + $0x10] sm:$0xff]   ;;  %v3719_v17 = vld [vmem:[%s4887_s0 + $0x18] sm:$0xff]   ;;  %s4009_s0 = smov 32   ;;  %s4010_s3 = smov 64  }
   0x7   :  { %140 = vmatpush1.bf16.msra.mxu0 %v3705_v5  ;;  %v57_v25 = vrot.slane %v52_v21, %v56_v20  ;;  %v61_v27 = vrot.slane %v52_v21, %v60_v22 }
   0x8   :  { %141 = vmatprep.subr.bf16.mxu0 %v3706_v6  ;;  %3434 = vmatpush3.bf16.msra.mxu1 %v4098_v9 }
   0x9   :  { %3439 = vmatprep.subr.bf16.mxu1 %v4006_v1 }
   0xb   :  { %142 = vmatpush1.bf16.msra.mxu0 %v3708_v8  ;;  %3436 = vmatmul.mubr.bf16.vlgmr.msra.gmra.mrb[0].mxu1 %v4007_v2 }
   0xc   :  { %143 = vmatprep.subr.bf16.mxu0 %v3710_v10  ;;  %3440 = vmatpush3.bf16.msra.mxu1 %v4111_v12 }
   0xd   :  { %3443 = vmatprep.mubr.msk.bf16.mxu1 %vm4008_vm0, %v4006_v1  ;;  %3441 = vmatprep.subr.bf16.mxu1 %v4006_v1 }
   0xf   :  { %144 = vmatpush1.bf16.msra.mxu0 %v3712_v11 }
  0x10   :  { %3471 = vmatprep.subr.bf16.mxu0 %v4006_v1  ;;  %3442 = vmatpush3.bf16.msra.mxu1 %v4121_v14 }
  0x11   :  { %3447 = vmatprep.subr.bf16.mxu1 %v4006_v1 }
  0x12   :  { %3190 = vmatmul.mubr.msk.bf16.vlgmr.msra.gmra.mrb[0].mxu0 %vm124_vm1, %v3714_v13 }
  0x13   :  { %179 = vmatprep.mubr.bf16.mxu0 %v4007_v2  ;;  %3472 = vmatpush3.bf16.msra.mxu0 %v4111_v12 }
  0x14   :  { %3444 = vmatmul.mubr.bf16.vlgmr.msra.gmra.mrb[4].mxu1 %v4007_v2  ;;  %3473 = vmatprep.subr.bf16.mxu0 %v4006_v1 }
  0x15   :  { %3448 = vmatpush3.bf16.msra.mxu1 %v4088_v7  ;;  %3451 = vmatprep.mubr.msk.bf16.mxu1 %vm4008_vm0, %v4006_v1 }
  0x16   :  { %3449 = vmatprep.subr.bf16.mxu1 %v4006_v1 }
  0x17   :  { %3474 = vmatpush3.bf16.msra.mxu0 %v4121_v14 }
  0x18   :  { %3487 = vmatprep.subr.bf16.mxu0 %v4006_v1 }
  0x19   :  { %3450 = vmatpush3.bf16.msra.mxu1 %v4098_v9 }
  0x1a   :  { %3191 = vmatmul.mubr.msk.bf16.gmra.mrb[4].mxu0 %vm124_vm1, %v3715_v15  ;;  %3455 = vmatprep.subr.bf16.mxu1 %v4006_v1 }
  0x1b   :  { %189 = vmatprep.mubr.bf16.mxu0 %v4007_v2 }
  0x22   :  { %3192 = vmatmul.mubr.msk.bf16.gmra.mrb[8].mxu0 %vm124_vm1, %v3716_v16 }
  0x23   :  { %199 = vmatprep.mubr.bf16.mxu0 %v4007_v2 }
  0x2a   :  { %3193 = vmatmul.mubr.msk.bf16.gmra.mrb[12].mxu0 %vm124_vm1, %v3719_v17 }
  0x2b   :  { %3475 = vmatprep.mubr.msk.bf16.mxu0 %vm4008_vm0, %v4006_v1 }
  0xde   :  { %v285_v23 = vpop.f32.mrb[0].mxu1 }
  0xdf   :  { %v3437_v24 = vpop.f32.mrb[1].mxu1 }
  0xe0   :  { %v288_v26 = vpop.f32.mrb[2].mxu1 }
  0xe1   :  { %v3438_v28 = vpop.f32.mrb[3].mxu1 }
  0xe5   :  { %v171_v29 = vpop.f32.mrb[0].mxu0 }
  0xe6   :  { %v172_v30 = vadd.f32 %v171_v29, %v57_v25  ;;  %v173_v31 = vpop.f32.mrb[1].mxu0 }
  0xe7   :  { %v4169_v32 = vadd.f32 %v173_v31, %v61_v27  ;;  %v175_v33 = vpop.f32.mrb[2].mxu0  ;;  %v337_v37 = vpop.f32.mrb[4].mxu1 }
  0xe8   :  { %v4171_v34 = vadd.f32 %v175_v33, %v57_v25  ;;  %v346_v35 = vadd.f32 %v285_v23, %v172_v30  ;;  %v177_v36 = vpop.f32.mrb[3].mxu0  ;;  %v3445_v39 = vpop.f32.mrb[5].mxu1 }
  0xe9   :  { %v4173_v38 = vadd.f32 %v177_v36, %v61_v27  ;;  %v340_v40 = vpop.f32.mrb[6].mxu1 }
  0xea   :  { %3746 = vtanh.f32 %v346_v35  ;;  %v3446_v41 = vpop.f32.mrb[7].mxu1  ;;  %v3202_v8 = vmul.f32 -1.442695, %v346_v35 }
  0xed   :  { %v181_v42 = vpop.f32.mrb[4].mxu0 }
  0xee   :  { %v4175_v43 = vadd.f32 %v181_v42, %v57_v25  ;;  %v183_v44 = vpop.f32.mrb[5].mxu0 }
  0xef   :  { %v4177_v45 = vadd.f32 %v183_v44, %v61_v27  ;;  %v185_v46 = vpop.f32.mrb[6].mxu0 }
  0xf0   :  { %v4179_v47 = vadd.f32 %v185_v46, %v57_v25  ;;  %v187_v48 = vpop.f32.mrb[7].mxu0 }
  0xf1   :  { %v4181_v49 = vadd.f32 %v187_v48, %v61_v27 }
  0xf4   :  { %v3747_v50 = vpop.eup %3746 }
  0xf5   :  { %v191_v51 = vpop.f32.mrb[8].mxu0  ;;  %364 = vrot.lane.b32.xlu0 %v3747_v50, %s4009_s0 }
  0xf6   :  { %v4184_v52 = vadd.f32 %v191_v51, %v57_v25  ;;  %v193_v53 = vpop.f32.mrb[9].mxu0 }
  0xf7   :  { %v4186_v54 = vadd.f32 %v193_v53, %v61_v27  ;;  %v195_v55 = vpop.f32.mrb[10].mxu0 }
  0xf8   :  { %v4188_v56 = vadd.f32 %v195_v55, %v57_v25  ;;  %v197_v57 = vpop.f32.mrb[11].mxu0 }
  0xf9   :  { %v4190_v58 = vadd.f32 %v197_v57, %v61_v27 }
  0xfd   :  { %v201_v59 = vpop.f32.mrb[12].mxu0 }
  0xfe   :  { %v4192_v60 = vadd.f32 %v201_v59, %v57_v25  ;;  %v203_v61 = vpop.f32.mrb[13].mxu0 }
  0xff   :  { %v4194_v62 = vadd.f32 %v203_v61, %v61_v27  ;;  %v205_v63 = vpop.f32.mrb[14].mxu0 }
 0x100   :  { %v4196_v0 = vadd.f32 %v205_v63, %v57_v25  ;;  %v207_v3 = vpop.f32.mrb[15].mxu0 }
 0x101   :  { %v208_v4 = vadd.f32 %v207_v3, %v61_v27 }
 0x103   :  { %v347_v5 = vadd.f32 %v337_v37, %v208_v4 }
 0x105   :  { %3748 = vtanh.f32 %v347_v5  ;;  %v3203_v13 = vmul.f32 -1.442695, %v347_v5 }
 0x106   :  { %3750 = vpow2.f32 %v3202_v8 }
 0x10f   :  { %v3749_v6 = vpop.eup %3748 }
 0x110   :  { %375 = vrot.lane.b32.xlu0 %v3749_v6, %s4009_s0  ;;  %v3751_v10 = vpop.eup %3750 }
 0x111   :  { %v351_v11 = vadd.f32 1.0, %v3751_v10 }
 0x113   :  { %3752 = vrcp.f32 %v351_v11 }
 0x114   :  { %3754 = vpow2.f32 %v3203_v13 }
 0x11d   :  { %v3753_v15 = vpop.eup %3752 }
 0x11e   :  { %v3755_v18 = vpop.eup %3754  ;;  %v362_v26 = vmul.f32 0.0, %v3753_v15 }
 0x11f   :  { %v358_v21 = vadd.f32 1.0, %v3755_v18 }
 0x121   :  { %3756 = vrcp.f32 %v358_v21 }
 0x12b   :  { %v3757_v23 = vpop.eup %3756 }
 0x12c   :  { %v373_v30 = vmul.f32 0.0, %v3757_v23 }
 0x167   :  { %v365_v16 = vpop.permute.xlu0 %364 }
 0x168   :  { %v367_v17 = vmul.f32 %v3753_v15, %v365_v16 }
 0x16a   :  { %369 = vrot.lane.b32.xlu1 %v367_v17, %s4009_s0 }
 0x182   :  { %v376_v24 = vpop.permute.xlu0 %375 }
 0x183   :  { %v378_v25 = vmul.f32 %v3757_v23, %v376_v24 }
 0x185   :  { %380 = vrot.lane.b32.xlu1 %v378_v25, %s4009_s0 }
 0x1dc   :  { %v370_v27 = vpop.permute.xlu1 %369 }
 0x1dd   :  { %v4201_v28 = vadd.f32 %v370_v27, %v362_v26 }
 0x1df   :  { %3758 = vtanh.f32 %v4201_v28 }
 0x1e9   :  { %v3759_v29 = vpop.eup %3758 }
 0x1ea   :  { %386 = vrot.lane.b32.xlu0 %v3759_v29, %s4009_s0 }
 0x1f7   :  { %v381_v31 = vpop.permute.xlu1 %380 }
 0x1f8   :  { %v4205_v33 = vadd.f32 %v381_v31, %v373_v30 }
 0x1fa   :  { %3760 = vtanh.f32 %v4205_v33 }
 0x204   :  { %v3761_v35 = vpop.eup %3760 }
 0x205   :  { %392 = vrot.lane.b32.xlu1 %v3761_v35, %s4009_s0 }
 0x25c   :  { %v387_v36 = vpop.permute.xlu0 %386 }
 0x25d   :  { %v389_v37 = vmul.f32 %v3753_v15, %v387_v36 }
 0x25f   :  { %v4209_v39 = vpack.c.bf16 %v389_v37, %v389_v37 }
 0x261   :  { %413 = vrot.lane.b32.xlu0 %v4209_v39, %s4010_s3 }
 0x277   :  { %v393_v40 = vpop.permute.xlu1 %392 }
 0x278   :  { %v395_v41 = vmul.f32 %v3757_v23, %v393_v40 }
 0x27a   :  { %v4213_v42 = vpack.c.bf16 %v395_v41, %v395_v41 }
 0x27c   :  { %458 = vrot.lane.b32.xlu1 %v4213_v42, %s4010_s3 }
 0x2d3   :  { %v414_v44 = vpop.permute.xlu0 %413 }
 0x2d4   :  { %3452 = vmatmul.mubr.msk.bf16.vlgmr.msra.gmra.mrb[8].mxu1 %vm247_vm2, %v414_v44 }
 0x2d5   :  { %3456 = vmatpush3.bf16.msra.mxu1 %v4111_v12  ;;  %3459 = vmatprep.mubr.msk.bf16.mxu1 %vm4008_vm0, %v4006_v1 }
 0x2d6   :  { %3457 = vmatprep.subr.bf16.mxu1 %v4006_v1 }
 0x2d9   :  { %3458 = vmatpush3.bf16.msra.mxu1 %v4121_v14 }
 0x2da   :  { %3463 = vmatprep.subr.bf16.mxu1 %v4006_v1 }
 0x2ee   :  { %v459_v46 = vpop.permute.xlu1 %458 }
 0x2ef   :  { %3460 = vmatmul.mubr.msk.bf16.vlgmr.msra.gmra.mrb[12].mxu1 %vm247_vm2, %v459_v46 }
 0x2f0   :  { %3464 = vmatpush3.bf16.msra.mxu1 %v4088_v7  ;;  %3467 = vmatprep.mubr.msk.bf16.mxu1 %vm4008_vm0, %v4006_v1 }
 0x2f1   :  { %3465 = vmatprep.subr.bf16.mxu1 %v4006_v1 }
 0x2f4   :  { %3466 = vmatpush3.bf16.msra.mxu1 %v4098_v9 }
 0x2f5   :  { %3479 = vmatprep.subr.bf16.mxu1 %v4006_v1 }
 0x3a7   :  { %v452_v48 = vpop.f32.mrb[8].mxu1 }
 0x3a8   :  { %v507_v50 = vadd.f32 %v452_v48, %v4171_v34  ;;  %v3453_v51 = vpop.f32.mrb[9].mxu1 }
 0x3a9   :  { %v455_v53 = vpop.f32.mrb[10].mxu1 }
 0x3aa   :  { %3762 = vtanh.f32 %v507_v50  ;;  %v3454_v55 = vpop.f32.mrb[11].mxu1  ;;  %v3208_v6 = vmul.f32 -1.442695, %v507_v50 }
 0x3b4   :  { %v3763_v57 = vpop.eup %3762 }
 0x3b5   :  { %525 = vrot.lane.b32.xlu0 %v3763_v57, %s4009_s0 }
 0x3c2   :  { %v497_v59 = vpop.f32.mrb[12].mxu1 }
 0x3c3   :  { %v508_v61 = vadd.f32 %v497_v59, %v4194_v62  ;;  %v3461_v63 = vpop.f32.mrb[13].mxu1 }
 0x3c4   :  { %v500_v3 = vpop.f32.mrb[14].mxu1 }
 0x3c5   :  { %3764 = vtanh.f32 %v508_v61  ;;  %v3462_v4 = vpop.f32.mrb[15].mxu1  ;;  %v3209_v10 = vmul.f32 -1.442695, %v508_v61 }
 0x3c6   :  { %3766 = vpow2.f32 %v3208_v6 }
 0x3cf   :  { %v3765_v5 = vpop.eup %3764 }
 0x3d0   :  { %536 = vrot.lane.b32.xlu1 %v3765_v5, %s4009_s0  ;;  %v3767_v34 = vpop.eup %3766 }
 0x3d1   :  { %v512_v8 = vadd.f32 1.0, %v3767_v34 }
 0x3d3   :  { %3768 = vrcp.f32 %v512_v8 }
 0x3d4   :  { %3770 = vpow2.f32 %v3209_v10 }
 0x3dd   :  { %v3769_v11 = vpop.eup %3768 }
 0x3de   :  { %v3771_v62 = vpop.eup %3770  ;;  %v523_v23 = vmul.f32 %v3769_v11, %v4201_v28 }
 0x3df   :  { %v519_v16 = vadd.f32 1.0, %v3771_v62 }
 0x3e1   :  { %3772 = vrcp.f32 %v519_v16 }
 0x3eb   :  { %v3773_v17 = vpop.eup %3772 }
 0x3ec   :  { %v534_v27 = vmul.f32 %v3773_v17, %v4205_v33 }
 0x427   :  { %v526_v13 = vpop.permute.xlu0 %525 }
 0x428   :  { %v528_v15 = vmul.f32 %v3769_v11, %v526_v13 }
 0x42a   :  { %530 = vrot.lane.b32.xlu0 %v528_v15, %s4009_s0 }
 0x442   :  { %v537_v18 = vpop.permute.xlu1 %536 }
 0x443   :  { %v539_v21 = vmul.f32 %v3773_v17, %v537_v18 }
 0x445   :  { %541 = vrot.lane.b32.xlu1 %v539_v21, %s4009_s0 }
 0x49c   :  { %v531_v24 = vpop.permute.xlu0 %530 }
 0x49d   :  { %v4238_v25 = vadd.f32 %v531_v24, %v523_v23 }
 0x49f   :  { %3774 = vtanh.f32 %v4238_v25 }
 0x4a9   :  { %v3775_v26 = vpop.eup %3774 }
 0x4aa   :  { %547 = vrot.lane.b32.xlu0 %v3775_v26, %s4009_s0 }
 0x4b7   :  { %v542_v29 = vpop.permute.xlu1 %541 }
 0x4b8   :  { %v4243_v30 = vadd.f32 %v542_v29, %v534_v27 }
 0x4ba   :  { %3776 = vtanh.f32 %v4243_v30 }
 0x4c4   :  { %v3777_v31 = vpop.eup %3776 }
 0x4c5   :  { %553 = vrot.lane.b32.xlu1 %v3777_v31, %s4009_s0 }
 0x51c   :  { %v548_v35 = vpop.permute.xlu0 %547 }
 0x51d   :  { %v550_v28 = vmul.f32 %v3769_v11, %v548_v35 }
 0x51f   :  { %v4247_v36 = vpack.c.bf16 %v550_v28, %v550_v28 }
 0x521   :  { %575 = vrot.lane.b32.xlu0 %v4247_v36, %s4010_s3 }
 0x537   :  { %v554_v37 = vpop.permute.xlu1 %553 }
 0x538   :  { %v556_v40 = vmul.f32 %v3773_v17, %v554_v37 }
 0x53a   :  { %v4251_v41 = vpack.c.bf16 %v556_v40, %v556_v40 }
 0x53c   :  { %620 = vrot.lane.b32.xlu1 %v4251_v41, %s4010_s3 }
 0x593   :  { %v576_v33 = vpop.permute.xlu0 %575 }
 0x594   :  { %3468 = vmatmul.mubr.msk.bf16.vlgmr.msra.gmra.mrb[16].mxu1 %vm247_vm2, %v576_v33 }
 0x595   :  { %3480 = vmatpush3.bf16.msra.mxu1 %v4088_v7  ;;  %3483 = vmatprep.mubr.msk.bf16.mxu1 %vm4008_vm0, %v4006_v1 }
 0x596   :  { %3481 = vmatprep.subr.bf16.mxu1 %v4006_v1 }
 0x599   :  { %3482 = vmatpush3.bf16.msra.mxu1 %v4098_v9 }
 0x59a   :  { %3495 = vmatprep.subr.bf16.mxu1 %v4006_v1 }
 0x5ae   :  { %v621_v44 = vpop.permute.xlu1 %620 }
 0x5af   :  { %3476 = vmatmul.mubr.msk.bf16.vlgmr.msra.gmra.mrb[16].mxu0 %vm247_vm2, %v621_v44 }
 0x5b0   :  { %3488 = vmatpush3.bf16.msra.mxu0 %v4111_v12  ;;  %3491 = vmatprep.mubr.msk.bf16.mxu0 %vm4008_vm0, %v4006_v1 }
 0x5b1   :  { %3489 = vmatprep.subr.bf16.mxu0 %v4006_v1 }
 0x5b4   :  { %3490 = vmatpush3.bf16.msra.mxu0 %v4121_v14 }
 0x5b5   :  { %3503 = vmatprep.subr.bf16.mxu0 %v4006_v1 }
 0x667   :  { %v614_v46 = vpop.f32.mrb[16].mxu1 }
 0x668   :  { %v669_v48 = vadd.f32 %v614_v46, %v4175_v43  ;;  %v3469_v50 = vpop.f32.mrb[17].mxu1 }
 0x669   :  { %v617_v51 = vpop.f32.mrb[18].mxu1 }
 0x66a   :  { %3778 = vtanh.f32 %v669_v48  ;;  %v3470_v53 = vpop.f32.mrb[19].mxu1  ;;  %v3214_v5 = vmul.f32 -1.442695, %v669_v48 }
 0x674   :  { %v3779_v55 = vpop.eup %3778 }
 0x675   :  { %687 = vrot.lane.b32.xlu0 %v3779_v55, %s4009_s0 }
 0x682   :  { %v659_v57 = vpop.f32.mrb[16].mxu0 }
 0x683   :  { %v670_v59 = vadd.f32 %v659_v57, %v4190_v58  ;;  %v3477_v61 = vpop.f32.mrb[17].mxu0 }
 0x684   :  { %v662_v63 = vpop.f32.mrb[18].mxu0 }
 0x685   :  { %3780 = vtanh.f32 %v670_v59  ;;  %v3478_v3 = vpop.f32.mrb[19].mxu0  ;;  %v3215_v34 = vmul.f32 -1.442695, %v670_v59 }
 0x686   :  { %3782 = vpow2.f32 %v3214_v5 }
 0x68f   :  { %v3781_v4 = vpop.eup %3780 }
 0x690   :  { %698 = vrot.lane.b32.xlu1 %v3781_v4, %s4009_s0  ;;  %v3783_v43 = vpop.eup %3782 }
 0x691   :  { %v674_v6 = vadd.f32 1.0, %v3783_v43 }
 0x693   :  { %3784 = vrcp.f32 %v674_v6 }
 0x694   :  { %3786 = vpow2.f32 %v3215_v34 }
 0x69d   :  { %v3785_v8 = vpop.eup %3784 }
 0x69e   :  { %v3787_v58 = vpop.eup %3786  ;;  %v685_v17 = vmul.f32 %v3785_v8, %v4238_v25 }
 0x69f   :  { %v681_v13 = vadd.f32 1.0, %v3787_v58 }
 0x6a1   :  { %3788 = vrcp.f32 %v681_v13 }
 0x6ab   :  { %v3789_v15 = vpop.eup %3788 }
 0x6ac   :  { %v696_v24 = vmul.f32 %v3789_v15, %v4243_v30 }
 0x6e7   :  { %v688_v10 = vpop.permute.xlu0 %687 }
 0x6e8   :  { %v690_v11 = vmul.f32 %v3785_v8, %v688_v10 }
 0x6ea   :  { %692 = vrot.lane.b32.xlu0 %v690_v11, %s4009_s0 }
 0x702   :  { %v699_v62 = vpop.permute.xlu1 %698 }
 0x703   :  { %v701_v16 = vmul.f32 %v3789_v15, %v699_v62 }
 0x705   :  { %703 = vrot.lane.b32.xlu1 %v701_v16, %s4009_s0 }
 0x75c   :  { %v693_v18 = vpop.permute.xlu0 %692 }
 0x75d   :  { %v4276_v21 = vadd.f32 %v693_v18, %v685_v17 }
 0x75f   :  { %3790 = vtanh.f32 %v4276_v21 }
 0x769   :  { %v3791_v23 = vpop.eup %3790 }
 0x76a   :  { %709 = vrot.lane.b32.xlu0 %v3791_v23, %s4009_s0 }
 0x777   :  { %v704_v26 = vpop.permute.xlu1 %703 }
 0x778   :  { %v4281_v27 = vadd.f32 %v704_v26, %v696_v24 }
 0x77a   :  { %3792 = vtanh.f32 %v4281_v27 }
 0x784   :  { %v3793_v29 = vpop.eup %3792 }
 0x785   :  { %715 = vrot.lane.b32.xlu1 %v3793_v29, %s4009_s0 }
 0x7dc   :  { %v710_v31 = vpop.permute.xlu0 %709 }
 0x7dd   :  { %v712_v25 = vmul.f32 %v3785_v8, %v710_v31 }
 0x7df   :  { %v4285_v35 = vpack.c.bf16 %v712_v25, %v712_v25 }
 0x7e1   :  { %737 = vrot.lane.b32.xlu0 %v4285_v35, %s4010_s3 }
 0x7f7   :  { %v716_v28 = vpop.permute.xlu1 %715 }
 0x7f8   :  { %v718_v37 = vmul.f32 %v3789_v15, %v716_v28 }
 0x7fa   :  { %v4289_v40 = vpack.c.bf16 %v718_v37, %v718_v37 }
 0x7fc   :  { %782 = vrot.lane.b32.xlu1 %v4289_v40, %s4010_s3 }
 0x853   :  { %v738_v30 = vpop.permute.xlu0 %737 }
 0x854   :  { %3484 = vmatmul.mubr.msk.bf16.vlgmr.msra.gmra.mrb[20].mxu1 %vm247_vm2, %v738_v30 }
 0x855   :  { %3496 = vmatpush3.bf16.msra.mxu1 %v4088_v7  ;;  %3499 = vmatprep.mubr.msk.bf16.mxu1 %vm4008_vm0, %v4006_v1 }
 0x856   :  { %3497 = vmatprep.subr.bf16.mxu1 %v4006_v1 }
 0x859   :  { %3498 = vmatpush3.bf16.msra.mxu1 %v4098_v9 }
 0x85a   :  { %3511 = vmatprep.subr.bf16.mxu1 %v4006_v1 }
 0x86e   :  { %v783_v33 = vpop.permute.xlu1 %782 }
 0x86f   :  { %3492 = vmatmul.mubr.msk.bf16.vlgmr.msra.gmra.mrb[20].mxu0 %vm247_vm2, %v783_v33 }
 0x870   :  { %3504 = vmatpush3.bf16.msra.mxu0 %v4111_v12  ;;  %3507 = vmatprep.mubr.msk.bf16.mxu0 %vm4008_vm0, %v4006_v1 }
 0x871   :  { %3505 = vmatprep.subr.bf16.mxu0 %v4006_v1 }
 0x874   :  { %3506 = vmatpush3.bf16.msra.mxu0 %v4121_v14 }
 0x875   :  { %3519 = vmatprep.subr.bf16.mxu0 %v4006_v1 }
 0x927   :  { %v776_v44 = vpop.f32.mrb[20].mxu1 }
 0x928   :  { %v831_v46 = vadd.f32 %v776_v44, %v4179_v47  ;;  %v3485_v48 = vpop.f32.mrb[21].mxu1 }
 0x929   :  { %v779_v50 = vpop.f32.mrb[22].mxu1 }
 0x92a   :  { %3794 = vtanh.f32 %v831_v46  ;;  %v3486_v51 = vpop.f32.mrb[23].mxu1  ;;  %v3220_v4 = vmul.f32 -1.442695, %v831_v46 }
 0x934   :  { %v3795_v53 = vpop.eup %3794 }
 0x935   :  { %849 = vrot.lane.b32.xlu0 %v3795_v53, %s4009_s0 }
 0x942   :  { %v821_v55 = vpop.f32.mrb[20].mxu0 }
 0x943   :  { %v832_v57 = vadd.f32 %v821_v55, %v4186_v54  ;;  %v3493_v59 = vpop.f32.mrb[21].mxu0 }
 0x944   :  { %v824_v61 = vpop.f32.mrb[22].mxu0 }
 0x945   :  { %3796 = vtanh.f32 %v832_v57  ;;  %v3494_v63 = vpop.f32.mrb[23].mxu0  ;;  %v3221_v43 = vmul.f32 -1.442695, %v832_v57 }
 0x946   :  { %3798 = vpow2.f32 %v3220_v4 }
 0x94f   :  { %v3797_v3 = vpop.eup %3796 }
 0x950   :  { %860 = vrot.lane.b32.xlu1 %v3797_v3, %s4009_s0  ;;  %v3799_v47 = vpop.eup %3798 }
 0x951   :  { %v836_v5 = vadd.f32 1.0, %v3799_v47 }
 0x953   :  { %3800 = vrcp.f32 %v836_v5 }
 0x954   :  { %3802 = vpow2.f32 %v3221_v43 }
 0x95d   :  { %v3801_v6 = vpop.eup %3800 }
 0x95e   :  { %v3803_v54 = vpop.eup %3802  ;;  %v847_v15 = vmul.f32 %v3801_v6, %v4276_v21 }
 0x95f   :  { %v843_v10 = vadd.f32 1.0, %v3803_v54 }
 0x961   :  { %3804 = vrcp.f32 %v843_v10 }
 0x96b   :  { %v3805_v11 = vpop.eup %3804 }
 0x96c   :  { %v858_v18 = vmul.f32 %v3805_v11, %v4281_v27 }
 0x9a7   :  { %v850_v34 = vpop.permute.xlu0 %849 }
 0x9a8   :  { %v852_v8 = vmul.f32 %v3801_v6, %v850_v34 }
 0x9aa   :  { %854 = vrot.lane.b32.xlu0 %v852_v8, %s4009_s0 }
 0x9c2   :  { %v861_v58 = vpop.permute.xlu1 %860 }
 0x9c3   :  { %v863_v13 = vmul.f32 %v3805_v11, %v861_v58 }
 0x9c5   :  { %865 = vrot.lane.b32.xlu1 %v863_v13, %s4009_s0 }
 0xa1c   :  { %v855_v62 = vpop.permute.xlu0 %854 }
 0xa1d   :  { %v4314_v16 = vadd.f32 %v855_v62, %v847_v15 }
 0xa1f   :  { %3806 = vtanh.f32 %v4314_v16 }
 0xa29   :  { %v3807_v17 = vpop.eup %3806 }
 0xa2a   :  { %871 = vrot.lane.b32.xlu0 %v3807_v17, %s4009_s0 }
 0xa37   :  { %v866_v23 = vpop.permute.xlu1 %865 }
 0xa38   :  { %v4319_v24 = vadd.f32 %v866_v23, %v858_v18 }
 0xa3a   :  { %3808 = vtanh.f32 %v4319_v24 }
 0xa44   :  { %v3809_v26 = vpop.eup %3808 }
 0xa45   :  { %877 = vrot.lane.b32.xlu1 %v3809_v26, %s4009_s0 }
 0xa9c   :  { %v872_v29 = vpop.permute.xlu0 %871 }
 0xa9d   :  { %v874_v21 = vmul.f32 %v3801_v6, %v872_v29 }
 0xa9f   :  { %v4323_v31 = vpack.c.bf16 %v874_v21, %v874_v21 }
 0xaa1   :  { %899 = vrot.lane.b32.xlu0 %v4323_v31, %s4010_s3 }
 0xab7   :  { %v878_v25 = vpop.permute.xlu1 %877 }
 0xab8   :  { %v880_v28 = vmul.f32 %v3805_v11, %v878_v25 }
 0xaba   :  { %v4327_v37 = vpack.c.bf16 %v880_v28, %v880_v28 }
 0xabc   :  { %944 = vrot.lane.b32.xlu1 %v4327_v37, %s4010_s3 }
 0xb13   :  { %v900_v27 = vpop.permute.xlu0 %899 }
 0xb14   :  { %3500 = vmatmul.mubr.msk.bf16.vlgmr.msra.gmra.mrb[24].mxu1 %vm247_vm2, %v900_v27 }
 0xb15   :  { %3512 = vmatpush3.bf16.msra.mxu1 %v4088_v7  ;;  %3515 = vmatprep.mubr.msk.bf16.mxu1 %vm4008_vm0, %v4006_v1 }
 0xb16   :  { %3513 = vmatprep.subr.bf16.mxu1 %v4006_v1 }
 0xb19   :  { %3514 = vmatpush3.bf16.msra.mxu1 %v4098_v9 }
 0xb1a   :  { %3527 = vmatprep.subr.bf16.mxu1 %v4006_v1 }
 0xb2e   :  { %v945_v30 = vpop.permute.xlu1 %944 }
 0xb2f   :  { %3508 = vmatmul.mubr.msk.bf16.vlgmr.msra.gmra.mrb[24].mxu0 %vm247_vm2, %v945_v30 }
 0xb30   :  { %3520 = vmatpush3.bf16.msra.mxu0 %v4111_v12  ;;  %3523 = vmatprep.mubr.msk.bf16.mxu0 %vm4008_vm0, %v4006_v1 }
 0xb31   :  { %3521 = vmatprep.subr.bf16.mxu0 %v4006_v1 }
 0xb34   :  { %3522 = vmatpush3.bf16.msra.mxu0 %v4121_v14 }
 0xb35   :  { %3535 = vmatprep.subr.bf16.mxu0 %v4006_v1 }
 0xbe7   :  { %v938_v33 = vpop.f32.mrb[24].mxu1 }
 0xbe8   :  { %v991_v44 = vadd.f32 %v938_v33, %v4184_v52  ;;  %v3501_v46 = vpop.f32.mrb[25].mxu1 }
 0xbe9   :  { %v941_v48 = vpop.f32.mrb[26].mxu1 }
 0xbea   :  { %3810 = vtanh.f32 %v991_v44  ;;  %v3502_v50 = vpop.f32.mrb[27].mxu1  ;;  %v3226_v3 = vmul.f32 -1.442695, %v991_v44 }
 0xbf4   :  { %v3811_v51 = vpop.eup %3810 }
 0xbf5   :  { %1009 = vrot.lane.b32.xlu0 %v3811_v51, %s4009_s0 }
 0xc02   :  { %v983_v53 = vpop.f32.mrb[24].mxu0 }
 0xc03   :  { %v992_v55 = vadd.f32 %v983_v53, %v4181_v49  ;;  %v3509_v57 = vpop.f32.mrb[25].mxu0 }
 0xc04   :  { %v986_v59 = vpop.f32.mrb[26].mxu0 }
 0xc05   :  { %3812 = vtanh.f32 %v992_v55  ;;  %v3510_v61 = vpop.f32.mrb[27].mxu0  ;;  %v3227_v47 = vmul.f32 -1.442695, %v992_v55 }
 0xc06   :  { %3814 = vpow2.f32 %v3226_v3 }
 0xc0f   :  { %v3813_v63 = vpop.eup %3812 }
 0xc10   :  { %1020 = vrot.lane.b32.xlu1 %v3813_v63, %s4009_s0  ;;  %v3815_v52 = vpop.eup %3814 }
 0xc11   :  { %v996_v4 = vadd.f32 1.0, %v3815_v52 }
 0xc13   :  { %3816 = vrcp.f32 %v996_v4 }
 0xc14   :  { %3818 = vpow2.f32 %v3227_v47 }
 0xc1d   :  { %v3817_v5 = vpop.eup %3816 }
 0xc1e   :  { %v3819_v49 = vpop.eup %3818  ;;  %v1007_v11 = vmul.f32 %v3817_v5, %v4314_v16 }
 0xc1f   :  { %v1003_v34 = vadd.f32 1.0, %v3819_v49 }
 0xc21   :  { %3820 = vrcp.f32 %v1003_v34 }
 0xc2b   :  { %v3821_v8 = vpop.eup %3820 }
 0xc2c   :  { %v1018_v62 = vmul.f32 %v3821_v8, %v4319_v24 }
 0xc67   :  { %v1010_v43 = vpop.permute.xlu0 %1009 }
 0xc68   :  { %v1012_v6 = vmul.f32 %v3817_v5, %v1010_v43 }
 0xc6a   :  { %1014 = vrot.lane.b32.xlu0 %v1012_v6, %s4009_s0 }
 0xc82   :  { %v1021_v54 = vpop.permute.xlu1 %1020 }
 0xc83   :  { %v1023_v10 = vmul.f32 %v3821_v8, %v1021_v54 }
 0xc85   :  { %1025 = vrot.lane.b32.xlu1 %v1023_v10, %s4009_s0 }
 0xcdc   :  { %v1015_v58 = vpop.permute.xlu0 %1014 }
 0xcdd   :  { %v4352_v13 = vadd.f32 %v1015_v58, %v1007_v11 }
 0xcdf   :  { %3822 = vtanh.f32 %v4352_v13 }
 0xce9   :  { %v3823_v15 = vpop.eup %3822 }
 0xcea   :  { %1031 = vrot.lane.b32.xlu0 %v3823_v15, %s4009_s0 }
 0xcf7   :  { %v1026_v17 = vpop.permute.xlu1 %1025 }
 0xcf8   :  { %v4357_v18 = vadd.f32 %v1026_v17, %v1018_v62 }
 0xcfa   :  { %3824 = vtanh.f32 %v4357_v18 }
 0xd04   :  { %v3825_v23 = vpop.eup %3824 }
 0xd05   :  { %1037 = vrot.lane.b32.xlu1 %v3825_v23, %s4009_s0 }
 0xd5c   :  { %v1032_v26 = vpop.permute.xlu0 %1031 }
 0xd5d   :  { %v1034_v16 = vmul.f32 %v3817_v5, %v1032_v26 }
 0xd5f   :  { %v4361_v29 = vpack.c.bf16 %v1034_v16, %v1034_v16 }
 0xd61   :  { %1059 = vrot.lane.b32.xlu0 %v4361_v29, %s4010_s3 }
 0xd77   :  { %v1038_v21 = vpop.permute.xlu1 %1037 }
 0xd78   :  { %v1040_v25 = vmul.f32 %v3821_v8, %v1038_v21 }
 0xd7a   :  { %v4365_v28 = vpack.c.bf16 %v1040_v25, %v1040_v25 }
 0xd7c   :  { %1104 = vrot.lane.b32.xlu1 %v4365_v28, %s4010_s3 }
 0xdd3   :  { %v1060_v24 = vpop.permute.xlu0 %1059 }
 0xdd4   :  { %3516 = vmatmul.mubr.msk.bf16.vlgmr.msra.gmra.mrb[28].mxu1 %vm247_vm2, %v1060_v24 }
 0xdd5   :  { %3528 = vmatpush3.bf16.msra.mxu1 %v4088_v7  ;;  %3531 = vmatprep.mubr.msk.bf16.mxu1 %vm4008_vm0, %v4006_v1 }
 0xdd6   :  { %3529 = vmatprep.subr.bf16.mxu1 %v4006_v1 }
 0xdd9   :  { %3530 = vmatpush3.bf16.msra.mxu1 %v4098_v9 }
 0xdda   :  { %3543 = vmatprep.subr.bf16.mxu1 %v4006_v1 }
 0xdee   :  { %v1105_v27 = vpop.permute.xlu1 %1104 }
 0xdef   :  { %3524 = vmatmul.mubr.msk.bf16.vlgmr.msra.gmra.mrb[28].mxu0 %vm247_vm2, %v1105_v27 }
 0xdf0   :  { %3536 = vmatpush3.bf16.msra.mxu0 %v4111_v12  ;;  %3539 = vmatprep.mubr.msk.bf16.mxu0 %vm4008_vm0, %v4006_v1 }
 0xdf1   :  { %3537 = vmatprep.subr.bf16.mxu0 %v4006_v1 }
 0xdf4   :  { %3538 = vmatpush3.bf16.msra.mxu0 %v4121_v14 }
 0xdf5   :  { %3551 = vmatprep.subr.bf16.mxu0 %v4006_v1 }
 0xea7   :  { %v1098_v30 = vpop.f32.mrb[28].mxu1 }
 0xea8   :  { %v1151_v33 = vadd.f32 %v1098_v30, %v4188_v56  ;;  %v3517_v44 = vpop.f32.mrb[29].mxu1 }
 0xea9   :  { %v1101_v46 = vpop.f32.mrb[30].mxu1 }
 0xeaa   :  { %3826 = vtanh.f32 %v1151_v33  ;;  %v3518_v48 = vpop.f32.mrb[31].mxu1  ;;  %v3232_v63 = vmul.f32 -1.442695, %v1151_v33 }
 0xeb4   :  { %v3827_v50 = vpop.eup %3826 }
 0xeb5   :  { %1169 = vrot.lane.b32.xlu0 %v3827_v50, %s4009_s0 }
 0xec2   :  { %v1143_v51 = vpop.f32.mrb[28].mxu0 }
 0xec3   :  { %v1152_v53 = vadd.f32 %v1143_v51, %v4177_v45  ;;  %v3525_v55 = vpop.f32.mrb[29].mxu0 }
 0xec4   :  { %v1146_v57 = vpop.f32.mrb[30].mxu0 }
 0xec5   :  { %3828 = vtanh.f32 %v1152_v53  ;;  %v3526_v59 = vpop.f32.mrb[31].mxu0  ;;  %v3233_v52 = vmul.f32 -1.442695, %v1152_v53 }
 0xec6   :  { %3830 = vpow2.f32 %v3232_v63 }
 0xecf   :  { %v3829_v61 = vpop.eup %3828 }
 0xed0   :  { %1180 = vrot.lane.b32.xlu1 %v3829_v61, %s4009_s0  ;;  %v3831_v56 = vpop.eup %3830 }
 0xed1   :  { %v1156_v3 = vadd.f32 1.0, %v3831_v56 }
 0xed3   :  { %3832 = vrcp.f32 %v1156_v3 }
 0xed4   :  { %3834 = vpow2.f32 %v3233_v52 }
 0xedd   :  { %v3833_v4 = vpop.eup %3832 }
 0xede   :  { %v3835_v45 = vpop.eup %3834  ;;  %v1167_v8 = vmul.f32 %v3833_v4, %v4352_v13 }
 0xedf   :  { %v1163_v43 = vadd.f32 1.0, %v3835_v45 }
 0xee1   :  { %3836 = vrcp.f32 %v1163_v43 }
 0xeeb   :  { %v3837_v6 = vpop.eup %3836 }
 0xeec   :  { %v1178_v58 = vmul.f32 %v3837_v6, %v4357_v18 }
 0xf27   :  { %v1170_v47 = vpop.permute.xlu0 %1169 }
 0xf28   :  { %v1172_v5 = vmul.f32 %v3833_v4, %v1170_v47 }
 0xf2a   :  { %1174 = vrot.lane.b32.xlu0 %v1172_v5, %s4009_s0 }
 0xf42   :  { %v1181_v49 = vpop.permute.xlu1 %1180 }
 0xf43   :  { %v1183_v34 = vmul.f32 %v3837_v6, %v1181_v49 }
 0xf45   :  { %1185 = vrot.lane.b32.xlu1 %v1183_v34, %s4009_s0 }
 0xf9c   :  { %v1175_v54 = vpop.permute.xlu0 %1174 }
 0xf9d   :  { %v4390_v10 = vadd.f32 %v1175_v54, %v1167_v8 }
 0xf9f   :  { %3838 = vtanh.f32 %v4390_v10 }
 0xfa9   :  { %v3839_v11 = vpop.eup %3838 }
 0xfaa   :  { %1191 = vrot.lane.b32.xlu0 %v3839_v11, %s4009_s0 }
 0xfb7   :  { %v1186_v15 = vpop.permute.xlu1 %1185 }
 0xfb8   :  { %v4395_v62 = vadd.f32 %v1186_v15, %v1178_v58 }
 0xfba   :  { %3840 = vtanh.f32 %v4395_v62 }
 0xfc4   :  { %v3841_v17 = vpop.eup %3840 }
 0xfc5   :  { %1197 = vrot.lane.b32.xlu1 %v3841_v17, %s4009_s0 }
0x101c   :  { %v1192_v23 = vpop.permute.xlu0 %1191 }
0x101d   :  { %v1194_v13 = vmul.f32 %v3833_v4, %v1192_v23 }
0x101f   :  { %v4399_v26 = vpack.c.bf16 %v1194_v13, %v1194_v13 }
0x1021   :  { %1219 = vrot.lane.b32.xlu0 %v4399_v26, %s4010_s3 }
0x1037   :  { %v1198_v16 = vpop.permute.xlu1 %1197 }
0x1038   :  { %v1200_v21 = vmul.f32 %v3837_v6, %v1198_v16 }
0x103a   :  { %v4403_v25 = vpack.c.bf16 %v1200_v21, %v1200_v21 }
0x103c   :  { %1264 = vrot.lane.b32.xlu1 %v4403_v25, %s4010_s3 }
0x1093   :  { %v1220_v18 = vpop.permute.xlu0 %1219 }
0x1094   :  { %3532 = vmatmul.mubr.msk.bf16.vlgmr.msra.gmra.mrb[32].mxu1 %vm247_vm2, %v1220_v18 }
0x1095   :  { %3544 = vmatpush3.bf16.msra.mxu1 %v4088_v7  ;;  %3547 = vmatprep.mubr.msk.bf16.mxu1 %vm4008_vm0, %v4006_v1 }
0x1096   :  { %3545 = vmatprep.subr.bf16.mxu1 %v4006_v1 }
0x1099   :  { %3546 = vmatpush3.bf16.msra.mxu1 %v4098_v9 }
0x10ae   :  { %v1265_v24 = vpop.permute.xlu1 %1264 }
0x10af   :  { %3540 = vmatmul.mubr.msk.bf16.vlgmr.msra.gmra.mrb[32].mxu0 %vm247_vm2, %v1265_v24 }
0x10b0   :  { %3552 = vmatpush3.bf16.msra.mxu0 %v4111_v12  ;;  %3555 = vmatprep.mubr.msk.bf16.mxu0 %vm4008_vm0, %v4006_v1 }
0x10b1   :  { %3553 = vmatprep.subr.bf16.mxu0 %v4006_v1 }
0x10b4   :  { %3554 = vmatpush3.bf16.msra.mxu0 %v4121_v14 }
0x1167   :  { %v1258_v7 = vpop.f32.mrb[32].mxu1 }
0x1168   :  { %v1311_v27 = vadd.f32 %v1258_v7, %v4192_v60  ;;  %v3533_v30 = vpop.f32.mrb[33].mxu1 }
0x1169   :  { %v1261_v33 = vpop.f32.mrb[34].mxu1 }
0x116a   :  { %3842 = vtanh.f32 %v1311_v27  ;;  %v3534_v44 = vpop.f32.mrb[35].mxu1  ;;  %v3238_v14 = vmul.f32 -1.442695, %v1311_v27 }
0x1174   :  { %v3843_v9 = vpop.eup %3842 }
0x1175   :  { %1329 = vrot.lane.b32.xlu0 %v3843_v9, %s4009_s0 }
0x1182   :  { %v1303_v46 = vpop.f32.mrb[32].mxu0 }
0x1183   :  { %v1312_v12 = vadd.f32 %v1303_v46, %v4173_v38  ;;  %v3541_v48 = vpop.f32.mrb[33].mxu0 }
0x1184   :  { %v1306_v50 = vpop.f32.mrb[34].mxu0 }
0x1185   :  { %3844 = vtanh.f32 %v1312_v12  ;;  %v3542_v51 = vpop.f32.mrb[35].mxu0  ;;  %v3239_v57 = vmul.f32 -1.442695, %v1312_v12 }
0x1186   :  { %3846 = vpow2.f32 %v3238_v14 }
0x118f   :  { %v3845_v53 = vpop.eup %3844 }
0x1190   :  { %1340 = vrot.lane.b32.xlu1 %v3845_v53, %s4009_s0  ;;  %v3847_v60 = vpop.eup %3846 }
0x1191   :  { %v1316_v55 = vadd.f32 1.0, %v3847_v60 }
0x1193   :  { %3848 = vrcp.f32 %v1316_v55 }
0x1194   :  { %3850 = vpow2.f32 %v3239_v57 }
0x119d   :  { %v3849_v59 = vpop.eup %3848 }
0x119e   :  { %v3851_v38 = vpop.eup %3850  ;;  %v1327_v47 = vmul.f32 %v3849_v59, %v4390_v10 }
0x119f   :  { %v1323_v56 = vadd.f32 1.0, %v3851_v38 }
0x11a1   :  { %3852 = vrcp.f32 %v1323_v56  ;;  %v3722_v56 = vld [vmem:[%s4889_s4 + $0x4] ss:$8 sps:$4 sm:$0xff]  }
0x11a2   :  { %1623 = vmatprep.subr.bf16.mxu1 %v3722_v56 }
0x11ab   :  { %v3853_v3 = vpop.eup %3852 }
0x11ac   :  { %v1338_v6 = vmul.f32 %v3853_v3, %v4395_v62 }
0x11e7   :  { %v1330_v61 = vpop.permute.xlu0 %1329 }
0x11e8   :  { %v1332_v63 = vmul.f32 %v3849_v59, %v1330_v61 }
0x11ea   :  { %1334 = vrot.lane.b32.xlu0 %v1332_v63, %s4009_s0 }
0x1202   :  { %v1341_v52 = vpop.permute.xlu1 %1340 }
0x1203   :  { %v1343_v4 = vmul.f32 %v3853_v3, %v1341_v52  ;;  %v3725_v52 = vld [vmem:[%s4889_s4 + $0x14] ss:$8 sps:$4 sm:$0xff]  }
0x1205   :  { %1345 = vrot.lane.b32.xlu1 %v1343_v4, %s4009_s0 }
0x125c   :  { %v1335_v5 = vpop.permute.xlu0 %1334 }
0x125d   :  { %v1337_v45 = vadd.f32 %v1335_v5, %v1327_v47  ;;  %v3723_v47 = vld [vmem:[%s4889_s4 + $0x10] ss:$8 sps:$4 sm:$0xff]  }
0x125f   :  { %3854 = vtanh.f32 %v1337_v45 }
0x1269   :  { %v3855_v43 = vpop.eup %3854 }
0x126a   :  { %1351 = vrot.lane.b32.xlu0 %v3855_v43, %s4009_s0 }
0x1277   :  { %v1346_v49 = vpop.permute.xlu1 %1345 }
0x1278   :  { %v4428_v34 = vadd.f32 %v1346_v49, %v1338_v6 }
0x127a   :  { %3856 = vtanh.f32 %v4428_v34 }
0x1284   :  { %v3857_v8 = vpop.eup %3856 }
0x1285   :  { %1357 = vrot.lane.b32.xlu1 %v3857_v8, %s4009_s0 }
0x12dc   :  { %v1352_v54 = vpop.permute.xlu0 %1351 }
0x12dd   :  { %v1354_v11 = vmul.f32 %v3849_v59, %v1352_v54 }
0x12df   :  { %v4432_v58 = vpack.c.bf16 %v1354_v11, %v1354_v11 }
0x12e1   :  { %1379 = vrot.lane.b32.xlu0 %v4432_v58, %s4010_s3 }
0x12f7   :  { %v1358_v10 = vpop.permute.xlu1 %1357 }
0x12f8   :  { %v1360_v15 = vmul.f32 %v3853_v3, %v1358_v10  ;;  %v3720_v3 = vld [vmem:[%s4889_s4] ss:$8 sps:$4 sm:$0xff]  }
0x12fa   :  { %v4436_v17 = vpack.c.bf16 %v1360_v15, %v1360_v15 }
0x12fc   :  { %1424 = vrot.lane.b32.xlu1 %v4436_v17, %s4010_s3 }
0x1353   :  { %v1380_v62 = vpop.permute.xlu0 %1379 }
0x1354   :  { %3548 = vmatmul.mubr.msk.bf16.vlgmr.msra.gmra.mrb[36].mxu1 %vm247_vm2, %v1380_v62 }
0x1355   :  { %1655 = vmatprep.mubr.bf16.mxu1 %v4007_v2  ;;  %1624 = vmatpush1.bf16.msra.mxu1 %v3720_v3 }
0x1356   :  { %1625 = vmatprep.subr.bf16.mxu1 %v3725_v52  ;;  %v1559_v52 = vld [vmem:[%s4892_s7] sm:$0x3] }
0x1359   :  { %1626 = vmatpush1.bf16.msra.mxu1 %v3723_v47 }
0x135a   :  { %3559 = vmatprep.subr.bf16.mxu1 %v4006_v1 }
0x136e   :  { %v1425_v23 = vpop.permute.xlu1 %1424 }
0x136f   :  { %3556 = vmatmul.mubr.msk.bf16.vlgmr.msra.gmra.mrb[36].mxu0 %vm247_vm2, %v1425_v23 }
0x1370   :  { %1800 = vmatprep.mubr.bf16.mxu0 %v4007_v2 }
0x1427   :  { %v1418_v13 = vpop.f32.mrb[36].mxu1 }
0x1428   :  { %v1471_v16 = vadd.f32 %v1418_v13, %v4196_v0  ;;  %v3549_v21 = vpop.f32.mrb[37].mxu1 }
0x1429   :  { %v1421_v18 = vpop.f32.mrb[38].mxu1 }
0x142a   :  { %3858 = vtanh.f32 %v1471_v16  ;;  %v3550_v24 = vpop.f32.mrb[39].mxu1  ;;  %v3244_v12 = vmul.f32 -1.442695, %v1471_v16  ;;  %v4557_v18 = vld [vmem:[%s4891_s6 + $0x10] sm:$0xff]  }
0x1434   :  { %v3859_v7 = vpop.eup %3858 }
0x1435   :  { %1489 = vrot.lane.b32.xlu0 %v3859_v7, %s4009_s0 }
0x1442   :  { %v1463_v27 = vpop.f32.mrb[36].mxu0 }
0x1443   :  { %v1472_v30 = vadd.f32 %v1463_v27, %v4169_v32  ;;  %v3557_v33 = vpop.f32.mrb[37].mxu0  ;;  %v4566_v27 = vld [vmem:[%s4891_s6 + $0x18] sm:$0xff]  }
0x1444   :  { %v1466_v44 = vpop.f32.mrb[38].mxu0 }
0x1445   :  { %3860 = vtanh.f32 %v1472_v30  ;;  %v3558_v9 = vpop.f32.mrb[39].mxu0  ;;  %v3245_v50 = vmul.f32 -1.442695, %v1472_v30 }
0x1446   :  { %3862 = vpow2.f32 %v3244_v12 }
0x144f   :  { %v3861_v46 = vpop.eup %3860 }
0x1450   :  { %1500 = vrot.lane.b32.xlu1 %v3861_v46, %s4009_s0  ;;  %v3863_v0 = vpop.eup %3862 }
0x1451   :  { %v1476_v48 = vadd.f32 1.0, %v3863_v0 }
0x1453   :  { %3864 = vrcp.f32 %v1476_v48 }
0x1454   :  { %3866 = vpow2.f32 %v3245_v50 }
0x145d   :  { %v3865_v51 = vpop.eup %3864 }
0x145e   :  { %v3867_v32 = vpop.eup %3866  ;;  %v1487_v61 = vmul.f32 %v3865_v51, %v1337_v45 }
0x145f   :  { %v1483_v60 = vadd.f32 1.0, %v3867_v32 }
0x1461   :  { %3868 = vrcp.f32 %v1483_v60 }
0x146b   :  { %v4449_v55 = vpop.eup %3868 }
0x146c   :  { %v1498_v5 = vmul.f32 %v4449_v55, %v4428_v34  ;;  %v4531_v34 = vld [vmem:[%s4891_s6 + $0x8] sm:$0xff]  }
0x14a7   :  { %v1490_v53 = vpop.permute.xlu0 %1489 }
0x14a8   :  { %v1492_v14 = vmul.f32 %v3865_v51, %v1490_v53 }
0x14aa   :  { %1494 = vrot.lane.b32.xlu0 %v1492_v14, %s4009_s0 }
0x14c2   :  { %v1501_v57 = vpop.permute.xlu1 %1500 }
0x14c3   :  { %v1503_v59 = vmul.f32 %v4449_v55, %v1501_v57 }
0x14c5   :  { %1505 = vrot.lane.b32.xlu1 %v1503_v59, %s4009_s0 }
0x151c   :  { %v1495_v63 = vpop.permute.xlu0 %1494 }
0x151d   :  { %v1497_v38 = vadd.f32 %v1495_v63, %v1487_v61 }
0x151f   :  { %3870 = vtanh.f32 %v1497_v38 }
0x1529   :  { %v3871_v4 = vpop.eup %3870 }
0x152a   :  { %1511 = vrot.lane.b32.xlu0 %v3871_v4, %s4009_s0 }
0x152e   :  { %400 = vrot.lane.b32.xlu0 %v4209_v39, %s4010_s3  ;;  %v3731_v39 = vld [vmem:[%s4890_s5 + $0x4] ss:$8 sps:$4 sm:$0xff]  }
0x152f   :  { %1768 = vmatprep.subr.bf16.mxu0 %v3731_v39 }
0x1532   :  { %561 = vrot.lane.b32.xlu0 %v4247_v36, %s4010_s3  ;;  %v3729_v36 = vld [vmem:[%s4890_s5] ss:$8 sps:$4 sm:$0xff]  }
0x1533   :  { %1769 = vmatpush1.bf16.msra.mxu0 %v3729_v36 }
0x1536   :  { %723 = vrot.lane.b32.xlu0 %v4285_v35, %s4010_s3  ;;  %v3734_v35 = vld [vmem:[%s4890_s5 + $0x14] ss:$8 sps:$4 sm:$0xff]  }
0x1537   :  { %v1506_v45 = vpop.permute.xlu1 %1505  ;;  %1770 = vmatprep.subr.bf16.mxu0 %v3734_v35 }
0x1538   :  { %v1508_v43 = vadd.f32 %v1506_v45, %v1498_v5  ;;  %v1564_v5 = vrot.slane %v1559_v52, %v56_v20  ;;  %v1568_v45 = vrot.slane %v1559_v52, %v60_v22 }
0x153a   :  { %3872 = vtanh.f32 %v1508_v43  ;;  %885 = vrot.lane.b32.xlu0 %v4323_v31, %s4010_s3 }
0x153e   :  { %1045 = vrot.lane.b32.xlu0 %v4361_v29, %s4010_s3  ;;  %v3732_v29 = vld [vmem:[%s4890_s5 + $0x10] ss:$8 sps:$4 sm:$0xff]  }
0x153f   :  { %1771 = vmatpush1.bf16.msra.mxu0 %v3732_v29 }
0x1540   :  { %3567 = vmatprep.subr.bf16.mxu0 %v4006_v1 }
0x1542   :  { %1205 = vrot.lane.b32.xlu0 %v4399_v26, %s4010_s3 }
0x1544   :  { %v3873_v31 = vpop.eup %3872 }
0x1545   :  { %1517 = vrot.lane.b32.xlu1 %v3873_v31, %s4009_s0 }
0x1546   :  { %1365 = vrot.lane.b32.xlu0 %v4432_v58, %s4010_s3 }
0x1549   :  { %409 = vrot.lane.b32.xlu1 %v4213_v42, %s4010_s3 }
0x154d   :  { %570 = vrot.lane.b32.xlu1 %v4251_v41, %s4010_s3 }
0x1551   :  { %732 = vrot.lane.b32.xlu1 %v4289_v40, %s4010_s3 }
0x1555   :  { %894 = vrot.lane.b32.xlu1 %v4327_v37, %s4010_s3 }
0x1559   :  { %1054 = vrot.lane.b32.xlu1 %v4365_v28, %s4010_s3 }
0x155d   :  { %1214 = vrot.lane.b32.xlu1 %v4403_v25, %s4010_s3  ;;  %v4522_v25 = vld [vmem:[%s4891_s6] sm:$0xff]  }
0x1561   :  { %1374 = vrot.lane.b32.xlu1 %v4436_v17, %s4010_s3 }
0x159c   :  { %v1512_v26 = vpop.permute.xlu0 %1511 }
0x159d   :  { %v4511_v42 = vmul.f32 %v3865_v51, %v1512_v26 }
0x159f   :  { %v3329_v41 = vpack.c.bf16 %v4511_v42, %v4511_v42 }
0x15a0   :  { %v401_v40 = vpop.permute.xlu0 %400 }
0x15a1   :  { %404 = vst.msk [vmem:[#allocation4] sm:$0xf] %vm403_vm3, %v401_v40  ;;  %1525 = vrot.lane.b32.xlu0 %v3329_v41, %s4010_s3 }
0x15a4   :  { %v562_v37 = vpop.permute.xlu0 %561 }
0x15a5   :  { %565 = vst.msk [vmem:[#allocation4 + $0x4] sm:$0xf] %vm403_vm3, %v562_v37 }
0x15a8   :  { %v724_v28 = vpop.permute.xlu0 %723 }
0x15a9   :  { %727 = vst.msk [vmem:[#allocation4 + $0x8] sm:$0xf] %vm403_vm3, %v724_v28 }
0x15ac   :  { %v886_v6 = vpop.permute.xlu0 %885  ;;  %v3726_v49 = vld [vmem:[#allocation4] sm:$0xff]  }
0x15ad   :  { %889 = vst.msk [vmem:[#allocation4 + $0xc] sm:$0xf] %vm403_vm3, %v886_v6  ;;  %3256 = vmatmul.mubr.msk.bf16.vlgmr.msra.gmra.mrb[40].mxu1 %vm247_vm2, %v3726_v49 }
0x15ae   :  { %1665 = vmatprep.mubr.bf16.mxu1 %v4007_v2  ;;  %3560 = vmatpush3.bf16.msra.mxu1 %v4522_v25 }
0x15af   :  { %3561 = vmatprep.subr.bf16.mxu1 %v4006_v1 }
0x15b0   :  { %v1046_v8 = vpop.permute.xlu0 %1045 }
0x15b1   :  { %1049 = vst.msk [vmem:[#allocation4 + $0x10] sm:$0xf] %vm403_vm3, %v1046_v8 }
0x15b2   :  { %3562 = vmatpush3.bf16.msra.mxu1 %v4531_v34 }
0x15b3   :  { %3575 = vmatprep.subr.bf16.mxu1 %v4006_v1 }
0x15b4   :  { %v1206_v54 = vpop.permute.xlu0 %1205  ;;  %v3727_v11 = vld [vmem:[#allocation4 + $0x8] sm:$0xff]  }
0x15b5   :  { %1209 = vst.msk [vmem:[#allocation4 + $0x14] sm:$0xf] %vm403_vm3, %v1206_v54  ;;  %3257 = vmatmul.mubr.msk.bf16.gmra.mrb[44].mxu1 %vm247_vm2, %v3727_v11 }
0x15b6   :  { %1675 = vmatprep.mubr.bf16.mxu1 %v4007_v2 }
0x15b7   :  { %v1518_v58 = vpop.permute.xlu1 %1517 }
0x15b8   :  { %v4541_v10 = vmul.f32 %v4449_v55, %v1518_v58  ;;  %v1366_v15 = vpop.permute.xlu0 %1365 }
0x15b9   :  { %1369 = vst.msk [vmem:[#allocation4 + $0x18] sm:$0xf] %vm403_vm3, %v1366_v15 }
0x15ba   :  { %v3330_v17 = vpack.c.bf16 %v4541_v10, %v4541_v10  ;;  %v3083_v62 = vpack.c.bf16 %v4541_v10, %v4511_v42 }
0x15bb   :  { %v410_v23 = vpop.permute.xlu1 %409 }
0x15bc   :  { %412 = vst.msk [vmem:[#allocation5] sm:$0xf] %vm403_vm3, %v410_v23  ;;  %1534 = vrot.lane.b32.xlu1 %v3330_v17, %s4010_s3  ;;  %v3728_v13 = vld [vmem:[#allocation4 + $0x10] sm:$0xff]  }
0x15bd   :  { %3258 = vmatmul.mubr.msk.bf16.gmra.mrb[48].mxu1 %vm247_vm2, %v3728_v13 }
0x15be   :  { %1685 = vmatprep.mubr.bf16.mxu1 %v4007_v2 }
0x15bf   :  { %v571_v16 = vpop.permute.xlu1 %570 }
0x15c0   :  { %574 = vst.msk [vmem:[#allocation5 + $0x4] sm:$0xf] %vm403_vm3, %v571_v16 }
0x15c3   :  { %v733_v21 = vpop.permute.xlu1 %732 }
0x15c4   :  { %736 = vst.msk [vmem:[#allocation5 + $0x8] sm:$0xf] %vm403_vm3, %v733_v21 }
0x15c7   :  { %v895_v24 = vpop.permute.xlu1 %894  ;;  %v3735_v7 = vld [vmem:[#allocation5] sm:$0xff]  }
0x15c8   :  { %898 = vst.msk [vmem:[#allocation5 + $0xc] sm:$0xf] %vm403_vm3, %v895_v24  ;;  %3268 = vmatmul.mubr.msk.bf16.vlgmr.msra.gmra.mrb[40].mxu0 %vm247_vm2, %v3735_v7 }
0x15c9   :  { %1810 = vmatprep.mubr.bf16.mxu0 %v4007_v2  ;;  %3568 = vmatpush3.bf16.msra.mxu0 %v4557_v18 }
0x15ca   :  { %3569 = vmatprep.subr.bf16.mxu0 %v4006_v1 }
0x15cb   :  { %v1055_v30 = vpop.permute.xlu1 %1054 }
0x15cc   :  { %1058 = vst.msk [vmem:[#allocation5 + $0x10] sm:$0xf] %vm403_vm3, %v1055_v30 }
0x15cd   :  { %3570 = vmatpush3.bf16.msra.mxu0 %v4566_v27 }
0x15ce   :  { %3583 = vmatprep.subr.bf16.mxu0 %v4006_v1 }
0x15cf   :  { %v1215_v33 = vpop.permute.xlu1 %1214  ;;  %v3736_v44 = vld [vmem:[#allocation5 + $0x8] sm:$0xff]  }
0x15d0   :  { %1218 = vst.msk [vmem:[#allocation5 + $0x14] sm:$0xf] %vm403_vm3, %v1215_v33  ;;  %3269 = vmatmul.mubr.msk.bf16.gmra.mrb[44].mxu0 %vm247_vm2, %v3736_v44 }
0x15d1   :  { %1820 = vmatprep.mubr.bf16.mxu0 %v4007_v2 }
0x15d3   :  { %v1375_v9 = vpop.permute.xlu1 %1374 }
0x15d4   :  { %1378 = vst.msk [vmem:[#allocation5 + $0x18] sm:$0xf] %vm403_vm3, %v1375_v9 }
0x15d7   :  { %v3737_v46 = vld [vmem:[#allocation5 + $0x10] sm:$0xff]  }
0x15d8   :  { %3270 = vmatmul.mubr.msk.bf16.gmra.mrb[48].mxu0 %vm247_vm2, %v3737_v46 }
0x15d9   :  { %1830 = vmatprep.mubr.bf16.mxu0 %v4007_v2 }
0x1613   :  { %v1526_v12 = vpop.permute.xlu0 %1525 }
0x1614   :  { %1529 = vst.msk [vmem:[#allocation4 + $0x1c] sm:$0xf] %vm403_vm3, %v1526_v12 }
0x161b   :  { %v3738_v0 = vld [vmem:[#allocation4 + $0x18] sm:$0xff]  }
0x161c   :  { %3259 = vmatmul.mubr.msk.bf16.gmra.mrb[52].mxu1 %vm247_vm2, %v3738_v0 }
0x161d   :  { %3563 = vmatprep.mubr.msk.bf16.mxu1 %vm4008_vm0, %v4006_v1 }
0x1624   :  { %3564 = vmatmul.mubr.bf16.vlgmr.msra.gmra.mrb[56].mxu1 %v4007_v2 }
0x1625   :  { %3576 = vmatpush3.bf16.msra.mxu1 %v4522_v25  ;;  %3579 = vmatprep.mubr.msk.bf16.mxu1 %vm4008_vm0, %v4006_v1 }
0x1626   :  { %3577 = vmatprep.subr.bf16.mxu1 %v4006_v1 }
0x1629   :  { %3578 = vmatpush3.bf16.msra.mxu1 %v4531_v34 }
0x162a   :  { %3591 = vmatprep.subr.bf16.mxu1 %v4006_v1 }
0x162e   :  { %v1535_v48 = vpop.permute.xlu1 %1534 }
0x162f   :  { %1538 = vst.msk [vmem:[#allocation5 + $0x1c] sm:$0xf] %vm403_vm3, %v1535_v48 }
0x1636   :  { %v3743_v50 = vld [vmem:[#allocation5 + $0x18] sm:$0xff]  }
0x1637   :  { %3271 = vmatmul.mubr.msk.bf16.gmra.mrb[52].mxu0 %vm247_vm2, %v3743_v50 }
0x1638   :  { %3571 = vmatprep.mubr.msk.bf16.mxu0 %vm4008_vm0, %v4006_v1 }
0x163f   :  { %3572 = vmatmul.mubr.bf16.vlgmr.msra.gmra.mrb[56].mxu0 %v4007_v2 }
0x1640   :  { %3584 = vmatpush3.bf16.msra.mxu0 %v4557_v18  ;;  %3587 = vmatprep.mubr.msk.bf16.mxu0 %vm4008_vm0, %v4006_v1 }
0x1641   :  { %3585 = vmatprep.subr.bf16.mxu0 %v4006_v1 }
0x1644   :  { %3586 = vmatpush3.bf16.msra.mxu0 %v4566_v27 }
0x1645   :  { %3599 = vmatprep.subr.bf16.mxu0 %v4006_v1 }
0x1680   :  { %v4600_v51 = vpop.f32.mrb[40].mxu1 }
0x1681   :  { %v4602_v53 = vpop.f32.mrb[41].mxu1 }
0x1682   :  { %v1661_v14 = vpop.f32.mrb[42].mxu1 }
0x1683   :  { %v1663_v32 = vpop.f32.mrb[43].mxu1 }
0x1688   :  { %v1667_v60 = vpop.f32.mrb[44].mxu1 }
0x1689   :  { %v1669_v55 = vpop.f32.mrb[45].mxu1  ;;  %v1668_v22 = vadd.f32 %v1667_v60, %v1564_v5 }
0x168a   :  { %v1671_v2 = vpop.f32.mrb[46].mxu1  ;;  %v1670_v11 = vadd.f32 %v1669_v55, %v1568_v45 }
0x168b   :  { %v1673_v57 = vpop.f32.mrb[47].mxu1  ;;  %v1672_v20 = vadd.f32 %v1671_v2, %v1564_v5 }
0x168c   :  { %v1674_v49 = vadd.f32 %v1673_v57, %v1568_v45  ;;  %v1662_v57 = vadd.f32 %v1661_v14, %v1564_v5 }
0x1690   :  { %v1677_v59 = vpop.f32.mrb[48].mxu1 }
0x1691   :  { %v1679_v61 = vpop.f32.mrb[49].mxu1  ;;  %v1678_v35 = vadd.f32 %v1677_v59, %v1564_v5  ;;  %v1664_v59 = vadd.f32 %v1663_v32, %v1568_v45 }
0x1692   :  { %v1681_v63 = vpop.f32.mrb[50].mxu1  ;;  %v1680_v26 = vadd.f32 %v1679_v61, %v1568_v45 }
0x1693   :  { %v1683_v38 = vpop.f32.mrb[51].mxu1  ;;  %v1682_v43 = vadd.f32 %v1681_v63, %v1564_v5  ;;  %v1658_v63 = vadd.f32 %v4600_v51, %v1564_v5 }
0x1694   :  { %v1684_v39 = vadd.f32 %v1683_v38, %v1568_v45 }
0x169b   :  { %v1802_v56 = vpop.f32.mrb[40].mxu0 }
0x169c   :  { %v1804_v3 = vpop.f32.mrb[41].mxu0 }
0x169d   :  { %v1806_v4 = vpop.f32.mrb[42].mxu0 }
0x169e   :  { %v1808_v47 = vpop.f32.mrb[43].mxu0 }
0x16a3   :  { %v1812_v36 = vpop.f32.mrb[44].mxu0 }
0x16a4   :  { %v4611_v31 = vadd.f32 %v1812_v36, %v1682_v43  ;;  %v1814_v29 = vpop.f32.mrb[45].mxu0 }
0x16a5   :  { %v4613_v41 = vadd.f32 %v1814_v29, %v1684_v39  ;;  %v1816_v40 = vpop.f32.mrb[46].mxu0 }
0x16a6   :  { %v4615_v37 = vadd.f32 %v1816_v40, %v1678_v35  ;;  %v1818_v28 = vpop.f32.mrb[47].mxu0 }
0x16a7   :  { %v4617_v6 = vadd.f32 %v1818_v28, %v1680_v26 }
0x16ab   :  { %v1822_v19 = vpop.f32.mrb[48].mxu0 }
0x16ac   :  { %v4619_v8 = vadd.f32 %v1822_v19, %v1672_v20  ;;  %v1824_v54 = vpop.f32.mrb[49].mxu0 }
0x16ad   :  { %v4621_v58 = vadd.f32 %v1824_v54, %v1674_v49  ;;  %v1826_v15 = vpop.f32.mrb[50].mxu0 }
0x16ae   :  { %v4623_v17 = vadd.f32 %v1826_v15, %v1668_v22  ;;  %v1828_v23 = vpop.f32.mrb[51].mxu0 }
0x16af   :  { %v4625_v13 = vadd.f32 %v1828_v23, %v1670_v11 }
0x16ef   :  { %v1687_v16 = vpop.f32.mrb[52].mxu1 }
0x16f0   :  { %v1688_v21 = vadd.f32 %v1687_v16, %v1564_v5  ;;  %v1689_v24 = vpop.f32.mrb[53].mxu1 }
0x16f1   :  { %v1690_v7 = vadd.f32 %v1689_v24, %v1568_v45  ;;  %v1691_v30 = vpop.f32.mrb[54].mxu1 }
0x16f2   :  { %v1692_v33 = vadd.f32 %v1691_v30, %v1564_v5  ;;  %v1693_v44 = vpop.f32.mrb[55].mxu1  ;;  %v4627_v9 = vadd.f32 %v1806_v4, %v1688_v21  ;;  %v1660_v4 = vadd.f32 %v4602_v53, %v1568_v45 }
0x16f3   :  { %v1694_v46 = vadd.f32 %v1693_v44, %v1568_v45  ;;  %v4629_v12 = vadd.f32 %v1808_v47, %v1690_v7 }
0x16f4   :  { %v4631_v0 = vadd.f32 %v1802_v56, %v1692_v33 }
0x16f5   :  { %v1980_v48 = vadd.f32 %v1804_v3, %v1694_v46 }
0x16f7   :  { %v1912_v50 = vpop.f32.mrb[56].mxu1 }
0x16f8   :  { %v3565_v60 = vpop.f32.mrb[57].mxu1 }
0x16f9   :  { %v1915_v55 = vpop.f32.mrb[58].mxu1 }
0x16fa   :  { %v3566_v2 = vpop.f32.mrb[59].mxu1 }
0x170a   :  { %v1832_v61 = vpop.f32.mrb[52].mxu0 }
0x170b   :  { %v4634_v38 = vadd.f32 %v1832_v61, %v1662_v57  ;;  %v1834_v52 = vpop.f32.mrb[53].mxu0 }
0x170c   :  { %v4637_v43 = vadd.f32 %v1834_v52, %v1664_v59  ;;  %v1836_v47 = vpop.f32.mrb[54].mxu0 }
0x170d   :  { %v1979_v56 = vadd.f32 %v1836_v47, %v1658_v63  ;;  %v1838_v39 = vpop.f32.mrb[55].mxu0 }
0x170e   :  { %v4639_v3 = vadd.f32 %v1838_v39, %v1660_v4 }
0x170f   :  { %v1981_v36 = vadd.f32 %v1979_v56, %v1912_v50 }
0x1711   :  { %3874 = vtanh.f32 %v1981_v36  ;;  %v3280_v53 = vmul.f32 -1.442695, %v1981_v36 }
0x1712   :  { %v1964_v35 = vpop.f32.mrb[56].mxu0 }
0x1713   :  { %v1982_v14 = vadd.f32 %v1980_v48, %v1964_v35  ;;  %v3573_v32 = vpop.f32.mrb[57].mxu0 }
0x1714   :  { %v1967_v29 = vpop.f32.mrb[58].mxu0 }
0x1715   :  { %3876 = vtanh.f32 %v1982_v14  ;;  %v3574_v51 = vpop.f32.mrb[59].mxu0  ;;  %v3281_v45 = vmul.f32 -1.442695, %v1982_v14 }
0x1716   :  { %3878 = vpow2.f32 %v3280_v53 }
0x1717   :  { %3880 = vpow2.f32 %v3281_v45 }
0x171b   :  { %v3875_v5 = vpop.eup %3874 }
0x171c   :  { %1999 = vrot.lane.b32.xlu0 %v3875_v5, %s4009_s0 }
0x171f   :  { %v3877_v26 = vpop.eup %3876 }
0x1720   :  { %2010 = vrot.lane.b32.xlu1 %v3877_v26, %s4009_s0  ;;  %v3879_v40 = vpop.eup %3878 }
0x1721   :  { %v1986_v28 = vadd.f32 1.0, %v3879_v40  ;;  %v3881_v20 = vpop.eup %3880 }
0x1722   :  { %v1993_v49 = vadd.f32 1.0, %v3881_v20 }
0x1723   :  { %3882 = vrcp.f32 %v1986_v28 }
0x1724   :  { %3884 = vrcp.f32 %v1993_v49 }
0x172d   :  { %v3883_v19 = vpop.eup %3882 }
0x172e   :  { %v3885_v11 = vpop.eup %3884  ;;  %v1997_v16 = vmul.f32 0.0, %v3883_v19 }
0x172f   :  { %v2008_v7 = vmul.f32 0.0, %v3885_v11 }
0x178e   :  { %v2000_v22 = vpop.permute.xlu0 %1999 }
0x178f   :  { %v2002_v54 = vmul.f32 %v3883_v19, %v2000_v22 }
0x1791   :  { %2004 = vrot.lane.b32.xlu0 %v2002_v54, %s4009_s0 }
0x1792   :  { %v2011_v15 = vpop.permute.xlu1 %2010 }
0x1793   :  { %v2013_v23 = vmul.f32 %v3885_v11, %v2011_v15 }
0x1795   :  { %2015 = vrot.lane.b32.xlu1 %v2013_v23, %s4009_s0 }
0x1803   :  { %v2005_v21 = vpop.permute.xlu0 %2004 }
0x1804   :  { %v4645_v24 = vadd.f32 %v2005_v21, %v1997_v16 }
0x1806   :  { %3886 = vtanh.f32 %v4645_v24 }
0x1807   :  { %v2016_v30 = vpop.permute.xlu1 %2015 }
0x1808   :  { %v4648_v33 = vadd.f32 %v2016_v30, %v2008_v7 }
0x180a   :  { %3888 = vtanh.f32 %v4648_v33 }
0x1810   :  { %v3887_v44 = vpop.eup %3886 }
0x1811   :  { %2021 = vrot.lane.b32.xlu0 %v3887_v44, %s4009_s0 }
0x1814   :  { %v3889_v46 = vpop.eup %3888 }
0x1815   :  { %2027 = vrot.lane.b32.xlu1 %v3889_v46, %s4009_s0 }
0x1883   :  { %v2022_v48 = vpop.permute.xlu0 %2021 }
0x1884   :  { %v2024_v50 = vmul.f32 %v3883_v19, %v2022_v48 }
0x1886   :  { %v2031_v60 = vpack.c.bf16 %v2024_v50, %v2024_v50 }
0x1887   :  { %v2028_v55 = vpop.permute.xlu1 %2027 }
0x1888   :  { %v2030_v2 = vmul.f32 %v3885_v11, %v2028_v55  ;;  %2033 = vrot.lane.b32.xlu0 %v2031_v60, %s4010_s3 }
0x188a   :  { %v2078_v57 = vpack.c.bf16 %v2030_v2, %v2030_v2 }
0x188c   :  { %2080 = vrot.lane.b32.xlu1 %v2078_v57, %s4010_s3 }
0x18fa   :  { %v2034_v59 = vpop.permute.xlu0 %2033 }
0x18fb   :  { %3580 = vmatmul.mubr.msk.bf16.vlgmr.msra.gmra.mrb[60].mxu1 %vm247_vm2, %v2034_v59 }
0x18fc   :  { %3592 = vmatpush3.bf16.msra.mxu1 %v4522_v25  ;;  %3595 = vmatprep.mubr.msk.bf16.mxu1 %vm4008_vm0, %v4006_v1 }
0x18fd   :  { %3593 = vmatprep.subr.bf16.mxu1 %v4006_v1 }
0x18fe   :  { %v2081_v61 = vpop.permute.xlu1 %2080 }
0x18ff   :  { %3588 = vmatmul.mubr.msk.bf16.vlgmr.msra.gmra.mrb[60].mxu0 %vm247_vm2, %v2081_v61 }
0x1900   :  { %3600 = vmatpush3.bf16.msra.mxu0 %v4557_v18  ;;  %3594 = vmatpush3.bf16.msra.mxu1 %v4531_v34 }
0x1901   :  { %3601 = vmatprep.subr.bf16.mxu0 %v4006_v1  ;;  %3603 = vmatprep.mubr.msk.bf16.mxu0 %vm4008_vm0, %v4006_v1 }
0x1902   :  { %3607 = vmatprep.subr.bf16.mxu1 %v4006_v1 }
0x1904   :  { %3602 = vmatpush3.bf16.msra.mxu0 %v4566_v27 }
0x1905   :  { %3615 = vmatprep.subr.bf16.mxu0 %v4006_v1 }
0x19ce   :  { %v2072_v63 = vpop.f32.mrb[60].mxu1 }
0x19cf   :  { %v2137_v52 = vadd.f32 %v4634_v38, %v2072_v63  ;;  %v3581_v4 = vpop.f32.mrb[61].mxu1 }
0x19d0   :  { %v2075_v47 = vpop.f32.mrb[62].mxu1 }
0x19d1   :  { %3890 = vtanh.f32 %v2137_v52  ;;  %v3582_v56 = vpop.f32.mrb[63].mxu1  ;;  %v3284_v5 = vmul.f32 -1.442695, %v2137_v52 }
0x19d2   :  { %v2119_v39 = vpop.f32.mrb[60].mxu0 }
0x19d3   :  { %v2138_v36 = vadd.f32 %v4629_v12, %v2119_v39  ;;  %v3589_v35 = vpop.f32.mrb[61].mxu0 }
0x19d4   :  { %v2122_v14 = vpop.f32.mrb[62].mxu0 }
0x19d5   :  { %3892 = vtanh.f32 %v2138_v36  ;;  %v3590_v32 = vpop.f32.mrb[63].mxu0  ;;  %v3285_v38 = vmul.f32 -1.442695, %v2138_v36 }
0x19d6   :  { %3894 = vpow2.f32 %v3284_v5 }
0x19d7   :  { %3896 = vpow2.f32 %v3285_v38 }
0x19db   :  { %v3891_v29 = vpop.eup %3890 }
0x19dc   :  { %2155 = vrot.lane.b32.xlu0 %v3891_v29, %s4009_s0 }
0x19df   :  { %v3893_v51 = vpop.eup %3892 }
0x19e0   :  { %2166 = vrot.lane.b32.xlu1 %v3893_v51, %s4009_s0  ;;  %v3895_v26 = vpop.eup %3894 }
0x19e1   :  { %v2142_v53 = vadd.f32 1.0, %v3895_v26  ;;  %v3897_v45 = vpop.eup %3896 }
0x19e2   :  { %v2149_v40 = vadd.f32 1.0, %v3897_v45 }
0x19e3   :  { %3898 = vrcp.f32 %v2142_v53 }
0x19e4   :  { %3900 = vrcp.f32 %v2149_v40 }
0x19ed   :  { %v3899_v12 = vpop.eup %3898 }
0x19ee   :  { %v3901_v49 = vpop.eup %3900  ;;  %v2153_v54 = vmul.f32 %v3899_v12, %v4645_v24 }
0x19ef   :  { %v2164_v23 = vmul.f32 %v3901_v49, %v4648_v33 }
0x1a4e   :  { %v2156_v28 = vpop.permute.xlu0 %2155 }
0x1a4f   :  { %v2158_v20 = vmul.f32 %v3899_v12, %v2156_v28 }
0x1a51   :  { %2160 = vrot.lane.b32.xlu0 %v2158_v20, %s4009_s0 }
0x1a52   :  { %v2167_v19 = vpop.permute.xlu1 %2166 }
0x1a53   :  { %v2169_v22 = vmul.f32 %v3901_v49, %v2167_v19 }
0x1a55   :  { %2171 = vrot.lane.b32.xlu1 %v2169_v22, %s4009_s0 }
0x1ac3   :  { %v2161_v11 = vpop.permute.xlu0 %2160 }
0x1ac4   :  { %v4676_v15 = vadd.f32 %v2161_v11, %v2153_v54 }
0x1ac6   :  { %3902 = vtanh.f32 %v4676_v15 }
0x1ac7   :  { %v2172_v16 = vpop.permute.xlu1 %2171 }
0x1ac8   :  { %v4680_v21 = vadd.f32 %v2172_v16, %v2164_v23 }
0x1aca   :  { %3904 = vtanh.f32 %v4680_v21 }
0x1ad0   :  { %v3903_v7 = vpop.eup %3902 }
0x1ad1   :  { %2177 = vrot.lane.b32.xlu0 %v3903_v7, %s4009_s0 }
0x1ad4   :  { %v3905_v30 = vpop.eup %3904 }
0x1ad5   :  { %2183 = vrot.lane.b32.xlu1 %v3905_v30, %s4009_s0 }
0x1b43   :  { %v2178_v44 = vpop.permute.xlu0 %2177 }
0x1b44   :  { %v2180_v24 = vmul.f32 %v3899_v12, %v2178_v44 }
0x1b46   :  { %v2187_v46 = vpack.c.bf16 %v2180_v24, %v2180_v24 }
0x1b47   :  { %v2184_v48 = vpop.permute.xlu1 %2183 }
0x1b48   :  { %v2186_v50 = vmul.f32 %v3901_v49, %v2184_v48  ;;  %2189 = vrot.lane.b32.xlu0 %v2187_v46, %s4010_s3 }
0x1b4a   :  { %v2234_v60 = vpack.c.bf16 %v2186_v50, %v2186_v50 }
0x1b4c   :  { %2236 = vrot.lane.b32.xlu1 %v2234_v60, %s4010_s3 }
0x1bba   :  { %v2190_v33 = vpop.permute.xlu0 %2189 }
0x1bbb   :  { %3596 = vmatmul.mubr.msk.bf16.vlgmr.msra.gmra.mrb[64].mxu1 %vm247_vm2, %v2190_v33 }
0x1bbc   :  { %3608 = vmatpush3.bf16.msra.mxu1 %v4522_v25  ;;  %3611 = vmatprep.mubr.msk.bf16.mxu1 %vm4008_vm0, %v4006_v1 }
0x1bbd   :  { %3609 = vmatprep.subr.bf16.mxu1 %v4006_v1 }
0x1bbe   :  { %v2237_v55 = vpop.permute.xlu1 %2236 }
0x1bbf   :  { %3604 = vmatmul.mubr.msk.bf16.vlgmr.msra.gmra.mrb[64].mxu0 %vm247_vm2, %v2237_v55 }
0x1bc0   :  { %3616 = vmatpush3.bf16.msra.mxu0 %v4557_v18  ;;  %3610 = vmatpush3.bf16.msra.mxu1 %v4531_v34 }
0x1bc1   :  { %3617 = vmatprep.subr.bf16.mxu0 %v4006_v1  ;;  %3619 = vmatprep.mubr.msk.bf16.mxu0 %vm4008_vm0, %v4006_v1 }
0x1bc2   :  { %3623 = vmatprep.subr.bf16.mxu1 %v4006_v1 }
0x1bc4   :  { %3618 = vmatpush3.bf16.msra.mxu0 %v4566_v27 }
0x1bc5   :  { %3631 = vmatprep.subr.bf16.mxu0 %v4006_v1 }
0x1c8e   :  { %v2228_v2 = vpop.f32.mrb[64].mxu1 }
0x1c8f   :  { %v2293_v57 = vadd.f32 %v4623_v17, %v2228_v2  ;;  %v3597_v59 = vpop.f32.mrb[65].mxu1 }
0x1c90   :  { %v2231_v61 = vpop.f32.mrb[66].mxu1 }
0x1c91   :  { %3906 = vtanh.f32 %v2293_v57  ;;  %v3598_v63 = vpop.f32.mrb[67].mxu1  ;;  %v3288_v14 = vmul.f32 -1.442695, %v2293_v57 }
0x1c92   :  { %v2275_v52 = vpop.f32.mrb[64].mxu0 }
0x1c93   :  { %v2294_v4 = vadd.f32 %v4613_v41, %v2275_v52  ;;  %v3605_v47 = vpop.f32.mrb[65].mxu0 }
0x1c94   :  { %v2278_v56 = vpop.f32.mrb[66].mxu0 }
0x1c95   :  { %3908 = vtanh.f32 %v2294_v4  ;;  %v3606_v39 = vpop.f32.mrb[67].mxu0  ;;  %v3289_v17 = vmul.f32 -1.442695, %v2294_v4 }
0x1c96   :  { %3910 = vpow2.f32 %v3288_v14 }
0x1c97   :  { %3912 = vpow2.f32 %v3289_v17 }
0x1c9b   :  { %v3907_v36 = vpop.eup %3906 }
0x1c9c   :  { %2311 = vrot.lane.b32.xlu0 %v3907_v36, %s4009_s0 }
0x1c9f   :  { %v3909_v35 = vpop.eup %3908 }
0x1ca0   :  { %2322 = vrot.lane.b32.xlu1 %v3909_v35, %s4009_s0  ;;  %v3911_v32 = vpop.eup %3910 }
0x1ca1   :  { %v2298_v29 = vadd.f32 1.0, %v3911_v32  ;;  %v3913_v51 = vpop.eup %3912 }
0x1ca2   :  { %v2305_v5 = vadd.f32 1.0, %v3913_v51 }
0x1ca3   :  { %3914 = vrcp.f32 %v2298_v29 }
0x1ca4   :  { %3916 = vrcp.f32 %v2305_v5 }
0x1cad   :  { %v3915_v41 = vpop.eup %3914 }
0x1cae   :  { %v3917_v53 = vpop.eup %3916  ;;  %v2309_v12 = vmul.f32 %v3915_v41, %v4676_v15 }
0x1caf   :  { %v2320_v49 = vmul.f32 %v3917_v53, %v4680_v21 }
0x1d0e   :  { %v2312_v38 = vpop.permute.xlu0 %2311 }
0x1d0f   :  { %v2314_v26 = vmul.f32 %v3915_v41, %v2312_v38 }
0x1d11   :  { %2316 = vrot.lane.b32.xlu0 %v2314_v26, %s4009_s0 }
0x1d12   :  { %v2323_v45 = vpop.permute.xlu1 %2322 }
0x1d13   :  { %v2325_v40 = vmul.f32 %v3917_v53, %v2323_v45 }
0x1d15   :  { %2327 = vrot.lane.b32.xlu1 %v2325_v40, %s4009_s0 }
0x1d83   :  { %v2317_v28 = vpop.permute.xlu0 %2316 }
0x1d84   :  { %v4708_v20 = vadd.f32 %v2317_v28, %v2309_v12 }
0x1d86   :  { %3918 = vtanh.f32 %v4708_v20 }
0x1d87   :  { %v2328_v19 = vpop.permute.xlu1 %2327 }
0x1d88   :  { %v4712_v22 = vadd.f32 %v2328_v19, %v2320_v49 }
0x1d8a   :  { %3920 = vtanh.f32 %v4712_v22 }
0x1d90   :  { %v3919_v54 = vpop.eup %3918 }
0x1d91   :  { %2333 = vrot.lane.b32.xlu0 %v3919_v54, %s4009_s0 }
0x1d94   :  { %v3921_v11 = vpop.eup %3920 }
0x1d95   :  { %2339 = vrot.lane.b32.xlu1 %v3921_v11, %s4009_s0 }
0x1e03   :  { %v2334_v23 = vpop.permute.xlu0 %2333 }
0x1e04   :  { %v2336_v15 = vmul.f32 %v3915_v41, %v2334_v23 }
0x1e06   :  { %v2343_v16 = vpack.c.bf16 %v2336_v15, %v2336_v15 }
0x1e07   :  { %v2340_v7 = vpop.permute.xlu1 %2339 }
0x1e08   :  { %v2342_v30 = vmul.f32 %v3917_v53, %v2340_v7  ;;  %2345 = vrot.lane.b32.xlu0 %v2343_v16, %s4010_s3 }
0x1e0a   :  { %v2390_v44 = vpack.c.bf16 %v2342_v30, %v2342_v30 }
0x1e0c   :  { %2392 = vrot.lane.b32.xlu1 %v2390_v44, %s4010_s3 }
0x1e7a   :  { %v2346_v21 = vpop.permute.xlu0 %2345 }
0x1e7b   :  { %3612 = vmatmul.mubr.msk.bf16.vlgmr.msra.gmra.mrb[68].mxu1 %vm247_vm2, %v2346_v21 }
0x1e7c   :  { %3624 = vmatpush3.bf16.msra.mxu1 %v4522_v25  ;;  %3627 = vmatprep.mubr.msk.bf16.mxu1 %vm4008_vm0, %v4006_v1 }
0x1e7d   :  { %3625 = vmatprep.subr.bf16.mxu1 %v4006_v1 }
0x1e7e   :  { %v2393_v24 = vpop.permute.xlu1 %2392 }
0x1e7f   :  { %3620 = vmatmul.mubr.msk.bf16.vlgmr.msra.gmra.mrb[68].mxu0 %vm247_vm2, %v2393_v24 }
0x1e80   :  { %3632 = vmatpush3.bf16.msra.mxu0 %v4557_v18  ;;  %3626 = vmatpush3.bf16.msra.mxu1 %v4531_v34 }
0x1e81   :  { %3633 = vmatprep.subr.bf16.mxu0 %v4006_v1  ;;  %3635 = vmatprep.mubr.msk.bf16.mxu0 %vm4008_vm0, %v4006_v1 }
0x1e82   :  { %3639 = vmatprep.subr.bf16.mxu1 %v4006_v1 }
0x1e84   :  { %3634 = vmatpush3.bf16.msra.mxu0 %v4566_v27 }
0x1e85   :  { %3647 = vmatprep.subr.bf16.mxu0 %v4006_v1 }
0x1f4e   :  { %v2384_v46 = vpop.f32.mrb[68].mxu1 }
0x1f4f   :  { %v2449_v48 = vadd.f32 %v4619_v8, %v2384_v46  ;;  %v3613_v50 = vpop.f32.mrb[69].mxu1 }
0x1f50   :  { %v2387_v60 = vpop.f32.mrb[70].mxu1 }
0x1f51   :  { %3922 = vtanh.f32 %v2449_v48  ;;  %v3614_v33 = vpop.f32.mrb[71].mxu1  ;;  %v3292_v4 = vmul.f32 -1.442695, %v2449_v48 }
0x1f52   :  { %v2431_v55 = vpop.f32.mrb[68].mxu0 }
0x1f53   :  { %v2450_v2 = vadd.f32 %v4617_v6, %v2431_v55  ;;  %v3621_v57 = vpop.f32.mrb[69].mxu0 }
0x1f54   :  { %v2434_v59 = vpop.f32.mrb[70].mxu0 }
0x1f55   :  { %3924 = vtanh.f32 %v2450_v2  ;;  %v3622_v61 = vpop.f32.mrb[71].mxu0  ;;  %v3293_v8 = vmul.f32 -1.442695, %v2450_v2 }
0x1f56   :  { %3926 = vpow2.f32 %v3292_v4 }
0x1f57   :  { %3928 = vpow2.f32 %v3293_v8 }
0x1f5b   :  { %v3923_v63 = vpop.eup %3922 }
0x1f5c   :  { %2467 = vrot.lane.b32.xlu0 %v3923_v63, %s4009_s0 }
0x1f5f   :  { %v3925_v52 = vpop.eup %3924 }
0x1f60   :  { %2478 = vrot.lane.b32.xlu1 %v3925_v52, %s4009_s0  ;;  %v3927_v47 = vpop.eup %3926 }
0x1f61   :  { %v2454_v56 = vadd.f32 1.0, %v3927_v47  ;;  %v3929_v39 = vpop.eup %3928 }
0x1f62   :  { %v2461_v36 = vadd.f32 1.0, %v3929_v39 }
0x1f63   :  { %3930 = vrcp.f32 %v2454_v56 }
0x1f64   :  { %3932 = vrcp.f32 %v2461_v36 }
0x1f6d   :  { %v3931_v6 = vpop.eup %3930 }
0x1f6e   :  { %v3933_v17 = vpop.eup %3932  ;;  %v2465_v51 = vmul.f32 %v3931_v6, %v4708_v20 }
0x1f6f   :  { %v2476_v38 = vmul.f32 %v3933_v17, %v4712_v22 }
0x1fce   :  { %v2468_v35 = vpop.permute.xlu0 %2467 }
0x1fcf   :  { %v2470_v14 = vmul.f32 %v3931_v6, %v2468_v35 }
0x1fd1   :  { %2472 = vrot.lane.b32.xlu0 %v2470_v14, %s4009_s0 }
0x1fd2   :  { %v2479_v32 = vpop.permute.xlu1 %2478 }
0x1fd3   :  { %v2481_v29 = vmul.f32 %v3933_v17, %v2479_v32 }
0x1fd5   :  { %2483 = vrot.lane.b32.xlu1 %v2481_v29, %s4009_s0 }
0x2043   :  { %v2473_v5 = vpop.permute.xlu0 %2472 }
0x2044   :  { %v4740_v41 = vadd.f32 %v2473_v5, %v2465_v51 }
0x2046   :  { %3934 = vtanh.f32 %v4740_v41 }
0x2047   :  { %v2484_v26 = vpop.permute.xlu1 %2483 }
0x2048   :  { %v4744_v53 = vadd.f32 %v2484_v26, %v2476_v38 }
0x204a   :  { %3936 = vtanh.f32 %v4744_v53 }
0x2050   :  { %v3935_v45 = vpop.eup %3934 }
0x2051   :  { %2489 = vrot.lane.b32.xlu0 %v3935_v45, %s4009_s0 }
0x2054   :  { %v3937_v40 = vpop.eup %3936 }
0x2055   :  { %2495 = vrot.lane.b32.xlu1 %v3937_v40, %s4009_s0 }
0x20c3   :  { %v2490_v12 = vpop.permute.xlu0 %2489 }
0x20c4   :  { %v2492_v28 = vmul.f32 %v3931_v6, %v2490_v12 }
0x20c6   :  { %v2499_v20 = vpack.c.bf16 %v2492_v28, %v2492_v28 }
0x20c7   :  { %v2496_v49 = vpop.permute.xlu1 %2495 }
0x20c8   :  { %v2498_v19 = vmul.f32 %v3933_v17, %v2496_v49  ;;  %2501 = vrot.lane.b32.xlu0 %v2499_v20, %s4010_s3 }
0x20ca   :  { %v2546_v54 = vpack.c.bf16 %v2498_v19, %v2498_v19 }
0x20cc   :  { %2548 = vrot.lane.b32.xlu1 %v2546_v54, %s4010_s3 }
0x213a   :  { %v2502_v22 = vpop.permute.xlu0 %2501 }
0x213b   :  { %3628 = vmatmul.mubr.msk.bf16.vlgmr.msra.gmra.mrb[72].mxu1 %vm247_vm2, %v2502_v22 }
0x213c   :  { %3640 = vmatpush3.bf16.msra.mxu1 %v4522_v25  ;;  %3643 = vmatprep.mubr.msk.bf16.mxu1 %vm4008_vm0, %v4006_v1 }
0x213d   :  { %3641 = vmatprep.subr.bf16.mxu1 %v4006_v1 }
0x213e   :  { %v2549_v11 = vpop.permute.xlu1 %2548 }
0x213f   :  { %3636 = vmatmul.mubr.msk.bf16.vlgmr.msra.gmra.mrb[72].mxu0 %vm247_vm2, %v2549_v11 }
0x2140   :  { %3648 = vmatpush3.bf16.msra.mxu0 %v4557_v18  ;;  %3642 = vmatpush3.bf16.msra.mxu1 %v4531_v34 }
0x2141   :  { %3649 = vmatprep.subr.bf16.mxu0 %v4006_v1  ;;  %3651 = vmatprep.mubr.msk.bf16.mxu0 %vm4008_vm0, %v4006_v1 }
0x2142   :  { %3655 = vmatprep.subr.bf16.mxu1 %v4006_v1 }
0x2144   :  { %3650 = vmatpush3.bf16.msra.mxu0 %v4566_v27 }
0x2145   :  { %3663 = vmatprep.subr.bf16.mxu0 %v4006_v1 }
0x220e   :  { %v2540_v23 = vpop.f32.mrb[72].mxu1 }
0x220f   :  { %v2595_v15 = vadd.f32 %v4615_v37, %v2540_v23  ;;  %v3629_v16 = vpop.f32.mrb[73].mxu1 }
0x2210   :  { %v2543_v7 = vpop.f32.mrb[74].mxu1 }
0x2211   :  { %3938 = vtanh.f32 %v2595_v15  ;;  %v3630_v30 = vpop.f32.mrb[75].mxu1  ;;  %v3296_v33 = vmul.f32 -1.442695, %v2595_v15 }
0x2212   :  { %v2587_v44 = vpop.f32.mrb[72].mxu0 }
0x2213   :  { %v2596_v21 = vadd.f32 %v4621_v58, %v2587_v44  ;;  %v3637_v24 = vpop.f32.mrb[73].mxu0 }
0x2214   :  { %v2590_v46 = vpop.f32.mrb[74].mxu0 }
0x2215   :  { %3940 = vtanh.f32 %v2596_v21  ;;  %v3638_v48 = vpop.f32.mrb[75].mxu0  ;;  %v3297_v37 = vmul.f32 -1.442695, %v2596_v21 }
0x2216   :  { %3942 = vpow2.f32 %v3296_v33 }
0x2217   :  { %3944 = vpow2.f32 %v3297_v37 }
0x221b   :  { %v3939_v50 = vpop.eup %3938 }
0x221c   :  { %2613 = vrot.lane.b32.xlu0 %v3939_v50, %s4009_s0 }
0x221f   :  { %v3941_v60 = vpop.eup %3940 }
0x2220   :  { %2624 = vrot.lane.b32.xlu1 %v3941_v60, %s4009_s0  ;;  %v3943_v55 = vpop.eup %3942 }
0x2221   :  { %v2600_v2 = vadd.f32 1.0, %v3943_v55  ;;  %v3945_v57 = vpop.eup %3944 }
0x2222   :  { %v2607_v59 = vadd.f32 1.0, %v3945_v57 }
0x2223   :  { %3946 = vrcp.f32 %v2600_v2 }
0x2224   :  { %3948 = vrcp.f32 %v2607_v59 }
0x222d   :  { %v3947_v58 = vpop.eup %3946 }
0x222e   :  { %v3949_v52 = vpop.eup %3948  ;;  %v2611_v47 = vmul.f32 %v3947_v58, %v4740_v41 }
0x222f   :  { %v2622_v36 = vmul.f32 %v3949_v52, %v4744_v53 }
0x228e   :  { %v2614_v61 = vpop.permute.xlu0 %2613 }
0x228f   :  { %v2616_v63 = vmul.f32 %v3947_v58, %v2614_v61 }
0x2291   :  { %2618 = vrot.lane.b32.xlu0 %v2616_v63, %s4009_s0 }
0x2292   :  { %v2625_v4 = vpop.permute.xlu1 %2624 }
0x2293   :  { %v2627_v8 = vmul.f32 %v3949_v52, %v2625_v4 }
0x2295   :  { %2629 = vrot.lane.b32.xlu1 %v2627_v8, %s4009_s0  ;;  %v4002_v8 = vld [vmem:[%s4891_s6] sm:$0xff]  }
0x2303   :  { %v2619_v56 = vpop.permute.xlu0 %2618 }
0x2304   :  { %v4772_v39 = vadd.f32 %v2619_v56, %v2611_v47  ;;  %v4003_v56 = vld [vmem:[%s4891_s6 + $0x10] sm:$0xff]  }
0x2306   :  { %3950 = vtanh.f32 %v4772_v39 }
0x2307   :  { %v2630_v6 = vpop.permute.xlu1 %2629 }
0x2308   :  { %v4776_v35 = vadd.f32 %v2630_v6, %v2622_v36  ;;  %v4005_v36 = vld [vmem:[%s4891_s6 + $0x18] sm:$0xff]  }
0x230a   :  { %3952 = vtanh.f32 %v4776_v35 }
0x2310   :  { %v3951_v14 = vpop.eup %3950 }
0x2311   :  { %2635 = vrot.lane.b32.xlu0 %v3951_v14, %s4009_s0 }
0x2314   :  { %v3953_v17 = vpop.eup %3952 }
0x2315   :  { %2641 = vrot.lane.b32.xlu1 %v3953_v17, %s4009_s0 }
0x2383   :  { %v2636_v32 = vpop.permute.xlu0 %2635 }
0x2384   :  { %v2638_v29 = vmul.f32 %v3947_v58, %v2636_v32 }
0x2386   :  { %v2645_v51 = vpack.c.bf16 %v2638_v29, %v2638_v29 }
0x2387   :  { %v2642_v5 = vpop.permute.xlu1 %2641 }
0x2388   :  { %v2644_v41 = vmul.f32 %v3949_v52, %v2642_v5  ;;  %2647 = vrot.lane.b32.xlu0 %v2645_v51, %s4010_s3 }
0x238a   :  { %v2692_v38 = vpack.c.bf16 %v2644_v41, %v2644_v41 }
0x238c   :  { %2694 = vrot.lane.b32.xlu1 %v2692_v38, %s4010_s3 }
0x23fa   :  { %v2648_v26 = vpop.permute.xlu0 %2647 }
0x23fb   :  { %3644 = vmatmul.mubr.msk.bf16.vlgmr.msra.gmra.mrb[76].mxu1 %vm247_vm2, %v2648_v26 }
0x23fc   :  { %3656 = vmatpush3.bf16.msra.mxu1 %v4522_v25  ;;  %3659 = vmatprep.mubr.msk.bf16.mxu1 %vm4008_vm0, %v4006_v1 }
0x23fd   :  { %3657 = vmatprep.subr.bf16.mxu1 %v4006_v1 }
0x23fe   :  { %v2695_v53 = vpop.permute.xlu1 %2694 }
0x23ff   :  { %3652 = vmatmul.mubr.msk.bf16.vlgmr.msra.gmra.mrb[76].mxu0 %vm247_vm2, %v2695_v53 }
0x2400   :  { %3664 = vmatpush3.bf16.msra.mxu0 %v4557_v18  ;;  %3658 = vmatpush3.bf16.msra.mxu1 %v4531_v34 }
0x2401   :  { %3665 = vmatprep.subr.bf16.mxu0 %v4006_v1  ;;  %3667 = vmatprep.mubr.msk.bf16.mxu0 %vm4008_vm0, %v4006_v1 }
0x2402   :  { %3671 = vmatprep.subr.bf16.mxu1 %v4006_v1 }
0x2404   :  { %3666 = vmatpush3.bf16.msra.mxu0 %v4566_v27 }
0x2405   :  { %3679 = vmatprep.subr.bf16.mxu0 %v4006_v1 }
0x24ce   :  { %v2686_v25 = vpop.f32.mrb[76].mxu1 }
0x24cf   :  { %v2741_v45 = vadd.f32 %v4611_v31, %v2686_v25  ;;  %v3645_v40 = vpop.f32.mrb[77].mxu1 }
0x24d0   :  { %v2689_v12 = vpop.f32.mrb[78].mxu1 }
0x24d1   :  { %3954 = vtanh.f32 %v2741_v45  ;;  %v3646_v18 = vpop.f32.mrb[79].mxu1  ;;  %v3300_v22 = vmul.f32 -1.442695, %v2741_v45 }
0x24d2   :  { %v2733_v28 = vpop.f32.mrb[76].mxu0 }
0x24d3   :  { %v2742_v34 = vadd.f32 %v4625_v13, %v2733_v28  ;;  %v3653_v20 = vpop.f32.mrb[77].mxu0 }
0x24d4   :  { %v2736_v49 = vpop.f32.mrb[78].mxu0 }
0x24d5   :  { %3956 = vtanh.f32 %v2742_v34  ;;  %v3654_v19 = vpop.f32.mrb[79].mxu0  ;;  %v3301_v31 = vmul.f32 -1.442695, %v2742_v34 }
0x24d6   :  { %3958 = vpow2.f32 %v3300_v22 }
0x24d7   :  { %3960 = vpow2.f32 %v3301_v31 }
0x24db   :  { %v3955_v54 = vpop.eup %3954 }
0x24dc   :  { %2759 = vrot.lane.b32.xlu0 %v3955_v54, %s4009_s0 }
0x24df   :  { %v3957_v27 = vpop.eup %3956 }
0x24e0   :  { %2770 = vrot.lane.b32.xlu1 %v3957_v27, %s4009_s0  ;;  %v3959_v11 = vpop.eup %3958 }
0x24e1   :  { %v2746_v23 = vadd.f32 1.0, %v3959_v11  ;;  %v3961_v15 = vpop.eup %3960 }
0x24e2   :  { %v2753_v16 = vadd.f32 1.0, %v3961_v15 }
0x24e3   :  { %3962 = vrcp.f32 %v2746_v23 }
0x24e4   :  { %3964 = vrcp.f32 %v2753_v16 }
0x24ed   :  { %v3963_v13 = vpop.eup %3962 }
0x24ee   :  { %v3965_v44 = vpop.eup %3964  ;;  %v2757_v46 = vmul.f32 %v3963_v13, %v4772_v39  ;;  %v4004_v39 = vld [vmem:[%s4891_s6 + $0x8] sm:$0xff]  }
0x24ef   :  { %v2768_v60 = vmul.f32 %v3965_v44, %v4776_v35 }
0x254e   :  { %v2760_v7 = vpop.permute.xlu0 %2759 }
0x254f   :  { %v2762_v30 = vmul.f32 %v3963_v13, %v2760_v7 }
0x2551   :  { %2764 = vrot.lane.b32.xlu0 %v2762_v30, %s4009_s0 }
0x2552   :  { %v2771_v21 = vpop.permute.xlu1 %2770 }
0x2553   :  { %v2773_v24 = vmul.f32 %v3965_v44, %v2771_v21 }
0x2555   :  { %2775 = vrot.lane.b32.xlu1 %v2773_v24, %s4009_s0 }
0x25c3   :  { %v2765_v48 = vpop.permute.xlu0 %2764 }
0x25c4   :  { %v4804_v50 = vadd.f32 %v2765_v48, %v2757_v46 }
0x25c6   :  { %3966 = vtanh.f32 %v4804_v50 }
0x25c7   :  { %v2776_v33 = vpop.permute.xlu1 %2775 }
0x25c8   :  { %v4808_v37 = vadd.f32 %v2776_v33, %v2768_v60 }
0x25ca   :  { %3968 = vtanh.f32 %v4808_v37 }
0x25d0   :  { %v3967_v55 = vpop.eup %3966 }
0x25d1   :  { %2781 = vrot.lane.b32.xlu0 %v3967_v55, %s4009_s0 }
0x25d4   :  { %v3969_v2 = vpop.eup %3968 }
0x25d5   :  { %2787 = vrot.lane.b32.xlu1 %v3969_v2, %s4009_s0 }
0x2643   :  { %v2782_v57 = vpop.permute.xlu0 %2781 }
0x2644   :  { %v2784_v59 = vmul.f32 %v3963_v13, %v2782_v57 }
0x2646   :  { %v2791_v58 = vpack.c.bf16 %v2784_v59, %v2784_v59 }
0x2647   :  { %v2788_v61 = vpop.permute.xlu1 %2787 }
0x2648   :  { %v2790_v63 = vmul.f32 %v3965_v44, %v2788_v61  ;;  %2793 = vrot.lane.b32.xlu0 %v2791_v58, %s4010_s3 }
0x264a   :  { %v2838_v52 = vpack.c.bf16 %v2790_v63, %v2790_v63 }
0x264c   :  { %2840 = vrot.lane.b32.xlu1 %v2838_v52, %s4010_s3 }
0x26ba   :  { %v2794_v4 = vpop.permute.xlu0 %2793 }
0x26bb   :  { %3660 = vmatmul.mubr.msk.bf16.vlgmr.msra.gmra.mrb[80].mxu1 %vm247_vm2, %v2794_v4 }
0x26bc   :  { %3672 = vmatpush3.bf16.msra.mxu1 %v4002_v8  ;;  %3675 = vmatprep.mubr.msk.bf16.mxu1 %vm4008_vm0, %v4006_v1 }
0x26bd   :  { %3673 = vmatprep.subr.bf16.mxu1 %v4006_v1 }
0x26be   :  { %v2841_v47 = vpop.permute.xlu1 %2840 }
0x26bf   :  { %3668 = vmatmul.mubr.msk.bf16.vlgmr.msra.gmra.mrb[80].mxu0 %vm247_vm2, %v2841_v47 }
0x26c0   :  { %3680 = vmatpush3.bf16.msra.mxu0 %v4003_v56  ;;  %3674 = vmatpush3.bf16.msra.mxu1 %v4004_v39 }
0x26c1   :  { %3681 = vmatprep.subr.bf16.mxu0 %v4006_v1  ;;  %3683 = vmatprep.mubr.msk.bf16.mxu0 %vm4008_vm0, %v4006_v1 }
0x26c4   :  { %3682 = vmatpush3.bf16.msra.mxu0 %v4005_v36 }
0x278e   :  { %v2832_v6 = vpop.f32.mrb[80].mxu1 }
0x278f   :  { %v2887_v35 = vadd.f32 %v4627_v9, %v2832_v6  ;;  %v3661_v14 = vpop.f32.mrb[81].mxu1 }
0x2790   :  { %v2835_v17 = vpop.f32.mrb[82].mxu1 }
0x2791   :  { %3970 = vtanh.f32 %v2887_v35  ;;  %v3662_v32 = vpop.f32.mrb[83].mxu1  ;;  %v3304_v53 = vmul.f32 -1.442695, %v2887_v35 }
0x2792   :  { %v2879_v29 = vpop.f32.mrb[80].mxu0 }
0x2793   :  { %v2888_v51 = vadd.f32 %v4637_v43, %v2879_v29  ;;  %v3669_v5 = vpop.f32.mrb[81].mxu0 }
0x2794   :  { %v2882_v41 = vpop.f32.mrb[82].mxu0 }
0x2795   :  { %3972 = vtanh.f32 %v2888_v51  ;;  %v3670_v38 = vpop.f32.mrb[83].mxu0  ;;  %v3305_v9 = vmul.f32 -1.442695, %v2888_v51 }
0x2796   :  { %3974 = vpow2.f32 %v3304_v53  ;;  %v3744_v38 = vld [vmem:[%s4893_s8] sm:$0xff]  }
0x2797   :  { %3976 = vpow2.f32 %v3305_v9  ;;  %3687 = vmatprep.subr.bf16.mxu1 %v3744_v38 }
0x279b   :  { %v3971_v1 = vpop.eup %3970 }
0x279c   :  { %2905 = vrot.lane.b32.xlu0 %v3971_v1, %s4009_s0  ;;  %v3745_v1 = vld [vmem:[%s4893_s8 + $0x8] sm:$0xff]  }
0x279f   :  { %v3973_v26 = vpop.eup %3972 }
0x27a0   :  { %2916 = vrot.lane.b32.xlu1 %v3973_v26, %s4009_s0  ;;  %v3975_v25 = vpop.eup %3974 }
0x27a1   :  { %v2892_v45 = vadd.f32 1.0, %v3975_v25  ;;  %v3977_v40 = vpop.eup %3976 }
0x27a2   :  { %v2899_v12 = vadd.f32 1.0, %v3977_v40 }
0x27a3   :  { %3978 = vrcp.f32 %v2892_v45 }
0x27a4   :  { %3980 = vrcp.f32 %v2899_v12 }
0x27ad   :  { %v3979_v43 = vpop.eup %3978 }
0x27ae   :  { %v3981_v34 = vpop.eup %3980  ;;  %v2903_v19 = vmul.f32 %v3979_v43, %v4804_v50 }
0x27af   :  { %v2914_v22 = vmul.f32 %v3981_v34, %v4808_v37 }
0x280e   :  { %v2906_v18 = vpop.permute.xlu0 %2905 }
0x280f   :  { %v2908_v28 = vmul.f32 %v3979_v43, %v2906_v18 }
0x2811   :  { %2910 = vrot.lane.b32.xlu0 %v2908_v28, %s4009_s0  ;;  %v3310_v28 = vld [vmem:[%s4894_s9] ss:$0 sm:$0xff] }
0x2812   :  { %v2917_v20 = vpop.permute.xlu1 %2916 }
0x2813   :  { %v2919_v49 = vmul.f32 %v3981_v34, %v2917_v20 }
0x2815   :  { %2921 = vrot.lane.b32.xlu1 %v2919_v49, %s4009_s0 }
0x2883   :  { %v2911_v54 = vpop.permute.xlu0 %2910 }
0x2884   :  { %v2913_v27 = vadd.f32 %v2911_v54, %v2903_v19 }
0x2886   :  { %3982 = vtanh.f32 %v2913_v27 }
0x2887   :  { %v2922_v31 = vpop.permute.xlu1 %2921 }
0x2888   :  { %v2924_v11 = vadd.f32 %v2922_v31, %v2914_v22 }
0x288a   :  { %3984 = vtanh.f32 %v2924_v11 }
0x2890   :  { %v3983_v23 = vpop.eup %3982 }
0x2891   :  { %2927 = vrot.lane.b32.xlu0 %v3983_v23, %s4009_s0 }
0x2894   :  { %v3985_v15 = vpop.eup %3984 }
0x2895   :  { %2933 = vrot.lane.b32.xlu1 %v3985_v15, %s4009_s0 }
0x2903   :  { %v2928_v16 = vpop.permute.xlu0 %2927 }
0x2904   :  { %v2930_v13 = vmul.f32 %v3979_v43, %v2928_v16 }
0x2906   :  { %v2937_v7 = vpack.c.bf16 %v2930_v13, %v2930_v13 }
0x2907   :  { %v2934_v30 = vpop.permute.xlu1 %2933 }
0x2908   :  { %v2936_v44 = vmul.f32 %v3981_v34, %v2934_v30  ;;  %2939 = vrot.lane.b32.xlu0 %v2937_v7, %s4010_s3 }
0x290a   :  { %v2984_v21 = vpack.c.bf16 %v2936_v44, %v2936_v44 }
0x290c   :  { %2986 = vrot.lane.b32.xlu1 %v2984_v21, %s4010_s3 }
0x297a   :  { %v2940_v24 = vpop.permute.xlu0 %2939 }
0x297b   :  { %3676 = vmatmul.mubr.msk.bf16.vlgmr.msra.gmra.mrb[84].mxu1 %vm247_vm2, %v2940_v24 }
0x297c   :  { %3688 = vmatpush3.bf16.msra.mxu1 %v3744_v38 }
0x297d   :  { %3689 = vmatprep.subr.bf16.mxu1 %v3745_v1 }
0x297e   :  { %v2987_v46 = vpop.permute.xlu1 %2986 }
0x297f   :  { %3684 = vmatmul.mubr.msk.bf16.vlgmr.msra.gmra.mrb[84].mxu0 %vm247_vm2, %v2987_v46 }
0x2980   :  { %3690 = vmatpush3.bf16.msra.mxu1 %v3745_v1 }
0x2a4e   :  { %v2978_v48 = vpop.f32.mrb[84].mxu1 }
0x2a4f   :  { %v3033_v50 = vadd.f32 %v4631_v0, %v2978_v48  ;;  %v3677_v60 = vpop.f32.mrb[85].mxu1 }
0x2a50   :  { %v2981_v33 = vpop.f32.mrb[86].mxu1 }
0x2a51   :  { %3986 = vtanh.f32 %v3033_v50  ;;  %v3678_v37 = vpop.f32.mrb[87].mxu1  ;;  %v3308_v52 = vmul.f32 -1.442695, %v3033_v50 }
0x2a52   :  { %v3025_v55 = vpop.f32.mrb[84].mxu0 }
0x2a53   :  { %v3034_v2 = vadd.f32 %v4639_v3, %v3025_v55  ;;  %v3685_v57 = vpop.f32.mrb[85].mxu0 }
0x2a54   :  { %v3028_v59 = vpop.f32.mrb[86].mxu0 }
0x2a55   :  { %3988 = vtanh.f32 %v3034_v2  ;;  %v3686_v58 = vpop.f32.mrb[87].mxu0  ;;  %v3309_v0 = vmul.f32 -1.442695, %v3034_v2 }
0x2a56   :  { %3990 = vpow2.f32 %v3308_v52 }
0x2a57   :  { %3992 = vpow2.f32 %v3309_v0 }
0x2a5b   :  { %v3987_v61 = vpop.eup %3986 }
0x2a5c   :  { %3051 = vrot.lane.b32.xlu0 %v3987_v61, %s4009_s0 }
0x2a5f   :  { %v3989_v63 = vpop.eup %3988 }
0x2a60   :  { %3062 = vrot.lane.b32.xlu1 %v3989_v63, %s4009_s0  ;;  %v3991_v4 = vpop.eup %3990 }
0x2a61   :  { %v3038_v8 = vadd.f32 1.0, %v3991_v4  ;;  %v3993_v47 = vpop.eup %3992 }
0x2a62   :  { %v3045_v56 = vadd.f32 1.0, %v3993_v47 }
0x2a63   :  { %3994 = vrcp.f32 %v3038_v8 }
0x2a64   :  { %3996 = vrcp.f32 %v3045_v56 }
0x2a6d   :  { %v3995_v3 = vpop.eup %3994 }
0x2a6e   :  { %v3997_v6 = vpop.eup %3996  ;;  %v3049_v17 = vmul.f32 %v3995_v3, %v2913_v27 }
0x2a6f   :  { %v3060_v51 = vmul.f32 %v3997_v6, %v2924_v11 }
0x2ace   :  { %v3052_v39 = vpop.permute.xlu0 %3051 }
0x2acf   :  { %v3054_v36 = vmul.f32 %v3995_v3, %v3052_v39 }
0x2ad1   :  { %3056 = vrot.lane.b32.xlu0 %v3054_v36, %s4009_s0 }
0x2ad2   :  { %v3063_v35 = vpop.permute.xlu1 %3062 }
0x2ad3   :  { %v3065_v14 = vmul.f32 %v3997_v6, %v3063_v35 }
0x2ad5   :  { %3067 = vrot.lane.b32.xlu1 %v3065_v14, %s4009_s0 }
0x2b43   :  { %v3057_v32 = vpop.permute.xlu0 %3056 }
0x2b44   :  { %v3059_v29 = vadd.f32 %v3057_v32, %v3049_v17 }
0x2b46   :  { %3998 = vtanh.f32 %v3059_v29 }
0x2b47   :  { %v3068_v5 = vpop.permute.xlu1 %3067 }
0x2b48   :  { %v3070_v41 = vadd.f32 %v3068_v5, %v3060_v51 }
0x2b4a   :  { %4000 = vtanh.f32 %v3070_v41 }
0x2b50   :  { %v3999_v26 = vpop.eup %3998 }
0x2b51   :  { %3073 = vrot.lane.b32.xlu0 %v3999_v26, %s4009_s0 }
0x2b54   :  { %v4001_v53 = vpop.eup %4000 }
0x2b55   :  { %3079 = vrot.lane.b32.xlu1 %v4001_v53, %s4009_s0  ;;  %3098 = vrot.lane.b32.xlu0 %v3083_v62, %s4010_s3 }
0x2bc3   :  { %v3074_v9 = vpop.permute.xlu0 %3073 }
0x2bc4   :  { %v3076_v40 = vmul.f32 %v3995_v3, %v3074_v9 }
0x2bc7   :  { %v3080_v25 = vpop.permute.xlu1 %3079  ;;  %v3099_v45 = vpop.permute.xlu0 %3098 }
0x2bc8   :  { %v3082_v12 = vmul.f32 %v3997_v6, %v3080_v25  ;;  %3691 = vmatprep.mubr.msk.bf16.mxu1 %vm247_vm2, %v3099_v45 }
0x2bca   :  { %v3084_v43 = vpack.c.bf16 %v3082_v12, %v3076_v40 }
0x2bcc   :  { %3100 = vrot.lane.b32.xlu1 %v3084_v43, %s4010_s3 }
0x2c3e   :  { %v3101_v18 = vpop.permute.xlu1 %3100 }
0x2c3f   :  { %3692 = vmatmul.mubr.msk.bf16.vlgmr.msra.gmra.mrb[88].mxu1 %vm247_vm2, %v3101_v18 }
0x2d12   :  { %v3693_v34 = vpop.f32.mrb[88].mxu1 }
0x2d13   :  { %v3163_v42 = vadd.f32 %v3693_v34, %v3310_v28  ;;  %v3154_v10 = vpop.f32.mrb[89].mxu1 }
0x2d14   :  { %v3155_v62 = vadd.f32 %v3310_v28, %v3154_v10  ;;  %v3694_v20 = vpop.f32.mrb[90].mxu1 }
0x2d15   :  { %3172 = vst.msk [vmem:[%s4895_s10 + $0x10] sm:$0xff] %vm3169_vm4, %v3163_v42  ;;  %v3166_v49 = vadd.f32 %v3694_v20, %v3310_v28  ;;  %v3157_v19 = vpop.f32.mrb[91].mxu1 }
0x2d16   :  { %3170 = vst.msk [vmem:[%s4895_s10] sm:$0xff] %vm3169_vm4, %v3155_v62  ;;  %v3158_v54 = vadd.f32 %v3310_v28, %v3157_v19 }
0x2d17   :  { %3173 = vst.msk [vmem:[%s4895_s10 + $0x18] sm:$0xff] %vm3169_vm4, %v3166_v49 }
0x2d18   :  { %3171 = vst.msk [vmem:[%s4895_s10 + $0x8] sm:$0xff] %vm3169_vm4, %v3158_v54 }

</bundles_post_ra>
